<compile_context>
chip_gen: v7x
topology: tpu7x:2x2x1
jax: 0.10.0
libtpu: 0.0.40
codegen_flags: <defaults>
</compile_context>

<pallas_src>
import math
from functools import partial

import jax
import jax.numpy as jnp
from jax.experimental import pallas as pl
from jax.experimental.pallas import tpu as pltpu


# ----------------------- kernel 1: conv stack (3x Conv3x3+ReLU) -----------------------
def conv_stack_kernel(x_ref, w1, b1, w2, b2, w3, b3, o_ref,
                      pad_c, pad32, cols_c, cols32):
    # x_ref: (TB, H, W, C) f32 NHWC
    # w*:    (9*Cin, 32) bf16 im2col weights, b*: (1, 32) f32
    # o_ref: (TB*H*W, 32) bf16
    TB, H, W, C = x_ref.shape

    # zero the halo buffers once; only their interiors are ever rewritten.
    pad_c[...] = jnp.zeros_like(pad_c)
    pad32[...] = jnp.zeros_like(pad32)

    def conv_relu(x, pad_ref, cols_ref, w_ref, b_ref):
        # x: (TB, H, W, Cin) f32
        cin = x.shape[-1]
        cout = w_ref.shape[-1]
        pad_ref[:, 1:H + 1, 1:W + 1, :] = x
        # im2col: gather the 9 shifted taps into a (TB*H*W, 9*Cin) bf16 slab,
        # then one MXU matmul (K = 9*Cin) instead of 9 under-filled ones.
        k = 0
        for di in range(3):
            for dj in range(3):
                cols_ref[:, k * cin:(k + 1) * cin] = (
                    pad_ref[:, di:di + H, dj:dj + W, :]
                    .reshape(TB * H * W, cin).astype(jnp.bfloat16))
                k += 1
        y = jnp.dot(cols_ref[...], w_ref[...],
                    preferred_element_type=jnp.float32) + b_ref[...]
        return jnp.maximum(y, 0.0).reshape(TB, H, W, cout)

    x = conv_relu(x_ref[...], pad_c, cols_c, w1, b1)
    x = conv_relu(x, pad32, cols32, w2, b2)
    x = conv_relu(x, pad32, cols32, w3, b3)            # (TB, H, W, 32)
    o_ref[...] = x.reshape(TB * H * W, 32).astype(jnp.bfloat16)


# ------------------ kernel 2: GNN social embedding + fc1 + action head ------------------
def gnn_head_kernel(soc_ref, cf_ref,
                    gw1, gb1, gw2, gb2, gw3, gb3, gwl, gbl,
                    fws, fwc, fb, aw, ab, o_ref):
    # soc_ref: (TB, h, h) f32; cf_ref: (TB, H*W*32) bf16 (NHWC-flattened conv features)
    TB, h, _ = soc_ref.shape
    f64 = gw1.shape[-1]

    soc = soc_ref[...]
    eye = (jax.lax.broadcasted_iota(jnp.int32, (h, h), 0) ==
           jax.lax.broadcasted_iota(jnp.int32, (h, h), 1)).astype(jnp.float32)
    A = (soc + eye[None, :, :] >= 1.0).astype(jnp.float32)      # (TB, i, j)
    deg = jnp.sum(A, axis=1)                                    # in-degree (col sums)
    dinv = jax.lax.rsqrt(deg)
    # anorm[b, j, i] = dinv[j] * A[i, j] * dinv[i]; reused by all three layers.
    anorm = dinv[:, :, None] * jnp.swapaxes(A, 1, 2) * dinv[:, None, :]

    def prop(xw, b_ref):                                        # xw: (TB, h, 64)
        y = jnp.einsum('bji,bio->bjo', anorm, xw,
                       preferred_element_type=jnp.float32) + b_ref[...]
        return jnp.maximum(y, 0.0)

    # layer 1: node features are one-hot (identity), so X0 @ W1 == W1 broadcast.
    hid = prop(jnp.broadcast_to(gw1[...][None], (TB, h, f64)), gb1)
    for w_ref, b_ref in ((gw2, gb2), (gw3, gb3)):
        xw = jnp.dot(hid.reshape(TB * h, f64), w_ref[...],
                     preferred_element_type=jnp.float32).reshape(TB, h, f64)
        hid = prop(xw, b_ref)

    pooled = jnp.mean(hid, axis=1)                              # global_mean_pool (TB, 64)
    semb = jnp.dot(pooled, gwl[...],
                   preferred_element_type=jnp.float32) + gbl[...]

    # fc1 on cat([social_emb, conv_flat]) == two dots into one f32 accumulator.
    hid_fc = jnp.maximum(
        jnp.dot(semb.astype(jnp.bfloat16), fws[...],
                preferred_element_type=jnp.float32)
        + jnp.dot(cf_ref[...], fwc[...],
                  preferred_element_type=jnp.float32)
        + fb[...], 0.0)
    # action head, padded to 128 lanes (lane-dense store); sliced in the wrapper.
    o_ref[...] = (jnp.dot(hid_fc.astype(jnp.bfloat16), aw[...],
                          preferred_element_type=jnp.float32) + ab[...])


# ------------------------------- parameters -------------------------------
def init_params(key, C, H, W, h, num_outputs, fc_size):
    ks = jax.random.split(key, 12)

    def lin(k, fan_in, fan_out):
        s = 1.0 / math.sqrt(fan_in)
        return jax.random.uniform(k, (fan_in, fan_out), jnp.float32, -s, s)

    p = {}
    # conv stack: Conv2d(C,32,3,1,1) x3, weights in HWIO
    p['conv1_w'] = jax.random.normal(ks[0], (3, 3, C, 32), jnp.float32) / math.sqrt(9 * C)
    p['conv1_b'] = jnp.zeros((1, 32), jnp.float32)
    p['conv2_w'] = jax.random.normal(ks[1], (3, 3, 32, 32), jnp.float32) / math.sqrt(9 * 32)
    p['conv2_b'] = jnp.zeros((1, 32), jnp.float32)
    p['conv3_w'] = jax.random.normal(ks[2], (3, 3, 32, 32), jnp.float32) / math.sqrt(9 * 32)
    p['conv3_b'] = jnp.zeros((1, 32), jnp.float32)
    # social_embedding = GNNModel(64, global_pool=True)
    p['g_w1'] = lin(ks[3], h, 64);  p['g_b1'] = jnp.zeros((1, 64), jnp.float32)
    p['g_w2'] = lin(ks[4], 64, 64); p['g_b2'] = jnp.zeros((1, 64), jnp.float32)
    p['g_w3'] = lin(ks[5], 64, 64); p['g_b3'] = jnp.zeros((1, 64), jnp.float32)
    p['g_wl'] = lin(ks[6], 64, 64)
    p['g_bl'] = jax.random.uniform(ks[7], (1, 64), jnp.float32, -0.125, 0.125)
    # fc1: Linear(32*H*W + 64, fc_size); action_branch: Linear(fc_size, num_outputs)
    fc_in = 32 * H * W + 64
    p['fc1_w'] = lin(ks[8], fc_in, fc_size)
    p['fc1_b'] = jax.random.uniform(ks[9], (1, fc_size), jnp.float32,
                                    -1.0 / math.sqrt(fc_in), 1.0 / math.sqrt(fc_in))
    p['act_w'] = lin(ks[10], fc_size, num_outputs)
    p['act_b'] = jax.random.uniform(ks[11], (1, num_outputs), jnp.float32,
                                    -1.0 / math.sqrt(fc_size), 1.0 / math.sqrt(fc_size))
    return p


def pack_params(p, H, W):
    """One-time repack into kernel-ready layout (im2col conv weights, permuted /
    split fc1 rows, lane-padded action head, bf16 matmul operands)."""
    fc = p['fc1_w'].shape[-1]
    nout = p['act_w'].shape[-1]
    npad = 128 * ((nout + 127) // 128)

    def im2col(w):                       # (3,3,Cin,Cout) -> (9*Cin, Cout)
        kh, kw, ci, co = w.shape
        return w.reshape(kh * kw * ci, co).astype(jnp.bfloat16)

    # fc1 rows: [0:64] -> social embedding, [64:] -> conv features flattened in
    # PyTorch (C,H,W) order.  Permute the conv rows to the kernel's NHWC flatten
    # order (row index h*W*32 + w*32 + c) so no transpose is needed at runtime.
    fw_c = (p['fc1_w'][64:].reshape(32, H, W, fc)
            .transpose(1, 2, 0, 3).reshape(H * W * 32, fc))

    aw = jnp.zeros((fc, npad), jnp.float32).at[:, :nout].set(p['act_w'])
    ab = jnp.zeros((1, npad), jnp.float32).at[:, :nout].set(p['act_b'])

    return dict(
        cw1=im2col(p['conv1_w']), cb1=p['conv1_b'],
        cw2=im2col(p['conv2_w']), cb2=p['conv2_b'],
        cw3=im2col(p['conv3_w']), cb3=p['conv3_b'],
        gw1=p['g_w1'], gb1=p['g_b1'], gw2=p['g_w2'], gb2=p['g_b2'],
        gw3=p['g_w3'], gb3=p['g_b3'], gwl=p['g_wl'], gbl=p['g_bl'],
        fw_s=p['fc1_w'][:64].astype(jnp.bfloat16),
        fw_c=fw_c.astype(jnp.bfloat16),
        fb=p['fc1_b'],
        aw=aw.astype(jnp.bfloat16), ab=ab,
    )


# ------------------------------- forward -------------------------------
@partial(jax.jit, static_argnames=("num_outputs", "tb"))
def torch_gcnn_forward(packed, grid_observation, social_state, *, num_outputs, tb=8):
    # grid_observation: (B, C, H, W) NCHW; social_state: (B, h, h)
    B, C, H, W = grid_observation.shape
    h = social_state.shape[1]
    TB = B if B < tb else tb
    grid = (pl.cdiv(B, TB),)
    cparams = pltpu.CompilerParams(dimension_semantics=("parallel",))

    def wspec(name):  # full-array (resident) spec for a 2-D weight/bias
        return pl.BlockSpec(packed[name].shape, lambda i: (0, 0))

    # ---- kernel 1: conv stack ----
    x_nhwc = jnp.transpose(grid_observation, (0, 2, 3, 1)).astype(jnp.float32)
    conv_out = pl.pallas_call(
        conv_stack_kernel,
        out_shape=jax.ShapeDtypeStruct((B * H * W, 32), jnp.bfloat16),
        grid=grid,
        in_specs=[pl.BlockSpec((TB, H, W, C), lambda i: (i, 0, 0, 0))]
                 + [wspec(k) for k in ("cw1", "cb1", "cw2", "cb2", "cw3", "cb3")],
        out_specs=pl.BlockSpec((TB * H * W, 32), lambda i: (i, 0)),
        scratch_shapes=[
            pltpu.VMEM((TB, H + 2, W + 2, C), jnp.float32),    # halo pad, conv1
            pltpu.VMEM((TB, H + 2, W + 2, 32), jnp.float32),   # halo pad, conv2/3
            pltpu.VMEM((TB * H * W, 9 * C), jnp.bfloat16),     # im2col slab, conv1
            pltpu.VMEM((TB * H * W, 9 * 32), jnp.bfloat16),    # im2col slab, conv2/3
        ],
        compiler_params=cparams,
    )(x_nhwc, packed["cw1"], packed["cb1"], packed["cw2"], packed["cb2"],
      packed["cw3"], packed["cb3"])

    # free row-major reshape (bitcast): (B*H*W, 32) -> (B, H*W*32)
    conv_flat = conv_out.reshape(B, H * W * 32)

    # ---- kernel 2: GNN social embedding + fc1 + action head ----
    wnames = ("gw1", "gb1", "gw2", "gb2", "gw3", "gb3", "gwl", "gbl",
              "fw_s", "fw_c", "fb", "aw", "ab")
    NP = packed["aw"].shape[-1]
    act = pl.pallas_call(
        gnn_head_kernel,
        out_shape=jax.ShapeDtypeStruct((B, NP), jnp.float32),
        grid=grid,
        in_specs=[pl.BlockSpec((TB, h, h), lambda i: (i, 0, 0)),
                  pl.BlockSpec((TB, H * W * 32), lambda i: (i, 0))]
                 + [wspec(k) for k in wnames],
        out_specs=pl.BlockSpec((TB, NP), lambda i: (i, 0)),
        compiler_params=cparams,
    )(social_state.astype(jnp.float32), conv_flat, *(packed[k] for k in wnames))

    # TODO(synk): select_group branch (social_choice GNN), action_mask log-clamp,
    # player_id feature concat and the value branches are not exercised here
    # (defaults: select_group=False, action_mask=None, player_id_shape=(0,)).
    return act[:, :num_outputs].reshape(-1, num_outputs)


if __name__ == "__main__":
    key = jax.random.PRNGKey(0)
    kg, ks, kp = jax.random.split(key, 3)

    # small shapes consistent with the module config
    B = 2
    C, H, W = 4, 8, 8          # grid_observation_shape
    h = 6                      # social_state_shape = (6, 6)
    num_outputs = 8
    fc_size = 128

    grid_observation = jax.random.uniform(kg, (B, C, H, W), jnp.float32)
    social_state = (jax.random.uniform(ks, (B, h, h)) > 0.5).astype(jnp.float32)

    params = init_params(kp, C, H, W, h, num_outputs, fc_size)
    packed = pack_params(params, H, W)          # one-time weight repack (zero runtime cost)

    action = torch_gcnn_forward(packed, grid_observation, social_state,
                                num_outputs=num_outputs)
    action = jax.block_until_ready(action)

    assert action.shape == (B, num_outputs), action.shape
    assert bool(jnp.all(jnp.isfinite(action)))
    print("KERNEL_OK")
</pallas_src>

<mosaic_0001>
module attributes {stable_mosaic.version = 11 : i64} {
  func.func @gnn_head_kernel(%arg0: i32, %arg1: memref<2x6x6xf32, #tpu.memory_space<vmem>>, %arg2: memref<2x2048xbf16, #tpu.memory_space<vmem>>, %arg3: memref<6x64xf32, #tpu.memory_space<vmem>>, %arg4: memref<1x64xf32, #tpu.memory_space<vmem>>, %arg5: memref<64x64xf32, #tpu.memory_space<vmem>>, %arg6: memref<1x64xf32, #tpu.memory_space<vmem>>, %arg7: memref<64x64xf32, #tpu.memory_space<vmem>>, %arg8: memref<1x64xf32, #tpu.memory_space<vmem>>, %arg9: memref<64x64xf32, #tpu.memory_space<vmem>>, %arg10: memref<1x64xf32, #tpu.memory_space<vmem>>, %arg11: memref<64x128xbf16, #tpu.memory_space<vmem>>, %arg12: memref<2048x128xbf16, #tpu.memory_space<vmem>>, %arg13: memref<1x128xf32, #tpu.memory_space<vmem>>, %arg14: memref<128x128xbf16, #tpu.memory_space<vmem>>, %arg15: memref<1x128xf32, #tpu.memory_space<vmem>>, %arg16: memref<2x128xf32, #tpu.memory_space<vmem>>) attributes {dimension_semantics = [#tpu.dimension_semantics<parallel>], iteration_bounds = array<i64: 1>, scalar_prefetch = 0 : i64, scratch_operands = 0 : i64, tpu.core_type = #tpu.core_type<tc>, window_params = [{transform_indices = @transform_0, window_bounds = array<i64: 2, 6, 6>}, {transform_indices = @transform_1, window_bounds = array<i64: 2, 2048>}, {pipeline_mode = #tpu.pipeline_mode<synchronous>, transform_indices = @transform_2, window_bounds = array<i64: 6, 64>}, {pipeline_mode = #tpu.pipeline_mode<synchronous>, transform_indices = @transform_3, window_bounds = array<i64: 1, 64>}, {pipeline_mode = #tpu.pipeline_mode<synchronous>, transform_indices = @transform_4, window_bounds = array<i64: 64, 64>}, {pipeline_mode = #tpu.pipeline_mode<synchronous>, transform_indices = @transform_5, window_bounds = array<i64: 1, 64>}, {pipeline_mode = #tpu.pipeline_mode<synchronous>, transform_indices = @transform_6, window_bounds = array<i64: 64, 64>}, {pipeline_mode = #tpu.pipeline_mode<synchronous>, transform_indices = @transform_7, window_bounds = array<i64: 1, 64>}, {pipeline_mode = #tpu.pipeline_mode<synchronous>, transform_indices = @transform_8, window_bounds = array<i64: 64, 64>}, {pipeline_mode = #tpu.pipeline_mode<synchronous>, transform_indices = @transform_9, window_bounds = array<i64: 1, 64>}, {pipeline_mode = #tpu.pipeline_mode<synchronous>, transform_indices = @transform_10, window_bounds = array<i64: 64, 128>}, {pipeline_mode = #tpu.pipeline_mode<synchronous>, transform_indices = @transform_11, window_bounds = array<i64: 2048, 128>}, {pipeline_mode = #tpu.pipeline_mode<synchronous>, transform_indices = @transform_12, window_bounds = array<i64: 1, 128>}, {pipeline_mode = #tpu.pipeline_mode<synchronous>, transform_indices = @transform_13, window_bounds = array<i64: 128, 128>}, {pipeline_mode = #tpu.pipeline_mode<synchronous>, transform_indices = @transform_14, window_bounds = array<i64: 1, 128>}, {transform_indices = @transform_15, window_bounds = array<i64: 2, 128>}]} {
    %c0 = arith.constant 0 : index
    %c0_0 = arith.constant 0 : index
    %c0_1 = arith.constant 0 : index
    %0 = vector.load %arg1[%c0, %c0_0, %c0_1] : memref<2x6x6xf32, #tpu.memory_space<vmem>>, vector<2x6x6xf32>
    %1 = tpu.iota {dimensions = array<i32: 0>} : vector<6x6xi32>
    %2 = tpu.iota {dimensions = array<i32: 1>} : vector<6x6xi32>
    %3 = arith.cmpi eq, %1, %2 : vector<6x6xi32>
    %4 = arith.extui %3 : vector<6x6xi1> to vector<6x6xi32>
    %5 = arith.sitofp %4 : vector<6x6xi32> to vector<6x6xf32>
    %6 = vector.shape_cast %5 : vector<6x6xf32> to vector<1x6x6xf32>
    %7 = vector.broadcast %6 : vector<1x6x6xf32> to vector<2x6x6xf32>
    %8 = arith.addf %0, %7 : vector<2x6x6xf32>
    %cst = arith.constant 1.000000e+00 : f32
    %9 = vector.broadcast %cst : f32 to vector<2x6x6xf32>
    %10 = arith.cmpf oge, %8, %9 : vector<2x6x6xf32>
    %11 = arith.extui %10 : vector<2x6x6xi1> to vector<2x6x6xi32>
    %12 = arith.sitofp %11 : vector<2x6x6xi32> to vector<2x6x6xf32>
    %cst_2 = arith.constant dense<0.000000e+00> : vector<2x6xf32>
    %13 = vector.multi_reduction <add>, %12, %cst_2 [1] : vector<2x6x6xf32> to vector<2x6xf32>
    %14 = math.rsqrt %13 : vector<2x6xf32>
    %15 = vector.shape_cast %14 : vector<2x6xf32> to vector<2x6x1xf32>
    %16 = tpu.transpose %12, [0, 2, 1] : vector<2x6x6xf32> -> vector<2x6x6xf32>
    %17 = vector.broadcast %15 : vector<2x6x1xf32> to vector<2x6x6xf32>
    %18 = arith.mulf %17, %16 : vector<2x6x6xf32>
    %19 = vector.shape_cast %14 : vector<2x6xf32> to vector<2x1x6xf32>
    %20 = vector.broadcast %19 : vector<2x1x6xf32> to vector<2x6x6xf32>
    %21 = arith.mulf %18, %20 : vector<2x6x6xf32>
    %c0_3 = arith.constant 0 : index
    %c0_4 = arith.constant 0 : index
    %22 = vector.load %arg3[%c0_3, %c0_4] : memref<6x64xf32, #tpu.memory_space<vmem>>, vector<6x64xf32>
    %23 = vector.shape_cast %22 : vector<6x64xf32> to vector<1x6x64xf32>
    %24 = vector.shape_cast %23 : vector<1x6x64xf32> to vector<1x6x64xf32>
    %25 = vector.broadcast %24 : vector<1x6x64xf32> to vector<2x6x64xf32>
    "tpu.trace_start"() <{level = 10 : i32, message = "bji,bio->bjo"}> : () -> ()
    %cst_5 = arith.constant dense<0.000000e+00> : vector<2x6x64xf32>
    %26 = tpu.matmul %21, %25, %cst_5 {dimension_numbers = #tpu.dot_dimension_numbers<[2], [1], [1], [2], [0, 0, 0, 1, 1, 2], [0], [0]>} : vector<2x6x6xf32>, vector<2x6x64xf32>, vector<2x6x64xf32> -> vector<2x6x64xf32>
    "tpu.trace_stop"() : () -> ()
    %c0_6 = arith.constant 0 : index
    %c0_7 = arith.constant 0 : index
    %27 = vector.load %arg4[%c0_6, %c0_7] : memref<1x64xf32, #tpu.memory_space<vmem>>, vector<1x64xf32>
    %28 = vector.shape_cast %27 : vector<1x64xf32> to vector<1x1x64xf32>
    %29 = vector.broadcast %28 : vector<1x1x64xf32> to vector<2x6x64xf32>
    %30 = arith.addf %26, %29 : vector<2x6x64xf32>
    %cst_8 = arith.constant 0.000000e+00 : f32
    %31 = vector.broadcast %cst_8 : f32 to vector<2x6x64xf32>
    %32 = arith.maximumf %30, %31 : vector<2x6x64xf32>
    %33 = vector.shape_cast %32 : vector<2x6x64xf32> to vector<12x64xf32>
    %c0_9 = arith.constant 0 : index
    %c0_10 = arith.constant 0 : index
    %34 = vector.load %arg5[%c0_9, %c0_10] : memref<64x64xf32, #tpu.memory_space<vmem>>, vector<64x64xf32>
    %cst_11 = arith.constant dense<0.000000e+00> : vector<12x64xf32>
    %35 = tpu.matmul %33, %34, %cst_11 {dimension_numbers = #tpu.dot_dimension_numbers<[1], [0], [0], [1], [0, 0, 1, 1], [], []>} : vector<12x64xf32>, vector<64x64xf32>, vector<12x64xf32> -> vector<12x64xf32>
    %36 = vector.shape_cast %35 : vector<12x64xf32> to vector<2x6x64xf32>
    "tpu.trace_start"() <{level = 10 : i32, message = "bji,bio->bjo"}> : () -> ()
    %cst_12 = arith.constant dense<0.000000e+00> : vector<2x6x64xf32>
    %37 = tpu.matmul %21, %36, %cst_12 {dimension_numbers = #tpu.dot_dimension_numbers<[2], [1], [1], [2], [0, 0, 0, 1, 1, 2], [0], [0]>} : vector<2x6x6xf32>, vector<2x6x64xf32>, vector<2x6x64xf32> -> vector<2x6x64xf32>
    "tpu.trace_stop"() : () -> ()
    %c0_13 = arith.constant 0 : index
    %c0_14 = arith.constant 0 : index
    %38 = vector.load %arg6[%c0_13, %c0_14] : memref<1x64xf32, #tpu.memory_space<vmem>>, vector<1x64xf32>
    %39 = vector.shape_cast %38 : vector<1x64xf32> to vector<1x1x64xf32>
    %40 = vector.broadcast %39 : vector<1x1x64xf32> to vector<2x6x64xf32>
    %41 = arith.addf %37, %40 : vector<2x6x64xf32>
    %cst_15 = arith.constant 0.000000e+00 : f32
    %42 = vector.broadcast %cst_15 : f32 to vector<2x6x64xf32>
    %43 = arith.maximumf %41, %42 : vector<2x6x64xf32>
    %44 = vector.shape_cast %43 : vector<2x6x64xf32> to vector<12x64xf32>
    %c0_16 = arith.constant 0 : index
    %c0_17 = arith.constant 0 : index
    %45 = vector.load %arg7[%c0_16, %c0_17] : memref<64x64xf32, #tpu.memory_space<vmem>>, vector<64x64xf32>
    %cst_18 = arith.constant dense<0.000000e+00> : vector<12x64xf32>
    %46 = tpu.matmul %44, %45, %cst_18 {dimension_numbers = #tpu.dot_dimension_numbers<[1], [0], [0], [1], [0, 0, 1, 1], [], []>} : vector<12x64xf32>, vector<64x64xf32>, vector<12x64xf32> -> vector<12x64xf32>
    %47 = vector.shape_cast %46 : vector<12x64xf32> to vector<2x6x64xf32>
    "tpu.trace_start"() <{level = 10 : i32, message = "bji,bio->bjo"}> : () -> ()
    %cst_19 = arith.constant dense<0.000000e+00> : vector<2x6x64xf32>
    %48 = tpu.matmul %21, %47, %cst_19 {dimension_numbers = #tpu.dot_dimension_numbers<[2], [1], [1], [2], [0, 0, 0, 1, 1, 2], [0], [0]>} : vector<2x6x6xf32>, vector<2x6x64xf32>, vector<2x6x64xf32> -> vector<2x6x64xf32>
    "tpu.trace_stop"() : () -> ()
    %c0_20 = arith.constant 0 : index
    %c0_21 = arith.constant 0 : index
    %49 = vector.load %arg8[%c0_20, %c0_21] : memref<1x64xf32, #tpu.memory_space<vmem>>, vector<1x64xf32>
    %50 = vector.shape_cast %49 : vector<1x64xf32> to vector<1x1x64xf32>
    %51 = vector.broadcast %50 : vector<1x1x64xf32> to vector<2x6x64xf32>
    %52 = arith.addf %48, %51 : vector<2x6x64xf32>
    %cst_22 = arith.constant 0.000000e+00 : f32
    %53 = vector.broadcast %cst_22 : f32 to vector<2x6x64xf32>
    %54 = arith.maximumf %52, %53 : vector<2x6x64xf32>
    %cst_23 = arith.constant dense<0.000000e+00> : vector<2x64xf32>
    %55 = vector.multi_reduction <add>, %54, %cst_23 [1] : vector<2x6x64xf32> to vector<2x64xf32>
    %cst_24 = arith.constant 6.000000e+00 : f32
    %56 = vector.broadcast %cst_24 : f32 to vector<2x64xf32>
    %57 = arith.divf %55, %56 : vector<2x64xf32>
    %c0_25 = arith.constant 0 : index
    %c0_26 = arith.constant 0 : index
    %58 = vector.load %arg9[%c0_25, %c0_26] : memref<64x64xf32, #tpu.memory_space<vmem>>, vector<64x64xf32>
    %cst_27 = arith.constant dense<0.000000e+00> : vector<2x64xf32>
    %59 = tpu.matmul %57, %58, %cst_27 {dimension_numbers = #tpu.dot_dimension_numbers<[1], [0], [0], [1], [0, 0, 1, 1], [], []>} : vector<2x64xf32>, vector<64x64xf32>, vector<2x64xf32> -> vector<2x64xf32>
    %c0_28 = arith.constant 0 : index
    %c0_29 = arith.constant 0 : index
    %60 = vector.load %arg10[%c0_28, %c0_29] : memref<1x64xf32, #tpu.memory_space<vmem>>, vector<1x64xf32>
    %61 = vector.broadcast %60 : vector<1x64xf32> to vector<2x64xf32>
    %62 = arith.addf %59, %61 : vector<2x64xf32>
    %63 = arith.truncf %62 : vector<2x64xf32> to vector<2x64xbf16>
    %c0_30 = arith.constant 0 : index
    %c0_31 = arith.constant 0 : index
    %64 = vector.load %arg11[%c0_30, %c0_31] : memref<64x128xbf16, #tpu.memory_space<vmem>>, vector<64x128xbf16>
    %cst_32 = arith.constant dense<0.000000e+00> : vector<2x128xf32>
    %65 = tpu.matmul %63, %64, %cst_32 {dimension_numbers = #tpu.dot_dimension_numbers<[1], [0], [0], [1], [0, 0, 1, 1], [], []>} : vector<2x64xbf16>, vector<64x128xbf16>, vector<2x128xf32> -> vector<2x128xf32>
    %c0_33 = arith.constant 0 : index
    %c0_34 = arith.constant 0 : index
    %66 = vector.load %arg2[%c0_33, %c0_34] : memref<2x2048xbf16, #tpu.memory_space<vmem>>, vector<2x2048xbf16>
    %c0_35 = arith.constant 0 : index
    %c0_36 = arith.constant 0 : index
    %67 = vector.load %arg12[%c0_35, %c0_36] : memref<2048x128xbf16, #tpu.memory_space<vmem>>, vector<2048x128xbf16>
    %cst_37 = arith.constant dense<0.000000e+00> : vector<2x128xf32>
    %68 = tpu.matmul %66, %67, %cst_37 {dimension_numbers = #tpu.dot_dimension_numbers<[1], [0], [0], [1], [0, 0, 1, 1], [], []>} : vector<2x2048xbf16>, vector<2048x128xbf16>, vector<2x128xf32> -> vector<2x128xf32>
    %69 = arith.addf %65, %68 : vector<2x128xf32>
    %c0_38 = arith.constant 0 : index
    %c0_39 = arith.constant 0 : index
    %70 = vector.load %arg13[%c0_38, %c0_39] : memref<1x128xf32, #tpu.memory_space<vmem>>, vector<1x128xf32>
    %71 = vector.broadcast %70 : vector<1x128xf32> to vector<2x128xf32>
    %72 = arith.addf %69, %71 : vector<2x128xf32>
    %cst_40 = arith.constant 0.000000e+00 : f32
    %73 = vector.broadcast %cst_40 : f32 to vector<2x128xf32>
    %74 = arith.maximumf %72, %73 : vector<2x128xf32>
    %75 = arith.truncf %74 : vector<2x128xf32> to vector<2x128xbf16>
    %c0_41 = arith.constant 0 : index
    %c0_42 = arith.constant 0 : index
    %76 = vector.load %arg14[%c0_41, %c0_42] : memref<128x128xbf16, #tpu.memory_space<vmem>>, vector<128x128xbf16>
    %cst_43 = arith.constant dense<0.000000e+00> : vector<2x128xf32>
    %77 = tpu.matmul %75, %76, %cst_43 {dimension_numbers = #tpu.dot_dimension_numbers<[1], [0], [0], [1], [0, 0, 1, 1], [], []>} : vector<2x128xbf16>, vector<128x128xbf16>, vector<2x128xf32> -> vector<2x128xf32>
    %c0_44 = arith.constant 0 : index
    %c0_45 = arith.constant 0 : index
    %78 = vector.load %arg15[%c0_44, %c0_45] : memref<1x128xf32, #tpu.memory_space<vmem>>, vector<1x128xf32>
    %79 = vector.broadcast %78 : vector<1x128xf32> to vector<2x128xf32>
    %80 = arith.addf %77, %79 : vector<2x128xf32>
    %c0_46 = arith.constant 0 : index
    %c0_47 = arith.constant 0 : index
    %81 = vector.load %arg16[%c0_46, %c0_47] : memref<2x128xf32, #tpu.memory_space<vmem>>, vector<2x128xf32>
    tpu.vector_store %arg16[%c0_46, %c0_47], %80 {strides = array<i32>} : memref<2x128xf32, #tpu.memory_space<vmem>>, vector<2x128xf32>,
    return
  }
  func.func @transform_0(%arg0: i32) -> (i32, i32, i32) {
    %c0_i32 = arith.constant 0 : i32
    %c0_i32_0 = arith.constant 0 : i32
    %c0_i32_1 = arith.constant 0 : i32
    return %arg0, %c0_i32, %c0_i32_0 : i32, i32, i32
  }
  func.func @transform_1(%arg0: i32) -> (i32, i32) {
    %c0_i32 = arith.constant 0 : i32
    %c0_i32_0 = arith.constant 0 : i32
    return %arg0, %c0_i32 : i32, i32
  }
  func.func @transform_2(%arg0: i32) -> (i32, i32) {
    %c0_i32 = arith.constant 0 : i32
    %c0_i32_0 = arith.constant 0 : i32
    %c0_i32_1 = arith.constant 0 : i32
    return %c0_i32, %c0_i32_0 : i32, i32
  }
  func.func @transform_3(%arg0: i32) -> (i32, i32) {
    %c0_i32 = arith.constant 0 : i32
    %c0_i32_0 = arith.constant 0 : i32
    %c0_i32_1 = arith.constant 0 : i32
    return %c0_i32, %c0_i32_0 : i32, i32
  }
  func.func @transform_4(%arg0: i32) -> (i32, i32) {
    %c0_i32 = arith.constant 0 : i32
    %c0_i32_0 = arith.constant 0 : i32
    %c0_i32_1 = arith.constant 0 : i32
    return %c0_i32, %c0_i32_0 : i32, i32
  }
  func.func @transform_5(%arg0: i32) -> (i32, i32) {
    %c0_i32 = arith.constant 0 : i32
    %c0_i32_0 = arith.constant 0 : i32
    %c0_i32_1 = arith.constant 0 : i32
    return %c0_i32, %c0_i32_0 : i32, i32
  }
  func.func @transform_6(%arg0: i32) -> (i32, i32) {
    %c0_i32 = arith.constant 0 : i32
    %c0_i32_0 = arith.constant 0 : i32
    %c0_i32_1 = arith.constant 0 : i32
    return %c0_i32, %c0_i32_0 : i32, i32
  }
  func.func @transform_7(%arg0: i32) -> (i32, i32) {
    %c0_i32 = arith.constant 0 : i32
    %c0_i32_0 = arith.constant 0 : i32
    %c0_i32_1 = arith.constant 0 : i32
    return %c0_i32, %c0_i32_0 : i32, i32
  }
  func.func @transform_8(%arg0: i32) -> (i32, i32) {
    %c0_i32 = arith.constant 0 : i32
    %c0_i32_0 = arith.constant 0 : i32
    %c0_i32_1 = arith.constant 0 : i32
    return %c0_i32, %c0_i32_0 : i32, i32
  }
  func.func @transform_9(%arg0: i32) -> (i32, i32) {
    %c0_i32 = arith.constant 0 : i32
    %c0_i32_0 = arith.constant 0 : i32
    %c0_i32_1 = arith.constant 0 : i32
    return %c0_i32, %c0_i32_0 : i32, i32
  }
  func.func @transform_10(%arg0: i32) -> (i32, i32) {
    %c0_i32 = arith.constant 0 : i32
    %c0_i32_0 = arith.constant 0 : i32
    %c0_i32_1 = arith.constant 0 : i32
    return %c0_i32, %c0_i32_0 : i32, i32
  }
  func.func @transform_11(%arg0: i32) -> (i32, i32) {
    %c0_i32 = arith.constant 0 : i32
    %c0_i32_0 = arith.constant 0 : i32
    %c0_i32_1 = arith.constant 0 : i32
    return %c0_i32, %c0_i32_0 : i32, i32
  }
  func.func @transform_12(%arg0: i32) -> (i32, i32) {
    %c0_i32 = arith.constant 0 : i32
    %c0_i32_0 = arith.constant 0 : i32
    %c0_i32_1 = arith.constant 0 : i32
    return %c0_i32, %c0_i32_0 : i32, i32
  }
  func.func @transform_13(%arg0: i32) -> (i32, i32) {
    %c0_i32 = arith.constant 0 : i32
    %c0_i32_0 = arith.constant 0 : i32
    %c0_i32_1 = arith.constant 0 : i32
    return %c0_i32, %c0_i32_0 : i32, i32
  }
  func.func @transform_14(%arg0: i32) -> (i32, i32) {
    %c0_i32 = arith.constant 0 : i32
    %c0_i32_0 = arith.constant 0 : i32
    %c0_i32_1 = arith.constant 0 : i32
    return %c0_i32, %c0_i32_0 : i32, i32
  }
  func.func @transform_15(%arg0: i32) -> (i32, i32) {
    %c0_i32 = arith.constant 0 : i32
    %c0_i32_0 = arith.constant 0 : i32
    return %arg0, %c0_i32 : i32, i32
  }
}

module attributes {stable_mosaic.version = 11 : i64} {
  func.func @conv_stack_kernel(%arg0: i32, %arg1: memref<2x8x8x4xf32, #tpu.memory_space<vmem>>, %arg2: memref<36x32xbf16, #tpu.memory_space<vmem>>, %arg3: memref<1x32xf32, #tpu.memory_space<vmem>>, %arg4: memref<288x32xbf16, #tpu.memory_space<vmem>>, %arg5: memref<1x32xf32, #tpu.memory_space<vmem>>, %arg6: memref<288x32xbf16, #tpu.memory_space<vmem>>, %arg7: memref<1x32xf32, #tpu.memory_space<vmem>>, %arg8: memref<128x32xbf16, #tpu.memory_space<vmem>>, %arg9: memref<2x10x10x4xf32, #tpu.memory_space<vmem>>, %arg10: memref<2x10x10x32xf32, #tpu.memory_space<vmem>>, %arg11: memref<128x36xbf16, #tpu.memory_space<vmem>>, %arg12: memref<128x288xbf16, #tpu.memory_space<vmem>>) attributes {dimension_semantics = [#tpu.dimension_semantics<parallel>], iteration_bounds = array<i64: 1>, scalar_prefetch = 0 : i64, scratch_operands = 4 : i64, tpu.core_type = #tpu.core_type<tc>, window_params = [{transform_indices = @transform_0, window_bounds = array<i64: 2, 8, 8, 4>}, {pipeline_mode = #tpu.pipeline_mode<synchronous>, transform_indices = @transform_1, window_bounds = array<i64: 36, 32>}, {pipeline_mode = #tpu.pipeline_mode<synchronous>, transform_indices = @transform_2, window_bounds = array<i64: 1, 32>}, {pipeline_mode = #tpu.pipeline_mode<synchronous>, transform_indices = @transform_3, window_bounds = array<i64: 288, 32>}, {pipeline_mode = #tpu.pipeline_mode<synchronous>, transform_indices = @transform_4, window_bounds = array<i64: 1, 32>}, {pipeline_mode = #tpu.pipeline_mode<synchronous>, transform_indices = @transform_5, window_bounds = array<i64: 288, 32>}, {pipeline_mode = #tpu.pipeline_mode<synchronous>, transform_indices = @transform_6, window_bounds = array<i64: 1, 32>}, {transform_indices = @transform_7, window_bounds = array<i64: 128, 32>}]} {
    %cst = arith.constant 0.000000e+00 : f32
    %0 = vector.broadcast %cst : f32 to vector<2x10x10x4xf32>
    %c0 = arith.constant 0 : index
    %c0_0 = arith.constant 0 : index
    %c0_1 = arith.constant 0 : index
    %c0_2 = arith.constant 0 : index
    %1 = vector.load %arg9[%c0, %c0_0, %c0_1, %c0_2] : memref<2x10x10x4xf32, #tpu.memory_space<vmem>>, vector<2x10x10x4xf32>
    tpu.vector_store %arg9[%c0, %c0_0, %c0_1, %c0_2], %0 {strides = array<i32>} : memref<2x10x10x4xf32, #tpu.memory_space<vmem>>, vector<2x10x10x4xf32>,
    %cst_3 = arith.constant 0.000000e+00 : f32
    %2 = vector.broadcast %cst_3 : f32 to vector<2x10x10x32xf32>
    %c0_4 = arith.constant 0 : index
    %c0_5 = arith.constant 0 : index
    %c0_6 = arith.constant 0 : index
    %c0_7 = arith.constant 0 : index
    %3 = vector.load %arg10[%c0_4, %c0_5, %c0_6, %c0_7] : memref<2x10x10x32xf32, #tpu.memory_space<vmem>>, vector<2x10x10x32xf32>
    tpu.vector_store %arg10[%c0_4, %c0_5, %c0_6, %c0_7], %2 {strides = array<i32>} : memref<2x10x10x32xf32, #tpu.memory_space<vmem>>, vector<2x10x10x32xf32>,
    %c0_8 = arith.constant 0 : index
    %c0_9 = arith.constant 0 : index
    %c0_10 = arith.constant 0 : index
    %c0_11 = arith.constant 0 : index
    %4 = vector.load %arg1[%c0_8, %c0_9, %c0_10, %c0_11] : memref<2x8x8x4xf32, #tpu.memory_space<vmem>>, vector<2x8x8x4xf32>
    %c0_12 = arith.constant 0 : index
    %c1 = arith.constant 1 : index
    %c1_13 = arith.constant 1 : index
    %c0_14 = arith.constant 0 : index
    %5 = vector.load %arg9[%c0_12, %c1, %c1_13, %c0_14] : memref<2x10x10x4xf32, #tpu.memory_space<vmem>>, vector<2x8x8x4xf32>
    tpu.vector_store %arg9[%c0_12, %c1, %c1_13, %c0_14], %4 {strides = array<i32>} : memref<2x10x10x4xf32, #tpu.memory_space<vmem>>, vector<2x8x8x4xf32>,
    %c0_15 = arith.constant 0 : index
    %c0_16 = arith.constant 0 : index
    %c0_17 = arith.constant 0 : index
    %c0_18 = arith.constant 0 : index
    %6 = vector.load %arg9[%c0_15, %c0_16, %c0_17, %c0_18] : memref<2x10x10x4xf32, #tpu.memory_space<vmem>>, vector<2x8x8x4xf32>
    %7 = vector.shape_cast %6 : vector<2x8x8x4xf32> to vector<128x4xf32>
    %8 = arith.truncf %7 : vector<128x4xf32> to vector<128x4xbf16>
    %c0_19 = arith.constant 0 : index
    %c0_20 = arith.constant 0 : index
    %9 = vector.load %arg11[%c0_19, %c0_20] : memref<128x36xbf16, #tpu.memory_space<vmem>>, vector<128x4xbf16>
    tpu.vector_store %arg11[%c0_19, %c0_20], %8 {strides = array<i32>} : memref<128x36xbf16, #tpu.memory_space<vmem>>, vector<128x4xbf16>,
    %c0_21 = arith.constant 0 : index
    %c0_22 = arith.constant 0 : index
    %c1_23 = arith.constant 1 : index
    %c0_24 = arith.constant 0 : index
    %10 = vector.load %arg9[%c0_21, %c0_22, %c1_23, %c0_24] : memref<2x10x10x4xf32, #tpu.memory_space<vmem>>, vector<2x8x8x4xf32>
    %11 = vector.shape_cast %10 : vector<2x8x8x4xf32> to vector<128x4xf32>
    %12 = arith.truncf %11 : vector<128x4xf32> to vector<128x4xbf16>
    %c0_25 = arith.constant 0 : index
    %c4 = arith.constant 4 : index
    %13 = vector.load %arg11[%c0_25, %c4] : memref<128x36xbf16, #tpu.memory_space<vmem>>, vector<128x4xbf16>
    tpu.vector_store %arg11[%c0_25, %c4], %12 {strides = array<i32>} : memref<128x36xbf16, #tpu.memory_space<vmem>>, vector<128x4xbf16>,
    %c0_26 = arith.constant 0 : index
    %c0_27 = arith.constant 0 : index
    %c2 = arith.constant 2 : index
    %c0_28 = arith.constant 0 : index
    %14 = vector.load %arg9[%c0_26, %c0_27, %c2, %c0_28] : memref<2x10x10x4xf32, #tpu.memory_space<vmem>>, vector<2x8x8x4xf32>
    %15 = vector.shape_cast %14 : vector<2x8x8x4xf32> to vector<128x4xf32>
    %16 = arith.truncf %15 : vector<128x4xf32> to vector<128x4xbf16>
    %c0_29 = arith.constant 0 : index
    %c8 = arith.constant 8 : index
    %17 = vector.load %arg11[%c0_29, %c8] : memref<128x36xbf16, #tpu.memory_space<vmem>>, vector<128x4xbf16>
    tpu.vector_store %arg11[%c0_29, %c8], %16 {strides = array<i32>} : memref<128x36xbf16, #tpu.memory_space<vmem>>, vector<128x4xbf16>,
    %c0_30 = arith.constant 0 : index
    %c1_31 = arith.constant 1 : index
    %c0_32 = arith.constant 0 : index
    %c0_33 = arith.constant 0 : index
    %18 = vector.load %arg9[%c0_30, %c1_31, %c0_32, %c0_33] : memref<2x10x10x4xf32, #tpu.memory_space<vmem>>, vector<2x8x8x4xf32>
    %19 = vector.shape_cast %18 : vector<2x8x8x4xf32> to vector<128x4xf32>
    %20 = arith.truncf %19 : vector<128x4xf32> to vector<128x4xbf16>
    %c0_34 = arith.constant 0 : index
    %c12 = arith.constant 12 : index
    %21 = vector.load %arg11[%c0_34, %c12] : memref<128x36xbf16, #tpu.memory_space<vmem>>, vector<128x4xbf16>
    tpu.vector_store %arg11[%c0_34, %c12], %20 {strides = array<i32>} : memref<128x36xbf16, #tpu.memory_space<vmem>>, vector<128x4xbf16>,
    %c0_35 = arith.constant 0 : index
    %c1_36 = arith.constant 1 : index
    %c1_37 = arith.constant 1 : index
    %c0_38 = arith.constant 0 : index
    %22 = vector.load %arg9[%c0_35, %c1_36, %c1_37, %c0_38] : memref<2x10x10x4xf32, #tpu.memory_space<vmem>>, vector<2x8x8x4xf32>
    %23 = vector.shape_cast %22 : vector<2x8x8x4xf32> to vector<128x4xf32>
    %24 = arith.truncf %23 : vector<128x4xf32> to vector<128x4xbf16>
    %c0_39 = arith.constant 0 : index
    %c16 = arith.constant 16 : index
    %25 = vector.load %arg11[%c0_39, %c16] : memref<128x36xbf16, #tpu.memory_space<vmem>>, vector<128x4xbf16>
    tpu.vector_store %arg11[%c0_39, %c16], %24 {strides = array<i32>} : memref<128x36xbf16, #tpu.memory_space<vmem>>, vector<128x4xbf16>,
    %c0_40 = arith.constant 0 : index
    %c1_41 = arith.constant 1 : index
    %c2_42 = arith.constant 2 : index
    %c0_43 = arith.constant 0 : index
    %26 = vector.load %arg9[%c0_40, %c1_41, %c2_42, %c0_43] : memref<2x10x10x4xf32, #tpu.memory_space<vmem>>, vector<2x8x8x4xf32>
    %27 = vector.shape_cast %26 : vector<2x8x8x4xf32> to vector<128x4xf32>
    %28 = arith.truncf %27 : vector<128x4xf32> to vector<128x4xbf16>
    %c0_44 = arith.constant 0 : index
    %c20 = arith.constant 20 : index
    %29 = vector.load %arg11[%c0_44, %c20] : memref<128x36xbf16, #tpu.memory_space<vmem>>, vector<128x4xbf16>
    tpu.vector_store %arg11[%c0_44, %c20], %28 {strides = array<i32>} : memref<128x36xbf16, #tpu.memory_space<vmem>>, vector<128x4xbf16>,
    %c0_45 = arith.constant 0 : index
    %c2_46 = arith.constant 2 : index
    %c0_47 = arith.constant 0 : index
    %c0_48 = arith.constant 0 : index
    %30 = vector.load %arg9[%c0_45, %c2_46, %c0_47, %c0_48] : memref<2x10x10x4xf32, #tpu.memory_space<vmem>>, vector<2x8x8x4xf32>
    %31 = vector.shape_cast %30 : vector<2x8x8x4xf32> to vector<128x4xf32>
    %32 = arith.truncf %31 : vector<128x4xf32> to vector<128x4xbf16>
    %c0_49 = arith.constant 0 : index
    %c24 = arith.constant 24 : index
    %33 = vector.load %arg11[%c0_49, %c24] : memref<128x36xbf16, #tpu.memory_space<vmem>>, vector<128x4xbf16>
    tpu.vector_store %arg11[%c0_49, %c24], %32 {strides = array<i32>} : memref<128x36xbf16, #tpu.memory_space<vmem>>, vector<128x4xbf16>,
    %c0_50 = arith.constant 0 : index
    %c2_51 = arith.constant 2 : index
    %c1_52 = arith.constant 1 : index
    %c0_53 = arith.constant 0 : index
    %34 = vector.load %arg9[%c0_50, %c2_51, %c1_52, %c0_53] : memref<2x10x10x4xf32, #tpu.memory_space<vmem>>, vector<2x8x8x4xf32>
    %35 = vector.shape_cast %34 : vector<2x8x8x4xf32> to vector<128x4xf32>
    %36 = arith.truncf %35 : vector<128x4xf32> to vector<128x4xbf16>
    %c0_54 = arith.constant 0 : index
    %c28 = arith.constant 28 : index
    %37 = vector.load %arg11[%c0_54, %c28] : memref<128x36xbf16, #tpu.memory_space<vmem>>, vector<128x4xbf16>
    tpu.vector_store %arg11[%c0_54, %c28], %36 {strides = array<i32>} : memref<128x36xbf16, #tpu.memory_space<vmem>>, vector<128x4xbf16>,
    %c0_55 = arith.constant 0 : index
    %c2_56 = arith.constant 2 : index
    %c2_57 = arith.constant 2 : index
    %c0_58 = arith.constant 0 : index
    %38 = vector.load %arg9[%c0_55, %c2_56, %c2_57, %c0_58] : memref<2x10x10x4xf32, #tpu.memory_space<vmem>>, vector<2x8x8x4xf32>
    %39 = vector.shape_cast %38 : vector<2x8x8x4xf32> to vector<128x4xf32>
    %40 = arith.truncf %39 : vector<128x4xf32> to vector<128x4xbf16>
    %c0_59 = arith.constant 0 : index
    %c32 = arith.constant 32 : index
    %41 = vector.load %arg11[%c0_59, %c32] : memref<128x36xbf16, #tpu.memory_space<vmem>>, vector<128x4xbf16>
    tpu.vector_store %arg11[%c0_59, %c32], %40 {strides = array<i32>} : memref<128x36xbf16, #tpu.memory_space<vmem>>, vector<128x4xbf16>,
    %c0_60 = arith.constant 0 : index
    %c0_61 = arith.constant 0 : index
    %42 = vector.load %arg11[%c0_60, %c0_61] : memref<128x36xbf16, #tpu.memory_space<vmem>>, vector<128x36xbf16>
    %c0_62 = arith.constant 0 : index
    %c0_63 = arith.constant 0 : index
    %43 = vector.load %arg2[%c0_62, %c0_63] : memref<36x32xbf16, #tpu.memory_space<vmem>>, vector<36x32xbf16>
    %cst_64 = arith.constant dense<0.000000e+00> : vector<128x32xf32>
    %44 = tpu.matmul %42, %43, %cst_64 {dimension_numbers = #tpu.dot_dimension_numbers<[1], [0], [0], [1], [0, 0, 1, 1], [], []>} : vector<128x36xbf16>, vector<36x32xbf16>, vector<128x32xf32> -> vector<128x32xf32>
    %c0_65 = arith.constant 0 : index
    %c0_66 = arith.constant 0 : index
    %45 = vector.load %arg3[%c0_65, %c0_66] : memref<1x32xf32, #tpu.memory_space<vmem>>, vector<1x32xf32>
    %46 = vector.broadcast %45 : vector<1x32xf32> to vector<128x32xf32>
    %47 = arith.addf %44, %46 : vector<128x32xf32>
    %cst_67 = arith.constant 0.000000e+00 : f32
    %48 = vector.broadcast %cst_67 : f32 to vector<128x32xf32>
    %49 = arith.maximumf %47, %48 : vector<128x32xf32>
    %50 = vector.shape_cast %49 : vector<128x32xf32> to vector<2x8x8x32xf32>
    %c0_68 = arith.constant 0 : index
    %c1_69 = arith.constant 1 : index
    %c1_70 = arith.constant 1 : index
    %c0_71 = arith.constant 0 : index
    %51 = vector.load %arg10[%c0_68, %c1_69, %c1_70, %c0_71] : memref<2x10x10x32xf32, #tpu.memory_space<vmem>>, vector<2x8x8x32xf32>
    tpu.vector_store %arg10[%c0_68, %c1_69, %c1_70, %c0_71], %50 {strides = array<i32>} : memref<2x10x10x32xf32, #tpu.memory_space<vmem>>, vector<2x8x8x32xf32>,
    %c0_72 = arith.constant 0 : index
    %c0_73 = arith.constant 0 : index
    %c0_74 = arith.constant 0 : index
    %c0_75 = arith.constant 0 : index
    %52 = vector.load %arg10[%c0_72, %c0_73, %c0_74, %c0_75] : memref<2x10x10x32xf32, #tpu.memory_space<vmem>>, vector<2x8x8x32xf32>
    %53 = vector.shape_cast %52 : vector<2x8x8x32xf32> to vector<128x32xf32>
    %54 = arith.truncf %53 : vector<128x32xf32> to vector<128x32xbf16>
    %c0_76 = arith.constant 0 : index
    %c0_77 = arith.constant 0 : index
    %55 = vector.load %arg12[%c0_76, %c0_77] : memref<128x288xbf16, #tpu.memory_space<vmem>>, vector<128x32xbf16>
    tpu.vector_store %arg12[%c0_76, %c0_77], %54 {strides = array<i32>} : memref<128x288xbf16, #tpu.memory_space<vmem>>, vector<128x32xbf16>,
    %c0_78 = arith.constant 0 : index
    %c0_79 = arith.constant 0 : index
    %c1_80 = arith.constant 1 : index
    %c0_81 = arith.constant 0 : index
    %56 = vector.load %arg10[%c0_78, %c0_79, %c1_80, %c0_81] : memref<2x10x10x32xf32, #tpu.memory_space<vmem>>, vector<2x8x8x32xf32>
    %57 = vector.shape_cast %56 : vector<2x8x8x32xf32> to vector<128x32xf32>
    %58 = arith.truncf %57 : vector<128x32xf32> to vector<128x32xbf16>
    %c0_82 = arith.constant 0 : index
    %c32_83 = arith.constant 32 : index
    %59 = vector.load %arg12[%c0_82, %c32_83] : memref<128x288xbf16, #tpu.memory_space<vmem>>, vector<128x32xbf16>
    tpu.vector_store %arg12[%c0_82, %c32_83], %58 {strides = array<i32>} : memref<128x288xbf16, #tpu.memory_space<vmem>>, vector<128x32xbf16>,
    %c0_84 = arith.constant 0 : index
    %c0_85 = arith.constant 0 : index
    %c2_86 = arith.constant 2 : index
    %c0_87 = arith.constant 0 : index
    %60 = vector.load %arg10[%c0_84, %c0_85, %c2_86, %c0_87] : memref<2x10x10x32xf32, #tpu.memory_space<vmem>>, vector<2x8x8x32xf32>
    %61 = vector.shape_cast %60 : vector<2x8x8x32xf32> to vector<128x32xf32>
    %62 = arith.truncf %61 : vector<128x32xf32> to vector<128x32xbf16>
    %c0_88 = arith.constant 0 : index
    %c64 = arith.constant 64 : index
    %63 = vector.load %arg12[%c0_88, %c64] : memref<128x288xbf16, #tpu.memory_space<vmem>>, vector<128x32xbf16>
    tpu.vector_store %arg12[%c0_88, %c64], %62 {strides = array<i32>} : memref<128x288xbf16, #tpu.memory_space<vmem>>, vector<128x32xbf16>,
    %c0_89 = arith.constant 0 : index
    %c1_90 = arith.constant 1 : index
    %c0_91 = arith.constant 0 : index
    %c0_92 = arith.constant 0 : index
    %64 = vector.load %arg10[%c0_89, %c1_90, %c0_91, %c0_92] : memref<2x10x10x32xf32, #tpu.memory_space<vmem>>, vector<2x8x8x32xf32>
    %65 = vector.shape_cast %64 : vector<2x8x8x32xf32> to vector<128x32xf32>
    %66 = arith.truncf %65 : vector<128x32xf32> to vector<128x32xbf16>
    %c0_93 = arith.constant 0 : index
    %c96 = arith.constant 96 : index
    %67 = vector.load %arg12[%c0_93, %c96] : memref<128x288xbf16, #tpu.memory_space<vmem>>, vector<128x32xbf16>
    tpu.vector_store %arg12[%c0_93, %c96], %66 {strides = array<i32>} : memref<128x288xbf16, #tpu.memory_space<vmem>>, vector<128x32xbf16>,
    %c0_94 = arith.constant 0 : index
    %c1_95 = arith.constant 1 : index
    %c1_96 = arith.constant 1 : index
    %c0_97 = arith.constant 0 : index
    %68 = vector.load %arg10[%c0_94, %c1_95, %c1_96, %c0_97] : memref<2x10x10x32xf32, #tpu.memory_space<vmem>>, vector<2x8x8x32xf32>
    %69 = vector.shape_cast %68 : vector<2x8x8x32xf32> to vector<128x32xf32>
    %70 = arith.truncf %69 : vector<128x32xf32> to vector<128x32xbf16>
    %c0_98 = arith.constant 0 : index
    %c128 = arith.constant 128 : index
    %71 = vector.load %arg12[%c0_98, %c128] : memref<128x288xbf16, #tpu.memory_space<vmem>>, vector<128x32xbf16>
    tpu.vector_store %arg12[%c0_98, %c128], %70 {strides = array<i32>} : memref<128x288xbf16, #tpu.memory_space<vmem>>, vector<128x32xbf16>,
    %c0_99 = arith.constant 0 : index
    %c1_100 = arith.constant 1 : index
    %c2_101 = arith.constant 2 : index
    %c0_102 = arith.constant 0 : index
    %72 = vector.load %arg10[%c0_99, %c1_100, %c2_101, %c0_102] : memref<2x10x10x32xf32, #tpu.memory_space<vmem>>, vector<2x8x8x32xf32>
    %73 = vector.shape_cast %72 : vector<2x8x8x32xf32> to vector<128x32xf32>
    %74 = arith.truncf %73 : vector<128x32xf32> to vector<128x32xbf16>
    %c0_103 = arith.constant 0 : index
    %c160 = arith.constant 160 : index
    %75 = vector.load %arg12[%c0_103, %c160] : memref<128x288xbf16, #tpu.memory_space<vmem>>, vector<128x32xbf16>
    tpu.vector_store %arg12[%c0_103, %c160], %74 {strides = array<i32>} : memref<128x288xbf16, #tpu.memory_space<vmem>>, vector<128x32xbf16>,
    %c0_104 = arith.constant 0 : index
    %c2_105 = arith.constant 2 : index
    %c0_106 = arith.constant 0 : index
    %c0_107 = arith.constant 0 : index
    %76 = vector.load %arg10[%c0_104, %c2_105, %c0_106, %c0_107] : memref<2x10x10x32xf32, #tpu.memory_space<vmem>>, vector<2x8x8x32xf32>
    %77 = vector.shape_cast %76 : vector<2x8x8x32xf32> to vector<128x32xf32>
    %78 = arith.truncf %77 : vector<128x32xf32> to vector<128x32xbf16>
    %c0_108 = arith.constant 0 : index
    %c192 = arith.constant 192 : index
    %79 = vector.load %arg12[%c0_108, %c192] : memref<128x288xbf16, #tpu.memory_space<vmem>>, vector<128x32xbf16>
    tpu.vector_store %arg12[%c0_108, %c192], %78 {strides = array<i32>} : memref<128x288xbf16, #tpu.memory_space<vmem>>, vector<128x32xbf16>,
    %c0_109 = arith.constant 0 : index
    %c2_110 = arith.constant 2 : index
    %c1_111 = arith.constant 1 : index
    %c0_112 = arith.constant 0 : index
    %80 = vector.load %arg10[%c0_109, %c2_110, %c1_111, %c0_112] : memref<2x10x10x32xf32, #tpu.memory_space<vmem>>, vector<2x8x8x32xf32>
    %81 = vector.shape_cast %80 : vector<2x8x8x32xf32> to vector<128x32xf32>
    %82 = arith.truncf %81 : vector<128x32xf32> to vector<128x32xbf16>
    %c0_113 = arith.constant 0 : index
    %c224 = arith.constant 224 : index
    %83 = vector.load %arg12[%c0_113, %c224] : memref<128x288xbf16, #tpu.memory_space<vmem>>, vector<128x32xbf16>
    tpu.vector_store %arg12[%c0_113, %c224], %82 {strides = array<i32>} : memref<128x288xbf16, #tpu.memory_space<vmem>>, vector<128x32xbf16>,
    %c0_114 = arith.constant 0 : index
    %c2_115 = arith.constant 2 : index
    %c2_116 = arith.constant 2 : index
    %c0_117 = arith.constant 0 : index
    %84 = vector.load %arg10[%c0_114, %c2_115, %c2_116, %c0_117] : memref<2x10x10x32xf32, #tpu.memory_space<vmem>>, vector<2x8x8x32xf32>
    %85 = vector.shape_cast %84 : vector<2x8x8x32xf32> to vector<128x32xf32>
    %86 = arith.truncf %85 : vector<128x32xf32> to vector<128x32xbf16>
    %c0_118 = arith.constant 0 : index
    %c256 = arith.constant 256 : index
    %87 = vector.load %arg12[%c0_118, %c256] : memref<128x288xbf16, #tpu.memory_space<vmem>>, vector<128x32xbf16>
    tpu.vector_store %arg12[%c0_118, %c256], %86 {strides = array<i32>} : memref<128x288xbf16, #tpu.memory_space<vmem>>, vector<128x32xbf16>,
    %c0_119 = arith.constant 0 : index
    %c0_120 = arith.constant 0 : index
    %88 = vector.load %arg12[%c0_119, %c0_120] : memref<128x288xbf16, #tpu.memory_space<vmem>>, vector<128x288xbf16>
    %c0_121 = arith.constant 0 : index
    %c0_122 = arith.constant 0 : index
    %89 = vector.load %arg4[%c0_121, %c0_122] : memref<288x32xbf16, #tpu.memory_space<vmem>>, vector<288x32xbf16>
    %cst_123 = arith.constant dense<0.000000e+00> : vector<128x32xf32>
    %90 = tpu.matmul %88, %89, %cst_123 {dimension_numbers = #tpu.dot_dimension_numbers<[1], [0], [0], [1], [0, 0, 1, 1], [], []>} : vector<128x288xbf16>, vector<288x32xbf16>, vector<128x32xf32> -> vector<128x32xf32>
    %c0_124 = arith.constant 0 : index
    %c0_125 = arith.constant 0 : index
    %91 = vector.load %arg5[%c0_124, %c0_125] : memref<1x32xf32, #tpu.memory_space<vmem>>, vector<1x32xf32>
    %92 = vector.broadcast %91 : vector<1x32xf32> to vector<128x32xf32>
    %93 = arith.addf %90, %92 : vector<128x32xf32>
    %cst_126 = arith.constant 0.000000e+00 : f32
    %94 = vector.broadcast %cst_126 : f32 to vector<128x32xf32>
    %95 = arith.maximumf %93, %94 : vector<128x32xf32>
    %96 = vector.shape_cast %95 : vector<128x32xf32> to vector<2x8x8x32xf32>
    %c0_127 = arith.constant 0 : index
    %c1_128 = arith.constant 1 : index
    %c1_129 = arith.constant 1 : index
    %c0_130 = arith.constant 0 : index
    %97 = vector.load %arg10[%c0_127, %c1_128, %c1_129, %c0_130] : memref<2x10x10x32xf32, #tpu.memory_space<vmem>>, vector<2x8x8x32xf32>
    tpu.vector_store %arg10[%c0_127, %c1_128, %c1_129, %c0_130], %96 {strides = array<i32>} : memref<2x10x10x32xf32, #tpu.memory_space<vmem>>, vector<2x8x8x32xf32>,
    %c0_131 = arith.constant 0 : index
    %c0_132 = arith.constant 0 : index
    %c0_133 = arith.constant 0 : index
    %c0_134 = arith.constant 0 : index
    %98 = vector.load %arg10[%c0_131, %c0_132, %c0_133, %c0_134] : memref<2x10x10x32xf32, #tpu.memory_space<vmem>>, vector<2x8x8x32xf32>
    %99 = vector.shape_cast %98 : vector<2x8x8x32xf32> to vector<128x32xf32>
    %100 = arith.truncf %99 : vector<128x32xf32> to vector<128x32xbf16>
    %c0_135 = arith.constant 0 : index
    %c0_136 = arith.constant 0 : index
    %101 = vector.load %arg12[%c0_135, %c0_136] : memref<128x288xbf16, #tpu.memory_space<vmem>>, vector<128x32xbf16>
    tpu.vector_store %arg12[%c0_135, %c0_136], %100 {strides = array<i32>} : memref<128x288xbf16, #tpu.memory_space<vmem>>, vector<128x32xbf16>,
    %c0_137 = arith.constant 0 : index
    %c0_138 = arith.constant 0 : index
    %c1_139 = arith.constant 1 : index
    %c0_140 = arith.constant 0 : index
    %102 = vector.load %arg10[%c0_137, %c0_138, %c1_139, %c0_140] : memref<2x10x10x32xf32, #tpu.memory_space<vmem>>, vector<2x8x8x32xf32>
    %103 = vector.shape_cast %102 : vector<2x8x8x32xf32> to vector<128x32xf32>
    %104 = arith.truncf %103 : vector<128x32xf32> to vector<128x32xbf16>
    %c0_141 = arith.constant 0 : index
    %c32_142 = arith.constant 32 : index
    %105 = vector.load %arg12[%c0_141, %c32_142] : memref<128x288xbf16, #tpu.memory_space<vmem>>, vector<128x32xbf16>
    tpu.vector_store %arg12[%c0_141, %c32_142], %104 {strides = array<i32>} : memref<128x288xbf16, #tpu.memory_space<vmem>>, vector<128x32xbf16>,
    %c0_143 = arith.constant 0 : index
    %c0_144 = arith.constant 0 : index
    %c2_145 = arith.constant 2 : index
    %c0_146 = arith.constant 0 : index
    %106 = vector.load %arg10[%c0_143, %c0_144, %c2_145, %c0_146] : memref<2x10x10x32xf32, #tpu.memory_space<vmem>>, vector<2x8x8x32xf32>
    %107 = vector.shape_cast %106 : vector<2x8x8x32xf32> to vector<128x32xf32>
    %108 = arith.truncf %107 : vector<128x32xf32> to vector<128x32xbf16>
    %c0_147 = arith.constant 0 : index
    %c64_148 = arith.constant 64 : index
    %109 = vector.load %arg12[%c0_147, %c64_148] : memref<128x288xbf16, #tpu.memory_space<vmem>>, vector<128x32xbf16>
    tpu.vector_store %arg12[%c0_147, %c64_148], %108 {strides = array<i32>} : memref<128x288xbf16, #tpu.memory_space<vmem>>, vector<128x32xbf16>,
    %c0_149 = arith.constant 0 : index
    %c1_150 = arith.constant 1 : index
    %c0_151 = arith.constant 0 : index
    %c0_152 = arith.constant 0 : index
    %110 = vector.load %arg10[%c0_149, %c1_150, %c0_151, %c0_152] : memref<2x10x10x32xf32, #tpu.memory_space<vmem>>, vector<2x8x8x32xf32>
    %111 = vector.shape_cast %110 : vector<2x8x8x32xf32> to vector<128x32xf32>
    %112 = arith.truncf %111 : vector<128x32xf32> to vector<128x32xbf16>
    %c0_153 = arith.constant 0 : index
    %c96_154 = arith.constant 96 : index
    %113 = vector.load %arg12[%c0_153, %c96_154] : memref<128x288xbf16, #tpu.memory_space<vmem>>, vector<128x32xbf16>
    tpu.vector_store %arg12[%c0_153, %c96_154], %112 {strides = array<i32>} : memref<128x288xbf16, #tpu.memory_space<vmem>>, vector<128x32xbf16>,
    %c0_155 = arith.constant 0 : index
    %c1_156 = arith.constant 1 : index
    %c1_157 = arith.constant 1 : index
    %c0_158 = arith.constant 0 : index
    %114 = vector.load %arg10[%c0_155, %c1_156, %c1_157, %c0_158] : memref<2x10x10x32xf32, #tpu.memory_space<vmem>>, vector<2x8x8x32xf32>
    %115 = vector.shape_cast %114 : vector<2x8x8x32xf32> to vector<128x32xf32>
    %116 = arith.truncf %115 : vector<128x32xf32> to vector<128x32xbf16>
    %c0_159 = arith.constant 0 : index
    %c128_160 = arith.constant 128 : index
    %117 = vector.load %arg12[%c0_159, %c128_160] : memref<128x288xbf16, #tpu.memory_space<vmem>>, vector<128x32xbf16>
    tpu.vector_store %arg12[%c0_159, %c128_160], %116 {strides = array<i32>} : memref<128x288xbf16, #tpu.memory_space<vmem>>, vector<128x32xbf16>,
    %c0_161 = arith.constant 0 : index
    %c1_162 = arith.constant 1 : index
    %c2_163 = arith.constant 2 : index
    %c0_164 = arith.constant 0 : index
    %118 = vector.load %arg10[%c0_161, %c1_162, %c2_163, %c0_164] : memref<2x10x10x32xf32, #tpu.memory_space<vmem>>, vector<2x8x8x32xf32>
    %119 = vector.shape_cast %118 : vector<2x8x8x32xf32> to vector<128x32xf32>
    %120 = arith.truncf %119 : vector<128x32xf32> to vector<128x32xbf16>
    %c0_165 = arith.constant 0 : index
    %c160_166 = arith.constant 160 : index
    %121 = vector.load %arg12[%c0_165, %c160_166] : memref<128x288xbf16, #tpu.memory_space<vmem>>, vector<128x32xbf16>
    tpu.vector_store %arg12[%c0_165, %c160_166], %120 {strides = array<i32>} : memref<128x288xbf16, #tpu.memory_space<vmem>>, vector<128x32xbf16>,
    %c0_167 = arith.constant 0 : index
    %c2_168 = arith.constant 2 : index
    %c0_169 = arith.constant 0 : index
    %c0_170 = arith.constant 0 : index
    %122 = vector.load %arg10[%c0_167, %c2_168, %c0_169, %c0_170] : memref<2x10x10x32xf32, #tpu.memory_space<vmem>>, vector<2x8x8x32xf32>
    %123 = vector.shape_cast %122 : vector<2x8x8x32xf32> to vector<128x32xf32>
    %124 = arith.truncf %123 : vector<128x32xf32> to vector<128x32xbf16>
    %c0_171 = arith.constant 0 : index
    %c192_172 = arith.constant 192 : index
    %125 = vector.load %arg12[%c0_171, %c192_172] : memref<128x288xbf16, #tpu.memory_space<vmem>>, vector<128x32xbf16>
    tpu.vector_store %arg12[%c0_171, %c192_172], %124 {strides = array<i32>} : memref<128x288xbf16, #tpu.memory_space<vmem>>, vector<128x32xbf16>,
    %c0_173 = arith.constant 0 : index
    %c2_174 = arith.constant 2 : index
    %c1_175 = arith.constant 1 : index
    %c0_176 = arith.constant 0 : index
    %126 = vector.load %arg10[%c0_173, %c2_174, %c1_175, %c0_176] : memref<2x10x10x32xf32, #tpu.memory_space<vmem>>, vector<2x8x8x32xf32>
    %127 = vector.shape_cast %126 : vector<2x8x8x32xf32> to vector<128x32xf32>
    %128 = arith.truncf %127 : vector<128x32xf32> to vector<128x32xbf16>
    %c0_177 = arith.constant 0 : index
    %c224_178 = arith.constant 224 : index
    %129 = vector.load %arg12[%c0_177, %c224_178] : memref<128x288xbf16, #tpu.memory_space<vmem>>, vector<128x32xbf16>
    tpu.vector_store %arg12[%c0_177, %c224_178], %128 {strides = array<i32>} : memref<128x288xbf16, #tpu.memory_space<vmem>>, vector<128x32xbf16>,
    %c0_179 = arith.constant 0 : index
    %c2_180 = arith.constant 2 : index
    %c2_181 = arith.constant 2 : index
    %c0_182 = arith.constant 0 : index
    %130 = vector.load %arg10[%c0_179, %c2_180, %c2_181, %c0_182] : memref<2x10x10x32xf32, #tpu.memory_space<vmem>>, vector<2x8x8x32xf32>
    %131 = vector.shape_cast %130 : vector<2x8x8x32xf32> to vector<128x32xf32>
    %132 = arith.truncf %131 : vector<128x32xf32> to vector<128x32xbf16>
    %c0_183 = arith.constant 0 : index
    %c256_184 = arith.constant 256 : index
    %133 = vector.load %arg12[%c0_183, %c256_184] : memref<128x288xbf16, #tpu.memory_space<vmem>>, vector<128x32xbf16>
    tpu.vector_store %arg12[%c0_183, %c256_184], %132 {strides = array<i32>} : memref<128x288xbf16, #tpu.memory_space<vmem>>, vector<128x32xbf16>,
    %c0_185 = arith.constant 0 : index
    %c0_186 = arith.constant 0 : index
    %134 = vector.load %arg12[%c0_185, %c0_186] : memref<128x288xbf16, #tpu.memory_space<vmem>>, vector<128x288xbf16>
    %c0_187 = arith.constant 0 : index
    %c0_188 = arith.constant 0 : index
    %135 = vector.load %arg6[%c0_187, %c0_188] : memref<288x32xbf16, #tpu.memory_space<vmem>>, vector<288x32xbf16>
    %cst_189 = arith.constant dense<0.000000e+00> : vector<128x32xf32>
    %136 = tpu.matmul %134, %135, %cst_189 {dimension_numbers = #tpu.dot_dimension_numbers<[1], [0], [0], [1], [0, 0, 1, 1], [], []>} : vector<128x288xbf16>, vector<288x32xbf16>, vector<128x32xf32> -> vector<128x32xf32>
    %c0_190 = arith.constant 0 : index
    %c0_191 = arith.constant 0 : index
    %137 = vector.load %arg7[%c0_190, %c0_191] : memref<1x32xf32, #tpu.memory_space<vmem>>, vector<1x32xf32>
    %138 = vector.broadcast %137 : vector<1x32xf32> to vector<128x32xf32>
    %139 = arith.addf %136, %138 : vector<128x32xf32>
    %cst_192 = arith.constant 0.000000e+00 : f32
    %140 = vector.broadcast %cst_192 : f32 to vector<128x32xf32>
    %141 = arith.maximumf %139, %140 : vector<128x32xf32>
    %142 = vector.shape_cast %141 : vector<128x32xf32> to vector<2x8x8x32xf32>
    %143 = vector.shape_cast %142 : vector<2x8x8x32xf32> to vector<128x32xf32>
    %144 = arith.truncf %143 : vector<128x32xf32> to vector<128x32xbf16>
    %c0_193 = arith.constant 0 : index
    %c0_194 = arith.constant 0 : index
    %145 = vector.load %arg8[%c0_193, %c0_194] : memref<128x32xbf16, #tpu.memory_space<vmem>>, vector<128x32xbf16>
    tpu.vector_store %arg8[%c0_193, %c0_194], %144 {strides = array<i32>} : memref<128x32xbf16, #tpu.memory_space<vmem>>, vector<128x32xbf16>,
    return
  }
  func.func @transform_0(%arg0: i32) -> (i32, i32, i32, i32) {
    %c0_i32 = arith.constant 0 : i32
    %c0_i32_0 = arith.constant 0 : i32
    %c0_i32_1 = arith.constant 0 : i32
    %c0_i32_2 = arith.constant 0 : i32
    return %arg0, %c0_i32, %c0_i32_0, %c0_i32_1 : i32, i32, i32, i32
  }
  func.func @transform_1(%arg0: i32) -> (i32, i32) {
    %c0_i32 = arith.constant 0 : i32
    %c0_i32_0 = arith.constant 0 : i32
    %c0_i32_1 = arith.constant 0 : i32
    return %c0_i32, %c0_i32_0 : i32, i32
  }
  func.func @transform_2(%arg0: i32) -> (i32, i32) {
    %c0_i32 = arith.constant 0 : i32
    %c0_i32_0 = arith.constant 0 : i32
    %c0_i32_1 = arith.constant 0 : i32
    return %c0_i32, %c0_i32_0 : i32, i32
  }
  func.func @transform_3(%arg0: i32) -> (i32, i32) {
    %c0_i32 = arith.constant 0 : i32
    %c0_i32_0 = arith.constant 0 : i32
    %c0_i32_1 = arith.constant 0 : i32
    return %c0_i32, %c0_i32_0 : i32, i32
  }
  func.func @transform_4(%arg0: i32) -> (i32, i32) {
    %c0_i32 = arith.constant 0 : i32
    %c0_i32_0 = arith.constant 0 : i32
    %c0_i32_1 = arith.constant 0 : i32
    return %c0_i32, %c0_i32_0 : i32, i32
  }
  func.func @transform_5(%arg0: i32) -> (i32, i32) {
    %c0_i32 = arith.constant 0 : i32
    %c0_i32_0 = arith.constant 0 : i32
    %c0_i32_1 = arith.constant 0 : i32
    return %c0_i32, %c0_i32_0 : i32, i32
  }
  func.func @transform_6(%arg0: i32) -> (i32, i32) {
    %c0_i32 = arith.constant 0 : i32
    %c0_i32_0 = arith.constant 0 : i32
    %c0_i32_1 = arith.constant 0 : i32
    return %c0_i32, %c0_i32_0 : i32, i32
  }
  func.func @transform_7(%arg0: i32) -> (i32, i32) {
    %c0_i32 = arith.constant 0 : i32
    %c0_i32_0 = arith.constant 0 : i32
    return %arg0, %c0_i32 : i32, i32
  }
}

</mosaic_0001>

<bundles_post_ra>
// kernel: torch_gcnn_forward.3
= control target key start
LH: loop header
LB: loop body
LE: loop exit
PB: predicated region body
PF: predicated region fallthrough
CT: control target
= control target key end

     0   :  { %s4592_s0 = inlined_call_operand.vmem [shape: f32[2,6,6], index: 0, kind: input, shape index: {}]   ;;  %s4593_s1 = inlined_call_operand.vmem [shape: bf16[2,2048], index: 1, kind: input, shape index: {}]   ;;  %s4594_s2 = inlined_call_operand.hbm [shape: f32[6,64], index: 2, kind: input, shape index: {}]   ;;  %s4595_s3 = inlined_call_operand.vmem [shape: f32[1,64], index: 3, kind: input, shape index: {}]   ;;  %s4596_s4 = inlined_call_operand.vmem [shape: f32[64,64], index: 4, kind: input, shape index: {}]   ;;  %s4597_s5 = inlined_call_operand.vmem [shape: f32[1,64], index: 5, kind: input, shape index: {}]   ;;  %s4598_s6 = inlined_call_operand.vmem [shape: f32[64,64], index: 6, kind: input, shape index: {}]   ;;  %s4599_s7 = inlined_call_operand.vmem [shape: f32[1,64], index: 7, kind: input, shape index: {}]   ;;  %s4600_s8 = inlined_call_operand.hbm [shape: f32[64,64], index: 8, kind: input, shape index: {}]   ;;  %s4601_s9 = inlined_call_operand.hbm [shape: f32[1,64], index: 9, kind: input, shape index: {}]   ;;  %s4602_s10 = inlined_call_operand.vmem [shape: bf16[64,128], index: 10, kind: input, shape index: {}]   ;;  %s4603_s11 = inlined_call_operand.vmem [shape: bf16[2048,128], index: 11, kind: input, shape index: {}]   ;;  %s4604_s12 = inlined_call_operand.hbm [shape: f32[1,128], index: 12, kind: input, shape index: {}]   ;;  %s4605_s13 = inlined_call_operand.hbm [shape: bf16[128,128], index: 13, kind: input, shape index: {}]   ;;  %s4606_s14 = inlined_call_operand.hbm [shape: f32[1,128], index: 14, kind: input, shape index: {}]   ;;  %s4607_s15 = inlined_call_operand.hbm [shape: f32[2,128], index: 15, kind: output, shape index: {}]  }
   0x1   :  { %4609 = sst [smem:[#allocation19_spill]] %s4607_s15 }
   0x2   :  { %20 = vsyncpa [#allocation3], 0 }
   0x3   :  { %21 = vsyncpa [#allocation6], 0 }
   0x4   :  { %22 = vsyncpa [#allocation9], 0 }
   0x5   :  { %23 = vsyncpa [#allocation12], 0 }
   0x6   :  { %24 = vsyncpa [#allocation4], 0  ;;  %s3786_s18 = smov [#allocation5]   ;;  %s3622_s22 = scalar_lea.hbm %s4600_s8, 1024 }
   0x7   :  { %s54_s19 = sshll.u32 %s3786_s18, 4  ;;  %p3623_p0 = scmp.ne.s32.totalorder %s4600_s8, %s3622_s22  ;;  %s55_s19 = int_to_ptr.vmem [resolvable:$true] %s54_s19 }
   0x8   :  { %p3626_p1 = scmp.lt.u32.totalorder %s3622_s22, %s4600_s8 }
   0xa   :  { %p3628_p2 = pnand %p3626_p1, %p3623_p0 }
   0xc   :  { %3631 = shalt.err (!%p3628_p2)
}
   0xd   :  { %s3632_s27 = scalar_lea.vmem %s55_s19, 1024  ;;  %p3637_p4 = scmp.lt.s32.totalorder %s55_s19, %s55_s19 }
   0xe   :  { %p3633_p3 = scmp.ne.s32.totalorder %s55_s19, %s3632_s27  ;;  %p3638_p5 = scmp.lt.s32.totalorder %s3632_s27, %s3632_s27 }
  0x10   :  { %p3639_p6 = por %p3638_p5, %p3637_p4 }
  0x12   :  { %p3640_p7 = pnand %p3639_p6, %p3633_p3 }
  0x14   :  { %3643 = shalt.err (!%p3640_p7)
}
  0x15   :  { %s3787_s28 = smov 128   ;;  %s3788_s29 = smov 8  }
  0x16   :  { %60 = dma.hbm_to_vmem [thread:$0]  %s4600_s8, 1024, %s55_s19, [#allocation6], %s3787_s28, %s3787_s28, %s3788_s29  }
  0x17   :  { %s3789_s17 = smov [#allocation8]   ;;  %s3790_s20 = smov [#allocation2]  }
  0x18   :  { %s81_s18 = sshll.u32 %s3789_s17, 4  ;;  %s35_s21 = sshll.u32 %s3790_s20, 4  ;;  %s82_s18 = int_to_ptr.vmem [resolvable:$true] %s81_s18  ;;  %s36_s21 = int_to_ptr.vmem [resolvable:$true] %s35_s21 }
  0x19   :  { %s3644_s24 = scalar_lea.hbm %s4604_s12, 16 }
  0x1a   :  { %p3645_p8 = scmp.ne.s32.totalorder %s4604_s12, %s3644_s24  ;;  %p3648_p9 = scmp.lt.u32.totalorder %s3644_s24, %s4604_s12 }
  0x1c   :  { %p3650_p10 = pnand %p3648_p9, %p3645_p8 }
  0x1e   :  { %3653 = shalt.err (!%p3650_p10)
}
  0x1f   :  { %s3654_s8 = scalar_lea.vmem %s82_s18, 16  ;;  %s3658_s19 = scalar_lea.vmem %s82_s18, 32 }
  0x20   :  { %p3655_p11 = scmp.ne.s32.totalorder %s82_s18, %s3654_s8  ;;  %p3659_p12 = scmp.lt.s32.totalorder %s82_s18, %s82_s18 }
  0x21   :  { %p3660_p13 = scmp.lt.s32.totalorder %s3658_s19, %s3654_s8 }
  0x23   :  { %p3661_p0 = por %p3660_p13, %p3659_p12 }
  0x25   :  { %p3662_p1 = pnand %p3661_p0, %p3655_p11 }
  0x27   :  { %3665 = shalt.err (!%p3662_p1)
}
  0x28   :  { %84 = dma.hbm_to_vmem [thread:$0]  %s4604_s12, 16, %s82_s18, [#allocation9]  }
  0x29   :  { %s3666_s15 = scalar_lea.hbm %s4594_s2, 128 }
  0x2a   :  { %p3667_p2 = scmp.ne.s32.totalorder %s4594_s2, %s3666_s15  ;;  %p3670_p3 = scmp.lt.u32.totalorder %s3666_s15, %s4594_s2 }
  0x2c   :  { %p3672_p4 = pnand %p3670_p3, %p3667_p2 }
  0x2e   :  { %3675 = shalt.err (!%p3672_p4)
}
  0x2f   :  { %s3676_s24 = scalar_lea.vmem %s36_s21, 128  ;;  %p3681_p6 = scmp.lt.s32.totalorder %s36_s21, %s36_s21 }
  0x30   :  { %p3677_p5 = scmp.ne.s32.totalorder %s36_s21, %s3676_s24  ;;  %p3682_p7 = scmp.lt.s32.totalorder %s3676_s24, %s3676_s24 }
  0x32   :  { %p3683_p8 = por %p3682_p7, %p3681_p6 }
  0x34   :  { %p3684_p9 = pnand %p3683_p8, %p3677_p5 }
  0x36   :  { %3687 = shalt.err (!%p3684_p9)
}
  0x37   :  { %38 = dma.hbm_to_vmem [thread:$0]  %s4594_s2, 128, %s36_s21, [#allocation3]  }
  0x38   :  { %s3791_s25 = smov [#allocation7]   ;;  %s3792_s27 = smov [#allocation10]  }
  0x39   :  { %s67_s26 = sshll.u32 %s3791_s25, 4  ;;  %s90_s8 = sshll.u32 %s3792_s27, 4  ;;  %s68_s26 = int_to_ptr.vmem [resolvable:$true] %s67_s26  ;;  %s91_s8 = int_to_ptr.vmem [resolvable:$true] %s90_s8 }
  0x3a   :  { %s3688_s29 = scalar_lea.hbm %s4601_s9, 16 }
  0x3b   :  { %p3689_p10 = scmp.ne.s32.totalorder %s4601_s9, %s3688_s29  ;;  %p3692_p11 = scmp.lt.u32.totalorder %s3688_s29, %s4601_s9 }
  0x3d   :  { %p3694_p12 = pnand %p3692_p11, %p3689_p10 }
  0x3f   :  { %3697 = shalt.err (!%p3694_p12)
}
  0x40   :  { %s3698_s2 = scalar_lea.vmem %s68_s26, 16  ;;  %s3702_s21 = scalar_lea.vmem %s68_s26, 32 }
  0x41   :  { %p3699_p13 = scmp.ne.s32.totalorder %s68_s26, %s3698_s2  ;;  %p3703_p0 = scmp.lt.s32.totalorder %s68_s26, %s68_s26 }
  0x42   :  { %p3704_p1 = scmp.lt.s32.totalorder %s3702_s21, %s3698_s2 }
  0x44   :  { %p3705_p2 = por %p3704_p1, %p3703_p0 }
  0x46   :  { %p3706_p3 = pnand %p3705_p2, %p3699_p13 }
  0x48   :  { %3709 = shalt.err (!%p3706_p3)
}
  0x49   :  { %70 = dma.hbm_to_vmem [thread:$0]  %s4601_s9, 16, %s68_s26, [#allocation6]  }
  0x4a   :  { %s3710_s12 = scalar_lea.hbm %s4605_s13, 1024 }
  0x4b   :  { %p3711_p4 = scmp.ne.s32.totalorder %s4605_s13, %s3710_s12  ;;  %p3714_p5 = scmp.lt.u32.totalorder %s3710_s12, %s4605_s13 }
  0x4d   :  { %p3716_p6 = pnand %p3714_p5, %p3711_p4 }
  0x4f   :  { %3719 = shalt.err (!%p3716_p6)
}
  0x50   :  { %s3720_s28 = scalar_lea.vmem %s91_s8, 1024  ;;  %p3725_p8 = scmp.lt.s32.totalorder %s91_s8, %s91_s8 }
  0x51   :  { %p3721_p7 = scmp.ne.s32.totalorder %s91_s8, %s3720_s28  ;;  %p3726_p9 = scmp.lt.s32.totalorder %s3720_s28, %s3720_s28 }
  0x53   :  { %p3727_p10 = por %p3726_p9, %p3725_p8 }
  0x55   :  { %p3728_p11 = pnand %p3727_p10, %p3721_p7 }
  0x57   :  { %3731 = shalt.err (!%p3728_p11)
}
  0x58   :  { %s3793_s9 = smov 64   ;;  %s3794_s26 = smov 4  }
  0x59   :  { %96 = dma.hbm_to_vmem [thread:$0]  %s4605_s13, 1024, %s91_s8, [#allocation9], %s3793_s9, %s3793_s9, %s3794_s26  }
  0x5a   :  { %s3795_s16 = smov [#allocation11]   ;;  %s3732_s21 = scalar_lea.hbm %s4606_s14, 16 }
  0x5b   :  { %s103_s15 = sshll.u32 %s3795_s16, 4  ;;  %p3733_p12 = scmp.ne.s32.totalorder %s4606_s14, %s3732_s21  ;;  %s104_s15 = int_to_ptr.vmem [resolvable:$true] %s103_s15 }
  0x5c   :  { %p3736_p13 = scmp.lt.u32.totalorder %s3732_s21, %s4606_s14 }
  0x5e   :  { %p3738_p0 = pnand %p3736_p13, %p3733_p12 }
  0x60   :  { %3741 = shalt.err (!%p3738_p0)
}
  0x61   :  { %s3742_s12 = scalar_lea.vmem %s104_s15, 16  ;;  %s3746_s13 = scalar_lea.vmem %s104_s15, 32 }
  0x62   :  { %p3743_p1 = scmp.ne.s32.totalorder %s104_s15, %s3742_s12  ;;  %p3747_p2 = scmp.lt.s32.totalorder %s104_s15, %s104_s15 }
  0x63   :  { %p3748_p3 = scmp.lt.s32.totalorder %s3746_s13, %s3742_s12 }
  0x65   :  { %p3749_p4 = por %p3748_p3, %p3747_p2 }
  0x67   :  { %p3750_p5 = pnand %p3749_p4, %p3743_p1 }
  0x69   :  { %3753 = shalt.err (!%p3750_p5)
}
  0x6a   :  { %106 = dma.hbm_to_vmem [thread:$0]  %s4606_s14, 16, %s104_s15, [#allocation12]  }
  0x6b   :  { %3776 = dma.done.wait [#allocation3], 128  }
  0x6c   :  { %3777 = vsyncadd [#allocation3], 4294967168 }
  0x6d   :  { %3778 = dma.done.wait [#allocation6], 1040  }
  0x6e   :  { %3779 = vsyncadd [#allocation6], 4294966256 }
  0x6f   :  { %3780 = dma.done.wait [#allocation9], 1040  }
  0x70   :  { %3781 = vsyncadd [#allocation9], 4294966256 }
  0x71   :  { %3782 = dma.done.wait [#allocation12], 16  }
  0x72   :  { %3783 = vsyncadd [#allocation12], 4294967280  ;;  %v128_v0 = vlaneseq  ;;  %v3796_v1 = vmov 0.0   ;;  %vm143_vm1 = vcmask 46080   ;;  %v126_v5 = vld [vmem:[%s4592_s0] sm:$0x3f] }
  0x73   :  { %3297 = vmatprep.subr.mxu0 %v3796_v1  ;;  %3302 = vmatprep.subr.mxu1 %v3796_v1  ;;  %v127_v6 = vld [vmem:[%s4592_s0 + $0x8] sm:$0x3f]  ;;  %v234_v25 = vld [vmem:[#allocation2] sm:$0x3f]  ;;  %vm246_vm4 = vcmask 1045504   ;;  %vm3797_vm5 = vmmov 0  }
  0x74   :  { %v3956_v2 = vshrl.u32 %v128_v0, 7  ;;  %v131_v3 = vand.u32 127, %v128_v0  ;;  %3298 = vmatpush3.msk.msra.mxu0 %vm246_vm4, %v234_v25  ;;  %3299 = vmatprep.mubr.msk.f32.mxu0 %vm3797_vm5, %v3796_v1  ;;  %vm242_vm6 = vcmask 48128   ;;  %v429_v36 = vld [vmem:[%s4596_s4] sm:$0xff]  ;;  %v430_v37 = vld [vmem:[%s4596_s4 + $0x8] sm:$0xff]  ;;  %v431_v39 = vld [vmem:[%s4596_s4 + $0x10] sm:$0xff] }
  0x75   :  { %3303 = vmatpush3.msk.msra.mxu1 %vm246_vm4, %v234_v25  ;;  %3304 = vmatprep.mubr.msk.f32.mxu1 %vm3797_vm5, %v3796_v1  ;;  %v3416_v38 = vpack.c.bf16 %v430_v37, %v429_v36  ;;  %v432_v40 = vld [vmem:[%s4596_s4 + $0x18] sm:$0xff]  ;;  %v433_v42 = vld [vmem:[%s4596_s4 + $0x20] sm:$0xff]  ;;  %v434_v43 = vld [vmem:[%s4596_s4 + $0x28] sm:$0xff]  ;;  %v3798_v48 = vmov 1983009808   ;;  %vm462_vm7 = vcmask 523264  }
  0x76   :  { %vm132_vm0 = vcmp.eq.s32.totalorder %v3956_v2, %v131_v3  ;;  %3355 = vmatprep.subr.mxu0 %v3796_v1  ;;  %v3420_v41 = vpack.c.bf16 %v432_v40, %v431_v39  ;;  %v3424_v44 = vpack.c.bf16 %v434_v43, %v433_v42  ;;  %v435_v45 = vld [vmem:[%s4596_s4 + $0x30] sm:$0xff]  ;;  %v436_v46 = vld [vmem:[%s4596_s4 + $0x38] sm:$0xff]  ;;  %v399_v49 = vunpack.c.l.s4 %v3798_v48  ;;  %v2902_v51 = vld [vmem:[%s4595_s3] ss:$0 sm:$0xff] }
  0x77   :  { %v2899_v4 = vsel %vm132_vm0, 1.0, %v3796_v1  ;;  %3417 = vmatprep.subr.bf16.mxu1 %v3416_v38  ;;  %v3428_v47 = vpack.c.bf16 %v436_v46, %v435_v45  ;;  %v790_v36 = vld [vmem:[%s4598_s6 + $0x10] sm:$0xff]  ;;  %v791_v37 = vld [vmem:[%s4598_s6 + $0x18] sm:$0xff]  ;;  %v792_v39 = vld [vmem:[%s4598_s6 + $0x20] sm:$0xff]  ;;  %vm1112_vm8 = vcmask 521216   ;;  %vm1147_vm9 = vcmask 1041409  }
  0x78   :  { %v135_v7 = vadd.f32 %v2899_v4, %v126_v5  ;;  %v136_v8 = vadd.f32 %v2899_v4, %v127_v6  ;;  %v400_v50 = vunpack.c.0.s8 %v399_v49  ;;  %v793_v40 = vld [vmem:[%s4598_s6 + $0x28] sm:$0xff]  ;;  %v794_v42 = vld [vmem:[%s4598_s6 + $0x30] sm:$0xff]  ;;  %v795_v43 = vld [vmem:[%s4598_s6 + $0x38] sm:$0xff] }
  0x79   :  { %v2909_v45 = vld [vmem:[%s4597_s5] ss:$0 sm:$0xff] }
  0x7a   :  { %vm137_vm2 = vcmp.ge.f32.partialorder %v135_v7, 1.0  ;;  %vm138_vm3 = vcmp.ge.f32.partialorder %v136_v8, 1.0  ;;  %v4014_v53 = vsub.s32 %v400_v50, %v3956_v2 }
  0x7b   :  { %v2900_v9 = vsel %vm137_vm2, 1.0, %v3796_v1  ;;  %v2901_v10 = vsel %vm138_vm3, 1.0, %v3796_v1 }
  0x7c   :  { %166 = vxpose.xlu1.b32.start.end [1/1] (short) (narrow) %v2900_v9, 8  ;;  %v144_v11 = vsel %vm143_vm1, %v2900_v9, 0.0  ;;  %v151_v12 = vsel %vm143_vm1, %v2901_v10, 0.0 }
  0x7d   :  { %v145_v13 = vrot.slane %v144_v11, 4  ;;  %v152_v14 = vrot.slane %v151_v12, 4 }
  0x7f   :  { %v146_v15 = vadd.f32 %v145_v13, %v144_v11  ;;  %v153_v16 = vadd.f32 %v152_v14, %v151_v12 }
  0x80   :  { %198 = vxpose.xlu1.b32.start.end [1/1] (short) (narrow) %v2901_v10, 8 }
  0x81   :  { %v147_v17 = vrot.slane %v146_v15, 2  ;;  %v154_v18 = vrot.slane %v153_v16, 2 }
  0x83   :  { %v148_v19 = vadd.f32 %v147_v17, %v146_v15  ;;  %v155_v20 = vadd.f32 %v154_v18, %v153_v16 }
  0x85   :  { %v149_v21 = vrot.slane %v148_v19, 1  ;;  %v156_v22 = vrot.slane %v155_v20, 1 }
  0x87   :  { %v150_v23 = vadd.f32 %v149_v21, %v148_v19  ;;  %v157_v24 = vadd.f32 %v156_v22, %v155_v20 }
  0x89   :  { %3618 = vrsqrt.f32 %v150_v23 }
  0x8a   :  { %3620 = vrsqrt.f32 %v157_v24 }
  0x93   :  { %v3619_v26 = vpop.eup %3618 }
  0x94   :  { %161 = vbcast.lane.b32.xlu0 %v3619_v26, 256  ;;  %v3621_v27 = vpop.eup %3620 }
  0x98   :  { %164 = vbcast.lane.b32.xlu0 %v3621_v27, 256 }
  0xfc   :  { %v182_v28 = vpop.trf.xlu1 }
 0x100   :  { %v214_v31 = vpop.trf.xlu1 }
 0x106   :  { %v162_v29 = vpop.permute.xlu0 %161 }
 0x107   :  { %v230_v30 = vmul.f32 %v182_v28, %v162_v29 }
 0x109   :  { %v3975_v32 = vmul.f32 %v3619_v26, %v230_v30 }
 0x10a   :  { %v165_v33 = vpop.permute.xlu0 %164 }
 0x10b   :  { %v231_v34 = vmul.f32 %v214_v31, %v165_v33  ;;  %3300 = vmatmul.mubr.msk.f32.vlgmr.msra.gmra.mrb[0].mxu0 %vm242_vm6, %v3975_v32  ;;  %v788_v31 = vld [vmem:[%s4598_s6] sm:$0xff]  ;;  %v789_v33 = vld [vmem:[%s4598_s6 + $0x8] sm:$0xff] }
 0x10c   :  { %3357 = vmatprep.mubr.msk.f32.mxu0 %vm3797_vm5, %v3796_v1 }
 0x10d   :  { %v3981_v35 = vmul.f32 %v3621_v27, %v231_v34  ;;  %v3432_v34 = vpack.c.bf16 %v789_v33, %v788_v31  ;;  %v3478_v31 = vld [vmem:[%s4603_s11 + $0x48] sm:$0xff]  }
 0x10e   :  { %v1134_v33 = vld [vmem:[#allocation5 + $0x20] sm:$0xff] }
 0x10f   :  { %3305 = vmatmul.mubr.msk.f32.vlgmr.msra.gmra.mrb[0].mxu1 %vm242_vm6, %v3981_v35 }
 0x110   :  { %3419 = vmatpush3.bf16.msra.mxu1 %v3416_v38  ;;  %v3436_v38 = vpack.c.bf16 %v791_v37, %v790_v36  ;;  %v3479_v36 = vld [vmem:[%s4603_s11 + $0x8] sm:$0xff]  }
 0x111   :  { %3421 = vmatprep.subr.bf16.mxu1 %v3420_v41 }
 0x114   :  { %3423 = vmatpush3.bf16.msra.mxu1 %v3420_v41  ;;  %v3440_v41 = vpack.c.bf16 %v793_v40, %v792_v39  ;;  %v1136_v39 = vld [vmem:[#allocation5 + $0x30] sm:$0xff]  ;;  %v1137_v40 = vld [vmem:[#allocation5 + $0x38] sm:$0xff] }
 0x115   :  { %3425 = vmatprep.subr.bf16.mxu1 %v3424_v44 }
 0x118   :  { %3427 = vmatpush3.bf16.msra.mxu1 %v3424_v44  ;;  %v3444_v44 = vpack.c.bf16 %v795_v43, %v794_v42  ;;  %v3458_v42 = vpack.c.bf16 %v1137_v40, %v1136_v39  ;;  %v3482_v43 = vld [vmem:[%s4603_s11 + $0xc0] sm:$0xff]  }
 0x119   :  { %3429 = vmatprep.subr.bf16.mxu1 %v3428_v47 }
 0x11c   :  { %3431 = vmatpush3.bf16.msra.mxu1 %v3428_v47 }
 0x11d   :  { %3326 = vmatprep.subr.mxu1 %v3796_v1 }
 0x1de   :  { %v316_v52 = vpop.f32.mrb[0].mxu0 }
 0x1df   :  { %v317_v54 = vadd.f32 %v2902_v51, %v316_v52  ;;  %v3301_v55 = vpop.f32.mrb[1].mxu0 }
 0x1e1   :  { %v393_v56 = vmax.f32 %v317_v54, 0.0 }
 0x1e2   :  { %v389_v57 = vpop.f32.mrb[0].mxu1 }
 0x1e3   :  { %v397_v58 = vcombine.high %v393_v56, %v393_v56  ;;  %v404_v59 = vrot.slane %v393_v56, %v4014_v53  ;;  %v390_v60 = vadd.f32 %v2902_v51, %v389_v57  ;;  %v3306_v61 = vpop.f32.mrb[1].mxu1 }
 0x1e5   :  { %v412_v62 = vcombine.high %v404_v59, %v404_v59  ;;  %v394_v63 = vmax.f32 %v390_v60, 0.0  ;;  %v411_v0 = vrot.slane %v397_v58, %v4014_v53 }
 0x1e7   :  { %v437_v3 = vcombine.low %v404_v59, %v412_v62  ;;  %v413_v4 = vcombine.high %v394_v63, %v394_v63  ;;  %v420_v5 = vrot.slane %v394_v63, %v4014_v53 }
 0x1e9   :  { %v427_v6 = vrot.slane %v413_v4, %v4014_v53  ;;  %v428_v7 = vcombine.high %v420_v5, %v420_v5  ;;  %v438_v8 = vcombine.low %v411_v0, %v420_v5  ;;  %v445_v9 = vrot.slane %v437_v3, %v4014_v53 }
 0x1eb   :  { %v452_v10 = vrot.slane %v438_v8, %v4014_v53  ;;  %v454_v11 = vcombine.low %v428_v7, %v427_v6 }
 0x1ed   :  { %v461_v12 = vrot.slane %v454_v11, %v4014_v53  ;;  %v453_v13 = vcombine.low %v445_v9, %v452_v10 }
 0x1ef   :  { %3323 = vmatprep.mubr.msk.f32.mxu1 %vm462_vm7, %v453_v13 }
 0x1f0   :  { %3324 = vmatmul.mubr.msk.f32.vlgmr.msra.gmra.mrb[2].mxu1 %vm462_vm7, %v461_v12 }
 0x1f1   :  { %3328 = vmatprep.mubr.msk.f32.mxu1 %vm3797_vm5, %v3796_v1 }
 0x2c3   :  { %v3325_v14 = vpop.f32.mrb[2].mxu1 }
 0x2c4   :  { %v533_v15 = vpop.f32.mrb[3].mxu1  ;;  %v567_v16 = vrot.slane %v3325_v14, %v4014_v53 }
 0x2c5   :  { %v544_v17 = vcombine.high %v533_v15, %v533_v15  ;;  %v551_v18 = vrot.slane %v533_v15, %v4014_v53 }
 0x2c6   :  { %v568_v21 = vcombine.high %v567_v16, %v567_v16 }
 0x2c7   :  { %v558_v19 = vrot.slane %v544_v17, %v4014_v53  ;;  %v559_v20 = vcombine.high %v551_v18, %v551_v18 }
 0x2c8   :  { %v678_v27 = vrot.slane %v568_v21, %v4014_v53 }
 0x2c9   :  { %v560_v22 = vcombine.high %v558_v19, %v558_v19  ;;  %v576_v23 = vcombine.low %v551_v18, %v559_v20  ;;  %v590_v25 = vrot.slane %v558_v19, %v4014_v53 }
 0x2cb   :  { %v583_v24 = vrot.slane %v576_v23, %v4014_v53  ;;  %v664_v26 = vcombine.low %v560_v22, %v567_v16 }
 0x2cd   :  { %v591_v28 = vcombine.low %v583_v24, %v590_v25  ;;  %v671_v29 = vrot.slane %v664_v26, %v4014_v53  ;;  %v1131_v25 = vld [vmem:[#allocation5 + $0x8] sm:$0xff] }
 0x2cf   :  { %v679_v30 = vcombine.low %v671_v29, %v678_v27  ;;  %3327 = vmatpush3.msk.msra.mxu1 %vm246_vm4, %v591_v28  ;;  %v3799_v27 = vmov 0.0|0.0   ;;  %v1132_v28 = vld [vmem:[#allocation5 + $0x10] sm:$0xff]  ;;  %v1133_v29 = vld [vmem:[#allocation5 + $0x18] sm:$0xff] }
 0x2d0   :  { %3329 = vmatmul.mubr.msk.f32.vlgmr.msra.gmra.mrb[4].mxu1 %vm242_vm6, %v3975_v32  ;;  %3331 = vmatprep.subr.mxu1 %v3796_v1 }
 0x2d1   :  { %3332 = vmatpush3.msk.msra.mxu1 %vm246_vm4, %v679_v30  ;;  %3333 = vmatprep.mubr.msk.f32.mxu1 %vm3797_vm5, %v3796_v1  ;;  %v3452_v30 = vpack.c.bf16 %v1133_v29, %v1132_v28  ;;  %v3553_v28 = vld [vmem:[%s4603_s11 + $0x260] sm:$0xff]  }
 0x2d2   :  { %3433 = vmatprep.subr.bf16.mxu1 %v3432_v34  ;;  %v3554_v29 = vld [vmem:[%s4603_s11 + $0x220] sm:$0xff]  }
 0x2d4   :  { %3334 = vmatmul.mubr.msk.f32.vlgmr.msra.gmra.mrb[6].mxu1 %vm242_vm6, %v3981_v35 }
 0x2d5   :  { %3435 = vmatpush3.bf16.msra.mxu1 %v3432_v34  ;;  %v1135_v34 = vld [vmem:[#allocation5 + $0x28] sm:$0xff] }
 0x2d6   :  { %3437 = vmatprep.subr.bf16.mxu1 %v3436_v38  ;;  %v3455_v37 = vpack.c.bf16 %v1135_v34, %v1134_v33  ;;  %v3562_v33 = vld [vmem:[%s4603_s11 + $0x230] sm:$0xff]   ;;  %v1231_v34 = vld [vmem:[%s4593_s1 + $0x8] sm:$0xff] }
 0x2d9   :  { %3439 = vmatpush3.bf16.msra.mxu1 %v3436_v38  ;;  %v3480_v38 = vld [vmem:[%s4603_s11 + $0x50] sm:$0xff]  }
 0x2da   :  { %3441 = vmatprep.subr.bf16.mxu1 %v3440_v41 }
 0x2dd   :  { %3443 = vmatpush3.bf16.msra.mxu1 %v3440_v41  ;;  %v3481_v41 = vld [vmem:[%s4603_s11 + $0x10] sm:$0xff]  }
 0x2de   :  { %3445 = vmatprep.subr.bf16.mxu1 %v3444_v44 }
 0x2e1   :  { %3447 = vmatpush3.bf16.msra.mxu1 %v3444_v44  ;;  %v3484_v44 = vld [vmem:[%s4603_s11 + $0x58] sm:$0xff]  }
 0x3a3   :  { %v660_v46 = vpop.f32.mrb[4].mxu1 }
 0x3a4   :  { %v661_v47 = vadd.f32 %v2909_v45, %v660_v46  ;;  %v3330_v48 = vpop.f32.mrb[5].mxu1  ;;  %v3800_v46 = vmov 1966171168  }
 0x3a5   :  { %v3488_v48 = vld [vmem:[%s4603_s11 + $0x60] sm:$0xff]  }
 0x3a6   :  { %v752_v49 = vmax.f32 %v661_v47, 0.0  ;;  %v1492_v47 = vunpack.c.l.s4 %v3800_v46  ;;  %v3577_v46 = vld [vmem:[%s4603_s11 + $0x350] sm:$0xff]  }
 0x3a7   :  { %v748_v50 = vpop.f32.mrb[6].mxu1 }
 0x3a8   :  { %v756_v51 = vcombine.high %v752_v49, %v752_v49  ;;  %v763_v52 = vrot.slane %v752_v49, %v4014_v53  ;;  %v749_v54 = vadd.f32 %v2909_v45, %v748_v50  ;;  %v3335_v55 = vpop.f32.mrb[7].mxu1  ;;  %v3485_v45 = vld [vmem:[%s4603_s11 + $0x18] sm:$0xff]   ;;  %v3489_v49 = vld [vmem:[%s4603_s11 + $0x20] sm:$0xff]   ;;  %v1493_v50 = vunpack.c.0.s8 %v1492_v47  ;;  %v3578_v47 = vld [vmem:[%s4603_s11 + $0x310] sm:$0xff]  }
 0x3a9   :  { %v3496_v55 = vld [vmem:[%s4603_s11 + $0x70] sm:$0xff]  }
 0x3aa   :  { %v771_v56 = vcombine.high %v763_v52, %v763_v52  ;;  %v753_v57 = vmax.f32 %v749_v54, 0.0  ;;  %v770_v58 = vrot.slane %v756_v51, %v4014_v53  ;;  %v3492_v51 = vld [vmem:[%s4603_s11 + $0x68] sm:$0xff]   ;;  %v4137_v54 = vsub.s32 %v1493_v50, %v3956_v2  ;;  %v3585_v50 = vld [vmem:[%s4603_s11 + $0x360] sm:$0xff]  }
 0x3ac   :  { %v796_v59 = vcombine.low %v763_v52, %v771_v56  ;;  %v772_v60 = vcombine.high %v753_v57, %v753_v57  ;;  %v779_v61 = vrot.slane %v753_v57, %v4014_v53  ;;  %v3493_v52 = vld [vmem:[%s4603_s11 + $0x28] sm:$0xff]   ;;  %v3497_v56 = vld [vmem:[%s4603_s11 + $0x30] sm:$0xff]   ;;  %v1230_v57 = vld [vmem:[%s4593_s1] sm:$0xff] }
 0x3ad   :  { %v1497_v2 = vrot.slane %v1230_v57, %v4137_v54 }
 0x3ae   :  { %v786_v62 = vrot.slane %v772_v60, %v4014_v53  ;;  %v787_v63 = vcombine.high %v779_v61, %v779_v61  ;;  %v797_v0 = vcombine.low %v770_v58, %v779_v61  ;;  %v804_v3 = vrot.slane %v796_v59, %v4014_v53  ;;  %v3500_v58 = vld [vmem:[%s4603_s11 + $0x78] sm:$0xff]  }
 0x3af   :  { %v3501_v59 = vld [vmem:[%s4603_s11 + $0x38] sm:$0xff]   ;;  %v1505_v60 = vcombine.high %v1497_v2, %v1497_v2 }
 0x3b0   :  { %v811_v4 = vrot.slane %v797_v0, %v4014_v53  ;;  %v813_v5 = vcombine.low %v787_v63, %v786_v62  ;;  %v3504_v62 = vld [vmem:[%s4603_s11 + $0x140] sm:$0xff]   ;;  %v4162_v63 = vrot.slane %v1497_v2, %v4137_v54 }
 0x3b1   :  { %v4156_v61 = vrot.slane %v1505_v60, %v4137_v54  ;;  %v3505_v0 = vld [vmem:[%s4603_s11 + $0x100] sm:$0xff]  }
 0x3b2   :  { %v820_v6 = vrot.slane %v813_v5, %v4014_v53  ;;  %v812_v7 = vcombine.low %v804_v3, %v811_v4  ;;  %v3508_v3 = vld [vmem:[%s4603_s11 + $0x148] sm:$0xff]   ;;  %v3512_v5 = vld [vmem:[%s4603_s11 + $0x150] sm:$0xff]  }
 0x3b3   :  { %v3509_v4 = vld [vmem:[%s4603_s11 + $0x108] sm:$0xff]  }
 0x3b4   :  { %3352 = vmatprep.mubr.msk.f32.mxu1 %vm462_vm7, %v812_v7  ;;  %v3516_v7 = vld [vmem:[%s4603_s11 + $0x158] sm:$0xff]  }
 0x3b5   :  { %3353 = vmatmul.mubr.msk.f32.vlgmr.msra.gmra.mrb[8].mxu1 %vm462_vm7, %v820_v6  ;;  %v3513_v6 = vld [vmem:[%s4603_s11 + $0x110] sm:$0xff]  }
 0x3b6   :  { %2404 = vmatprep.mubr.bf16.mxu1 %v4156_v61 }
 0x488   :  { %v3354_v8 = vpop.f32.mrb[8].mxu1 }
 0x489   :  { %v891_v9 = vpop.f32.mrb[9].mxu1  ;;  %v925_v10 = vrot.slane %v3354_v8, %v4014_v53  ;;  %v3517_v8 = vld [vmem:[%s4603_s11 + $0x118] sm:$0xff]  }
 0x48a   :  { %v902_v11 = vcombine.high %v891_v9, %v891_v9  ;;  %v909_v12 = vrot.slane %v891_v9, %v4014_v53  ;;  %v3520_v9 = vld [vmem:[%s4603_s11 + $0x160] sm:$0xff]  }
 0x48b   :  { %v926_v15 = vcombine.high %v925_v10, %v925_v10 }
 0x48c   :  { %v916_v13 = vrot.slane %v902_v11, %v4014_v53  ;;  %v917_v14 = vcombine.high %v909_v12, %v909_v12  ;;  %v3524_v11 = vld [vmem:[%s4603_s11 + $0x168] sm:$0xff]  }
 0x48d   :  { %v1036_v21 = vrot.slane %v926_v15, %v4014_v53  ;;  %v1490_v15 = vcombine.high %v1230_v57, %v1230_v57 }
 0x48e   :  { %v918_v16 = vcombine.high %v916_v13, %v916_v13  ;;  %v934_v17 = vcombine.low %v909_v12, %v917_v14  ;;  %v948_v19 = vrot.slane %v916_v13, %v4014_v53  ;;  %v3525_v12 = vld [vmem:[%s4603_s11 + $0x128] sm:$0xff]   ;;  %v3528_v13 = vld [vmem:[%s4603_s11 + $0x170] sm:$0xff]  }
 0x48f   :  { %v3529_v14 = vld [vmem:[%s4603_s11 + $0x130] sm:$0xff]  }
 0x490   :  { %v941_v18 = vrot.slane %v934_v17, %v4014_v53  ;;  %v1022_v20 = vcombine.low %v918_v16, %v925_v10  ;;  %v3521_v10 = vld [vmem:[%s4603_s11 + $0x120] sm:$0xff]   ;;  %v3532_v16 = vld [vmem:[%s4603_s11 + $0x178] sm:$0xff]   ;;  %v1504_v17 = vrot.slane %v1490_v15, %v4137_v54 }
 0x492   :  { %v949_v22 = vcombine.low %v941_v18, %v948_v19  ;;  %v1029_v23 = vrot.slane %v1022_v20, %v4014_v53  ;;  %v1130_v53 = vld [vmem:[#allocation5] sm:$0xff]  ;;  %v3533_v18 = vld [vmem:[%s4603_s11 + $0x138] sm:$0xff]   ;;  %v1506_v19 = vcombine.high %v1504_v17, %v1504_v17 }
 0x493   :  { %v3449_v26 = vpack.c.bf16 %v1131_v25, %v1130_v53  ;;  %v3542_v53 = vld [vmem:[%s4603_s11 + $0x208] sm:$0xff]   ;;  %v3545_v25 = vld [vmem:[%s4603_s11 + $0x250] sm:$0xff]  }
 0x494   :  { %v1037_v24 = vcombine.low %v1029_v23, %v1036_v21  ;;  %3356 = vmatpush3.msk.msra.mxu0 %vm246_vm4, %v949_v22  ;;  %v4213_v20 = vrot.slane %v1506_v19, %v4137_v54  ;;  %v3537_v21 = vld [vmem:[%s4603_s11 + $0x240] sm:$0xff]   ;;  %v4219_v22 = vrot.slane %v1504_v17, %v4137_v54 }
 0x495   :  { %3358 = vmatmul.mubr.msk.f32.vlgmr.msra.gmra.mrb[2].mxu0 %vm242_vm6, %v3975_v32  ;;  %3360 = vmatprep.subr.mxu0 %v3796_v1  ;;  %v3476_v32 = vld [vmem:[%s4603_s11 + $0x40] sm:$0xff]  }
 0x496   :  { %3361 = vmatpush3.msk.msra.mxu0 %vm246_vm4, %v1037_v24  ;;  %3362 = vmatprep.mubr.msk.f32.mxu0 %vm3797_vm5, %v3796_v1  ;;  %v3538_v23 = vld [vmem:[%s4603_s11 + $0x200] sm:$0xff]   ;;  %v3541_v24 = vld [vmem:[%s4603_s11 + $0x248] sm:$0xff]  }
 0x497   :  { %3448 = vmatprep.subr.bf16.mxu0 %v3799_v27  ;;  %3107 = vmatprep.subr.bf16.mxu1 %v3476_v32  ;;  %v3550_v32 = vld [vmem:[%s4603_s11 + $0x218] sm:$0xff]  }
 0x499   :  { %3363 = vmatmul.mubr.msk.f32.vlgmr.msra.gmra.mrb[4].mxu0 %vm242_vm6, %v3981_v35  ;;  %v3477_v35 = vld [vmem:[%s4603_s11] sm:$0xff]  }
 0x49a   :  { %3381 = vmatprep.mubr.msk.f32.mxu0 %vm3797_vm5, %v3796_v1  ;;  %3450 = vmatpush3.bf16.msra.mxu0 %v3449_v26  ;;  %v3546_v26 = vld [vmem:[%s4603_s11 + $0x210] sm:$0xff]  }
 0x49b   :  { %3451 = vmatprep.subr.bf16.mxu0 %v3799_v27  ;;  %3108 = vmatpush3.bf16.msra.mxu1 %v3477_v35  ;;  %v3557_v35 = vld [vmem:[%s4603_s11 + $0x268] sm:$0xff]  }
 0x49c   :  { %3109 = vmatprep.subr.bf16.mxu1 %v3478_v31  ;;  %v3561_v31 = vld [vmem:[%s4603_s11 + $0x270] sm:$0xff]  }
 0x49e   :  { %3453 = vmatpush3.bf16.msra.mxu0 %v3452_v30  ;;  %v3558_v30 = vld [vmem:[%s4603_s11 + $0x228] sm:$0xff]  }
 0x49f   :  { %3454 = vmatprep.subr.bf16.mxu0 %v3799_v27  ;;  %3110 = vmatpush3.bf16.msra.mxu1 %v3479_v36  ;;  %v3565_v36 = vld [vmem:[%s4603_s11 + $0x278] sm:$0xff]  }
 0x4a0   :  { %3111 = vmatprep.subr.bf16.mxu1 %v3480_v38  ;;  %v3566_v38 = vld [vmem:[%s4603_s11 + $0x238] sm:$0xff]  }
 0x4a2   :  { %3456 = vmatpush3.bf16.msra.mxu0 %v3455_v37  ;;  %v1546_v37 = vrot.slane %v1231_v34, %v4137_v54 }
 0x4a3   :  { %3457 = vmatprep.subr.bf16.mxu0 %v3799_v27  ;;  %3112 = vmatpush3.bf16.msra.mxu1 %v3481_v41  ;;  %v3549_v27 = vld [vmem:[%s4603_s11 + $0x258] sm:$0xff]   ;;  %v3569_v41 = vld [vmem:[%s4603_s11 + $0x340] sm:$0xff]  }
 0x4a4   :  { %3113 = vmatprep.subr.bf16.mxu1 %v3484_v44  ;;  %v1554_v39 = vcombine.high %v1546_v37, %v1546_v37  ;;  %v3573_v44 = vld [vmem:[%s4603_s11 + $0x348] sm:$0xff]  }
 0x4a6   :  { %3459 = vmatpush3.bf16.msra.mxu0 %v3458_v42  ;;  %v4273_v40 = vrot.slane %v1554_v39, %v4137_v54  ;;  %v4279_v42 = vrot.slane %v1546_v37, %v4137_v54  ;;  %v3494_v37 = vld [vmem:[%s4603_s11 + $0xd8] sm:$0xff]  }
 0x4a7   :  { %3129 = vmatprep.subr.bf16.mxu0 %v3482_v43  ;;  %3114 = vmatpush3.bf16.msra.mxu1 %v3485_v45  ;;  %v3570_v43 = vld [vmem:[%s4603_s11 + $0x300] sm:$0xff]   ;;  %v3574_v45 = vld [vmem:[%s4603_s11 + $0x308] sm:$0xff]   ;;  %v3495_v39 = vld [vmem:[%s4603_s11 + $0x98] sm:$0xff]  }
 0x4a8   :  { %3115 = vmatprep.subr.bf16.mxu1 %v3488_v48  ;;  %v3581_v48 = vld [vmem:[%s4603_s11 + $0x358] sm:$0xff]  }
 0x4ab   :  { %3116 = vmatpush3.bf16.msra.mxu1 %v3489_v49  ;;  %v3582_v49 = vld [vmem:[%s4603_s11 + $0x318] sm:$0xff]  }
 0x4ac   :  { %3117 = vmatprep.subr.bf16.mxu1 %v3492_v51  ;;  %v3586_v51 = vld [vmem:[%s4603_s11 + $0x320] sm:$0xff]  }
 0x4af   :  { %3118 = vmatpush3.bf16.msra.mxu1 %v3493_v52  ;;  %v2916_v52 = vld [vmem:[%s4599_s7] ss:$0 sm:$0xff] }
 0x4b0   :  { %3119 = vmatprep.subr.bf16.mxu1 %v3496_v55  ;;  %v3589_v55 = vld [vmem:[%s4603_s11 + $0x368] sm:$0xff]  }
 0x4b3   :  { %3120 = vmatpush3.bf16.msra.mxu1 %v3497_v56  ;;  %v3590_v56 = vld [vmem:[%s4603_s11 + $0x328] sm:$0xff]  }
 0x4b4   :  { %3121 = vmatprep.subr.bf16.mxu1 %v3500_v58 }
 0x4b7   :  { %3122 = vmatpush3.bf16.msra.mxu1 %v3501_v59  ;;  %v3593_v59 = vld [vmem:[%s4603_s11 + $0x370] sm:$0xff]  }
 0x4b8   :  { %3151 = vmatprep.subr.bf16.mxu1 %v3504_v62  ;;  %v3594_v62 = vld [vmem:[%s4603_s11 + $0x330] sm:$0xff]  }
 0x4ba   :  { %2405 = vmatmul.mubr.bf16.vlgmr.msra.gmra.mrb[12].mxu1 %v4162_v63 }
 0x4bb   :  { %3152 = vmatpush3.bf16.msra.mxu1 %v3505_v0  ;;  %2484 = vmatprep.mubr.bf16.mxu1 %v4213_v20  ;;  %v1539_v0 = vcombine.high %v1231_v34, %v1231_v34  ;;  %v3607_v34 = vld [vmem:[%s4602_s10 + $0x8] sm:$0xff]  }
 0x4bc   :  { %3153 = vmatprep.subr.bf16.mxu1 %v3508_v3 }
 0x4bf   :  { %3154 = vmatpush3.bf16.msra.mxu1 %v3509_v4 }
 0x4c0   :  { %3155 = vmatprep.subr.bf16.mxu1 %v3512_v5 }
 0x4c3   :  { %3156 = vmatpush3.bf16.msra.mxu1 %v3513_v6 }
 0x4c4   :  { %3157 = vmatprep.subr.bf16.mxu1 %v3516_v7  ;;  %v1553_v7 = vrot.slane %v1539_v0, %v4137_v54  ;;  %v3535_v0 = vld [vmem:[%s4603_s11 + $0x1a8] sm:$0xff]  }
 0x4c7   :  { %3158 = vmatpush3.bf16.msra.mxu1 %v3517_v8 }
 0x4c8   :  { %3159 = vmatprep.subr.bf16.mxu1 %v3520_v9  ;;  %v3597_v9 = vld [vmem:[%s4603_s11 + $0x378] sm:$0xff]  }
 0x4cb   :  { %3160 = vmatpush3.bf16.msra.mxu1 %v3521_v10 }
 0x4cc   :  { %3161 = vmatprep.subr.bf16.mxu1 %v3524_v11  ;;  %v3598_v11 = vld [vmem:[%s4603_s11 + $0x338] sm:$0xff]  }
 0x4cf   :  { %3162 = vmatpush3.bf16.msra.mxu1 %v3525_v12  ;;  %v1555_v12 = vcombine.high %v1553_v7, %v1553_v7 }
 0x4d0   :  { %3163 = vmatprep.subr.bf16.mxu1 %v3528_v13 }
 0x4d1   :  { %v4335_v15 = vrot.slane %v1555_v12, %v4137_v54  ;;  %v3552_v12 = vld [vmem:[%s4603_s11 + $0x288] sm:$0xff]  }
 0x4d3   :  { %3164 = vmatpush3.bf16.msra.mxu1 %v3529_v14 }
 0x4d4   :  { %3165 = vmatprep.subr.bf16.mxu1 %v3532_v16 }
 0x4d7   :  { %3166 = vmatpush3.bf16.msra.mxu1 %v3533_v18  ;;  %v4338_v18 = vrot.slane %v1553_v7, %v4137_v54  ;;  %v3547_v7 = vld [vmem:[%s4603_s11 + $0x2c0] sm:$0xff]  }
 0x4d8   :  { %3195 = vmatprep.subr.bf16.mxu1 %v3537_v21 }
 0x4da   :  { %2485 = vmatmul.mubr.bf16.vlgmr.msra.gmra.mrb[16].mxu1 %v4219_v22 }
 0x4db   :  { %3196 = vmatpush3.bf16.msra.mxu1 %v3538_v23  ;;  %2564 = vmatprep.mubr.bf16.mxu1 %v4273_v40 }
 0x4dc   :  { %3197 = vmatprep.subr.bf16.mxu1 %v3541_v24 }
 0x4df   :  { %3198 = vmatpush3.bf16.msra.mxu1 %v3542_v53 }
 0x4e0   :  { %3199 = vmatprep.subr.bf16.mxu1 %v3545_v25 }
 0x4e3   :  { %3200 = vmatpush3.bf16.msra.mxu1 %v3546_v26 }
 0x4e4   :  { %3201 = vmatprep.subr.bf16.mxu1 %v3549_v27 }
 0x4e7   :  { %3202 = vmatpush3.bf16.msra.mxu1 %v3550_v32 }
 0x4e8   :  { %3203 = vmatprep.subr.bf16.mxu1 %v3553_v28  ;;  %v3483_v28 = vld [vmem:[%s4603_s11 + $0x80] sm:$0xff]  }
 0x4eb   :  { %3204 = vmatpush3.bf16.msra.mxu1 %v3554_v29  ;;  %v1537_v29 = vcombine.high %v4156_v61, %v4156_v61  ;;  %v3490_v61 = vld [vmem:[%s4603_s11 + $0xd0] sm:$0xff]  }
 0x4ec   :  { %3205 = vmatprep.subr.bf16.mxu1 %v3557_v35  ;;  %v3486_v35 = vld [vmem:[%s4603_s11 + $0xc8] sm:$0xff]  }
 0x4ef   :  { %3206 = vmatpush3.bf16.msra.mxu1 %v3558_v30 }
 0x4f0   :  { %3207 = vmatprep.subr.bf16.mxu1 %v3561_v31  ;;  %v3606_v31 = vld [vmem:[%s4602_s10] sm:$0xff]  }
 0x4f3   :  { %3208 = vmatpush3.bf16.msra.mxu1 %v3562_v33  ;;  %v3487_v33 = vld [vmem:[%s4603_s11 + $0x88] sm:$0xff]  }
 0x4f4   :  { %3209 = vmatprep.subr.bf16.mxu1 %v3565_v36  ;;  %v3491_v36 = vld [vmem:[%s4603_s11 + $0x90] sm:$0xff]  }
 0x4f7   :  { %3210 = vmatpush3.bf16.msra.mxu1 %v3566_v38  ;;  %v3608_v38 = vld [vmem:[%s4602_s10 + $0x10] sm:$0xff]  }
 0x4f8   :  { %3239 = vmatprep.subr.bf16.mxu1 %v3569_v41  ;;  %v3498_v41 = vld [vmem:[%s4603_s11 + $0xe0] sm:$0xff]  }
 0x4fa   :  { %2565 = vmatmul.mubr.bf16.vlgmr.msra.gmra.mrb[20].mxu1 %v4279_v42 }
 0x4fb   :  { %3240 = vmatpush3.bf16.msra.mxu1 %v3570_v43  ;;  %2644 = vmatprep.mubr.bf16.mxu1 %v4335_v15  ;;  %v3499_v43 = vld [vmem:[%s4603_s11 + $0xa0] sm:$0xff]  }
 0x4fc   :  { %3241 = vmatprep.subr.bf16.mxu1 %v3573_v44  ;;  %v3502_v44 = vld [vmem:[%s4603_s11 + $0xe8] sm:$0xff]  }
 0x4ff   :  { %3242 = vmatpush3.bf16.msra.mxu1 %v3574_v45  ;;  %v3503_v45 = vld [vmem:[%s4603_s11 + $0xa8] sm:$0xff]  }
 0x500   :  { %3243 = vmatprep.subr.bf16.mxu1 %v3577_v46  ;;  %v3506_v46 = vld [vmem:[%s4603_s11 + $0xf0] sm:$0xff]  }
 0x503   :  { %3244 = vmatpush3.bf16.msra.mxu1 %v3578_v47  ;;  %v3507_v47 = vld [vmem:[%s4603_s11 + $0xb0] sm:$0xff]  }
 0x504   :  { %3245 = vmatprep.subr.bf16.mxu1 %v3581_v48  ;;  %v3510_v48 = vld [vmem:[%s4603_s11 + $0xf8] sm:$0xff]  }
 0x507   :  { %3246 = vmatpush3.bf16.msra.mxu1 %v3582_v49  ;;  %v3511_v49 = vld [vmem:[%s4603_s11 + $0xb8] sm:$0xff]  }
 0x508   :  { %3247 = vmatprep.subr.bf16.mxu1 %v3585_v50  ;;  %v3514_v50 = vld [vmem:[%s4603_s11 + $0x1c0] sm:$0xff]  }
 0x50b   :  { %3248 = vmatpush3.bf16.msra.mxu1 %v3586_v51  ;;  %v1535_v51 = vcombine.high %v4162_v63, %v4162_v63  ;;  %v3522_v63 = vld [vmem:[%s4603_s11 + $0x1d0] sm:$0xff]  }
 0x50c   :  { %3249 = vmatprep.subr.bf16.mxu1 %v3589_v55  ;;  %v1538_v55 = vcombine.high %v4213_v20, %v4213_v20  ;;  %v3523_v20 = vld [vmem:[%s4603_s11 + $0x190] sm:$0xff]  }
 0x50f   :  { %3250 = vmatpush3.bf16.msra.mxu1 %v3590_v56  ;;  %v3518_v56 = vld [vmem:[%s4603_s11 + $0x1c8] sm:$0xff]  }
 0x510   :  { %3251 = vmatprep.subr.bf16.mxu1 %v3593_v59  ;;  %v3530_v59 = vld [vmem:[%s4603_s11 + $0x1e0] sm:$0xff]  }
 0x513   :  { %3252 = vmatpush3.bf16.msra.mxu1 %v3594_v62  ;;  %v3534_v62 = vld [vmem:[%s4603_s11 + $0x1e8] sm:$0xff]  }
 0x514   :  { %3253 = vmatprep.subr.bf16.mxu1 %v3597_v9  ;;  %v3548_v9 = vld [vmem:[%s4603_s11 + $0x280] sm:$0xff]  }
 0x517   :  { %3254 = vmatpush3.bf16.msra.mxu1 %v3598_v11  ;;  %v3551_v11 = vld [vmem:[%s4603_s11 + $0x2c8] sm:$0xff]  }
 0x518   :  { %3384 = vmatprep.subr.bf16.mxu1 %v3796_v1 }
 0x51a   :  { %2645 = vmatmul.mubr.bf16.vlgmr.msra.gmra.mrb[24].mxu1 %v4338_v18 }
 0x51b   :  { %3392 = vmatprep.mubr.msk.bf16.mxu1 %vm3797_vm5, %v3796_v1  ;;  %3385 = vmatpush3.bf16.msra.mxu1 %v3606_v31 }
 0x51c   :  { %3386 = vmatprep.subr.bf16.mxu1 %v3796_v1 }
 0x51f   :  { %3387 = vmatpush3.bf16.msra.mxu1 %v3607_v34 }
 0x520   :  { %3388 = vmatprep.subr.bf16.mxu1 %v3796_v1 }
 0x523   :  { %3389 = vmatpush3.bf16.msra.mxu1 %v3608_v38 }
 0x524   :  { %3390 = vmatprep.subr.bf16.mxu1 %v3796_v1 }
 0x568   :  { %v1018_v57 = vpop.f32.mrb[2].mxu0 }
 0x569   :  { %v1019_v58 = vadd.f32 %v2916_v52, %v1018_v57  ;;  %v3359_v2 = vpop.f32.mrb[3].mxu0  ;;  %v3519_v57 = vld [vmem:[%s4603_s11 + $0x188] sm:$0xff]  }
 0x56a   :  { %v3527_v2 = vld [vmem:[%s4603_s11 + $0x198] sm:$0xff]  }
 0x56b   :  { %v1110_v60 = vmax.f32 %v1019_v58, 0.0  ;;  %v3526_v58 = vld [vmem:[%s4603_s11 + $0x1d8] sm:$0xff]  }
 0x56c   :  { %v1106_v3 = vpop.f32.mrb[4].mxu0 }
 0x56d   :  { %v1113_v4 = vsel %vm1112_vm8, %v1110_v60, 0.0  ;;  %v1107_v5 = vadd.f32 %v2916_v52, %v1106_v3  ;;  %v3364_v6 = vpop.f32.mrb[5].mxu0  ;;  %v3515_v52 = vld [vmem:[%s4603_s11 + $0x180] sm:$0xff]   ;;  %v3539_v3 = vld [vmem:[%s4603_s11 + $0x1f0] sm:$0xff]  }
 0x56e   :  { %v1114_v8 = vrot.slane %v1113_v4, 4  ;;  %v3531_v60 = vld [vmem:[%s4603_s11 + $0x1a0] sm:$0xff]   ;;  %v3544_v6 = vld [vmem:[%s4603_s11 + $0x1b8] sm:$0xff]  }
 0x56f   :  { %v1111_v10 = vmax.f32 %v1107_v5, 0.0  ;;  %v3543_v5 = vld [vmem:[%s4603_s11 + $0x1f8] sm:$0xff]  }
 0x570   :  { %v1115_v13 = vadd.f32 %v1114_v8, %v1113_v4  ;;  %v3540_v4 = vld [vmem:[%s4603_s11 + $0x1b0] sm:$0xff]   ;;  %v1536_v8 = vcombine.high %v4219_v22, %v4219_v22 }
 0x571   :  { %v1120_v14 = vsel %vm1112_vm8, %v1111_v10, 0.0  ;;  %v1586_v10 = vcombine.high %v4273_v40, %v4273_v40  ;;  %v3555_v22 = vld [vmem:[%s4603_s11 + $0x2d0] sm:$0xff]  }
 0x572   :  { %v1116_v16 = vrot.slane %v1115_v13, 2  ;;  %v1121_v17 = vrot.slane %v1120_v14, 4  ;;  %v3556_v40 = vld [vmem:[%s4603_s11 + $0x290] sm:$0xff]  }
 0x574   :  { %v1117_v19 = vadd.f32 %v1116_v16, %v1115_v13  ;;  %v1122_v21 = vadd.f32 %v1121_v17, %v1120_v14  ;;  %v3559_v13 = vld [vmem:[%s4603_s11 + $0x2d8] sm:$0xff]   ;;  %v3563_v16 = vld [vmem:[%s4603_s11 + $0x2e0] sm:$0xff]  }
 0x575   :  { %v3560_v14 = vld [vmem:[%s4603_s11 + $0x298] sm:$0xff]   ;;  %v3564_v17 = vld [vmem:[%s4603_s11 + $0x2a0] sm:$0xff]  }
 0x576   :  { %v1118_v23 = vrot.slane %v1117_v19, 1  ;;  %v1123_v24 = vrot.slane %v1122_v21, 2 }
 0x578   :  { %v1124_v53 = vadd.f32 %v1123_v24, %v1122_v21  ;;  %v1119_v25 = vadd.f32 %v1118_v23, %v1117_v19  ;;  %v3567_v19 = vld [vmem:[%s4603_s11 + $0x2e8] sm:$0xff]   ;;  %v3571_v23 = vld [vmem:[%s4603_s11 + $0x2f0] sm:$0xff]   ;;  %v3609_v24 = vld [vmem:[%s4602_s10 + $0x18] sm:$0xff]  }
 0x579   :  { %v3568_v21 = vld [vmem:[%s4603_s11 + $0x2a8] sm:$0xff]   ;;  %3391 = vmatpush3.bf16.msra.mxu1 %v3609_v24 }
 0x57a   :  { %v1125_v26 = vrot.slane %v1124_v53, 1  ;;  %v1128_v54 = vmul.f32 0.16666667, %v1119_v25  ;;  %v3575_v25 = vld [vmem:[%s4603_s11 + $0x2f8] sm:$0xff]  }
 0x57c   :  { %v1126_v27 = vadd.f32 %v1125_v26, %v1124_v53  ;;  %v3572_v53 = vld [vmem:[%s4603_s11 + $0x2b0] sm:$0xff]   ;;  %v3576_v26 = vld [vmem:[%s4603_s11 + $0x2b8] sm:$0xff]  }
 0x57e   :  { %v1129_v32 = vmul.f32 0.16666667, %v1126_v27  ;;  %v3579_v27 = vld [vmem:[%s4603_s11 + $0x3c0] sm:$0xff]  }
 0x580   :  { %v1148_v30 = vsel %vm1147_vm9, %v1129_v32, %v1128_v54  ;;  %v1584_v54 = vcombine.high %v4279_v42, %v4279_v42  ;;  %v3580_v32 = vld [vmem:[%s4603_s11 + $0x380] sm:$0xff]   ;;  %v3587_v42 = vld [vmem:[%s4603_s11 + $0x3d0] sm:$0xff]  }
 0x581   :  { %3382 = vmatmul.mubr.msk.f32.vlgmr.msra.gmra.mrb[6].mxu0 %vm462_vm7, %v1148_v30  ;;  %v3591_v30 = vld [vmem:[%s4603_s11 + $0x3d8] sm:$0xff]  }
 0x582   :  { %3130 = vmatpush3.bf16.msra.mxu0 %v3483_v28  ;;  %2444 = vmatprep.mubr.bf16.mxu0 %v1537_v29  ;;  %v1587_v28 = vcombine.high %v4335_v15, %v4335_v15  ;;  %v3583_v29 = vld [vmem:[%s4603_s11 + $0x3c8] sm:$0xff]   ;;  %v3588_v15 = vld [vmem:[%s4603_s11 + $0x390] sm:$0xff]  }
 0x583   :  { %3131 = vmatprep.subr.bf16.mxu0 %v3486_v35  ;;  %v3584_v35 = vld [vmem:[%s4603_s11 + $0x388] sm:$0xff]  }
 0x586   :  { %3132 = vmatpush3.bf16.msra.mxu0 %v3487_v33 }
 0x587   :  { %3133 = vmatprep.subr.bf16.mxu0 %v3490_v61  ;;  %v3592_v61 = vld [vmem:[%s4603_s11 + $0x398] sm:$0xff]  }
 0x58a   :  { %3134 = vmatpush3.bf16.msra.mxu0 %v3491_v36 }
 0x58b   :  { %3135 = vmatprep.subr.bf16.mxu0 %v3494_v37  ;;  %v3595_v37 = vld [vmem:[%s4603_s11 + $0x3e0] sm:$0xff]  }
 0x58d   :  { %v3123_v31 = vpop.f32.mrb[12].mxu1 }
 0x58e   :  { %3136 = vmatpush3.bf16.msra.mxu0 %v3495_v39  ;;  %v3124_v33 = vpop.f32.mrb[13].mxu1  ;;  %v3596_v39 = vld [vmem:[%s4603_s11 + $0x3a0] sm:$0xff]  }
 0x58f   :  { %3137 = vmatprep.subr.bf16.mxu0 %v3498_v41  ;;  %v4540_v34 = vadd.f32 %v3124_v33, %v3123_v31  ;;  %v3126_v36 = vpop.f32.mrb[14].mxu1  ;;  %v3599_v41 = vld [vmem:[%s4603_s11 + $0x3e8] sm:$0xff]  }
 0x590   :  { %v3127_v38 = vpop.f32.mrb[15].mxu1 }
 0x592   :  { %3138 = vmatpush3.bf16.msra.mxu0 %v3499_v43  ;;  %v3601_v43 = vld [vmem:[%s4603_s11 + $0x3a8] sm:$0xff]  }
 0x593   :  { %3139 = vmatprep.subr.bf16.mxu0 %v3502_v44  ;;  %v3602_v44 = vld [vmem:[%s4603_s11 + $0x3f0] sm:$0xff]  }
 0x596   :  { %3140 = vmatpush3.bf16.msra.mxu0 %v3503_v45  ;;  %v3603_v45 = vld [vmem:[%s4603_s11 + $0x3b0] sm:$0xff]  }
 0x597   :  { %3141 = vmatprep.subr.bf16.mxu0 %v3506_v46  ;;  %v3604_v46 = vld [vmem:[%s4603_s11 + $0x3f8] sm:$0xff]  }
 0x59a   :  { %3142 = vmatpush3.bf16.msra.mxu0 %v3507_v47  ;;  %v3605_v47 = vld [vmem:[%s4603_s11 + $0x3b8] sm:$0xff]   ;;  %s3801_s11 = smov [#allocation13]  }
 0x59b   :  { %3143 = vmatprep.subr.bf16.mxu0 %v3510_v48  ;;  %v1585_v48 = vcombine.high %v4338_v18, %v4338_v18  ;;  %s2887_s10 = sshll.u32 %s3801_s11, 4  ;;  %s2888_s10 = int_to_ptr.vmem [resolvable:$true] %s2887_s10 }
 0x59c   :  { %s3754_s19 = scalar_lea.vmem %s2888_s10, 32  ;;  %p3759_p7 = scmp.lt.s32.totalorder %s2888_s10, %s2888_s10 }
 0x59d   :  { %p3755_p6 = scmp.ne.s32.totalorder %s2888_s10, %s3754_s19  ;;  %p3760_p8 = scmp.lt.s32.totalorder %s3754_s19, %s3754_s19 }
 0x59e   :  { %3144 = vmatpush3.bf16.msra.mxu0 %v3511_v49 }
 0x59f   :  { %3173 = vmatprep.subr.bf16.mxu0 %v3514_v50  ;;  %p3761_p9 = por %p3760_p8, %p3759_p7 }
 0x5a1   :  { %2445 = vmatmul.mubr.bf16.vlgmr.msra.gmra.mrb[8].mxu0 %v1535_v51  ;;  %p3762_p10 = pnand %p3761_p9, %p3755_p6 }
 0x5a2   :  { %3174 = vmatpush3.bf16.msra.mxu0 %v3515_v52  ;;  %2524 = vmatprep.mubr.bf16.mxu0 %v1538_v55 }
 0x5a3   :  { %3175 = vmatprep.subr.bf16.mxu0 %v3518_v56 }
 0x5a6   :  { %3176 = vmatpush3.bf16.msra.mxu0 %v3519_v57 }
 0x5a7   :  { %3177 = vmatprep.subr.bf16.mxu0 %v3522_v63 }
 0x5aa   :  { %3178 = vmatpush3.bf16.msra.mxu0 %v3523_v20 }
 0x5ab   :  { %3179 = vmatprep.subr.bf16.mxu0 %v3526_v58 }
 0x5ad   :  { %v3167_v49 = vpop.f32.mrb[16].mxu1 }
 0x5ae   :  { %3180 = vmatpush3.bf16.msra.mxu0 %v3527_v2  ;;  %v3168_v50 = vpop.f32.mrb[17].mxu1 }
 0x5af   :  { %3181 = vmatprep.subr.bf16.mxu0 %v3530_v59  ;;  %v3169_v51 = vadd.f32 %v3168_v50, %v3167_v49  ;;  %v3170_v52 = vpop.f32.mrb[18].mxu1  ;;  %v3057_v49 = vld [vmem:[#allocation11] ss:$0 sm:$0xff] }
 0x5b0   :  { %v3171_v55 = vpop.f32.mrb[19].mxu1 }
 0x5b2   :  { %3182 = vmatpush3.bf16.msra.mxu0 %v3531_v60 }
 0x5b3   :  { %3183 = vmatprep.subr.bf16.mxu0 %v3534_v62 }
 0x5b6   :  { %3184 = vmatpush3.bf16.msra.mxu0 %v3535_v0  ;;  %v2921_v0 = vld [vmem:[#allocation7] ss:$0 sm:$0xff] }
 0x5b7   :  { %3185 = vmatprep.subr.bf16.mxu0 %v3539_v3 }
 0x5ba   :  { %3186 = vmatpush3.bf16.msra.mxu0 %v3540_v4 }
 0x5bb   :  { %3187 = vmatprep.subr.bf16.mxu0 %v3543_v5 }
 0x5be   :  { %3188 = vmatpush3.bf16.msra.mxu0 %v3544_v6  ;;  %v3610_v6 = vld [vmem:[#allocation10] sm:$0xff]  }
 0x5bf   :  { %3217 = vmatprep.subr.bf16.mxu0 %v3547_v7 }
 0x5c1   :  { %2525 = vmatmul.mubr.bf16.vlgmr.msra.gmra.mrb[12].mxu0 %v1536_v8  ;;  %v3611_v8 = vld [vmem:[#allocation10 + $0x8] sm:$0xff]  }
 0x5c2   :  { %3218 = vmatpush3.bf16.msra.mxu0 %v3548_v9  ;;  %2604 = vmatprep.mubr.bf16.mxu0 %v1586_v10  ;;  %v3612_v9 = vld [vmem:[#allocation10 + $0x10] sm:$0xff]   ;;  %v3613_v10 = vld [vmem:[#allocation10 + $0x18] sm:$0xff]  }
 0x5c3   :  { %3219 = vmatprep.subr.bf16.mxu0 %v3551_v11  ;;  %v3614_v11 = vld [vmem:[#allocation10 + $0x20] sm:$0xff]  }
 0x5c6   :  { %3220 = vmatpush3.bf16.msra.mxu0 %v3552_v12  ;;  %v3615_v12 = vld [vmem:[#allocation10 + $0x28] sm:$0xff]  }
 0x5c7   :  { %3221 = vmatprep.subr.bf16.mxu0 %v3555_v22 }
 0x5ca   :  { %3222 = vmatpush3.bf16.msra.mxu0 %v3556_v40 }
 0x5cb   :  { %3223 = vmatprep.subr.bf16.mxu0 %v3559_v13 }
 0x5cd   :  { %v3211_v56 = vpop.f32.mrb[20].mxu1 }
 0x5ce   :  { %3224 = vmatpush3.bf16.msra.mxu0 %v3560_v14  ;;  %v3212_v57 = vpop.f32.mrb[21].mxu1 }
 0x5cf   :  { %3225 = vmatprep.subr.bf16.mxu0 %v3563_v16  ;;  %v3213_v63 = vadd.f32 %v3212_v57, %v3211_v56  ;;  %v3214_v20 = vpop.f32.mrb[22].mxu1 }
 0x5d0   :  { %v3215_v58 = vpop.f32.mrb[23].mxu1 }
 0x5d2   :  { %3226 = vmatpush3.bf16.msra.mxu0 %v3564_v17 }
 0x5d3   :  { %3227 = vmatprep.subr.bf16.mxu0 %v3567_v19 }
 0x5d6   :  { %3228 = vmatpush3.bf16.msra.mxu0 %v3568_v21 }
 0x5d7   :  { %3229 = vmatprep.subr.bf16.mxu0 %v3571_v23 }
 0x5da   :  { %3230 = vmatpush3.bf16.msra.mxu0 %v3572_v53 }
 0x5db   :  { %3231 = vmatprep.subr.bf16.mxu0 %v3575_v25 }
 0x5de   :  { %3232 = vmatpush3.bf16.msra.mxu0 %v3576_v26 }
 0x5df   :  { %3261 = vmatprep.subr.bf16.mxu0 %v3579_v27 }
 0x5e1   :  { %2605 = vmatmul.mubr.bf16.vlgmr.msra.gmra.mrb[16].mxu0 %v1584_v54  ;;  %v3616_v54 = vld [vmem:[#allocation10 + $0x30] sm:$0xff]  }
 0x5e2   :  { %3262 = vmatpush3.bf16.msra.mxu0 %v3580_v32  ;;  %2684 = vmatprep.mubr.bf16.mxu0 %v1587_v28  ;;  %v3617_v32 = vld [vmem:[#allocation10 + $0x38] sm:$0xff]  }
 0x5e3   :  { %3263 = vmatprep.subr.bf16.mxu0 %v3583_v29 }
 0x5e6   :  { %3264 = vmatpush3.bf16.msra.mxu0 %v3584_v35 }
 0x5e7   :  { %3265 = vmatprep.subr.bf16.mxu0 %v3587_v42 }
 0x5ea   :  { %3266 = vmatpush3.bf16.msra.mxu0 %v3588_v15 }
 0x5eb   :  { %3267 = vmatprep.subr.bf16.mxu0 %v3591_v30 }
 0x5ed   :  { %v3255_v2 = vpop.f32.mrb[24].mxu1 }
 0x5ee   :  { %3268 = vmatpush3.bf16.msra.mxu0 %v3592_v61  ;;  %v3256_v59 = vpop.f32.mrb[25].mxu1 }
 0x5ef   :  { %3269 = vmatprep.subr.bf16.mxu0 %v3595_v37  ;;  %v3257_v18 = vadd.f32 %v3256_v59, %v3255_v2  ;;  %v3258_v60 = vpop.f32.mrb[26].mxu1 }
 0x5f0   :  { %v3259_v62 = vpop.f32.mrb[27].mxu1 }
 0x5f2   :  { %3270 = vmatpush3.bf16.msra.mxu0 %v3596_v39 }
 0x5f3   :  { %3271 = vmatprep.subr.bf16.mxu0 %v3599_v41  ;;  %v3056_v41 = vld [vmem:[#allocation8] ss:$0 sm:$0xff] }
 0x5f6   :  { %3272 = vmatpush3.bf16.msra.mxu0 %v3601_v43 }
 0x5f7   :  { %3273 = vmatprep.subr.bf16.mxu0 %v3602_v44 }
 0x5fa   :  { %3274 = vmatpush3.bf16.msra.mxu0 %v3603_v45 }
 0x5fb   :  { %3275 = vmatprep.subr.bf16.mxu0 %v3604_v46 }
 0x5fe   :  { %3276 = vmatpush3.bf16.msra.mxu0 %v3605_v47 }
 0x5ff   :  { %3396 = vmatprep.subr.bf16.mxu0 %v3796_v1 }
 0x601   :  { %2685 = vmatmul.mubr.bf16.vlgmr.msra.gmra.mrb[20].mxu0 %v1585_v48 }
 0x602   :  { %3412 = vmatprep.mubr.msk.bf16.mxu0 %vm3797_vm5, %v3796_v1  ;;  %3397 = vmatpush3.bf16.msra.mxu0 %v3610_v6 }
 0x603   :  { %3398 = vmatprep.subr.bf16.mxu0 %v3796_v1 }
 0x606   :  { %3399 = vmatpush3.bf16.msra.mxu0 %v3611_v8 }
 0x607   :  { %3400 = vmatprep.subr.bf16.mxu0 %v3796_v1 }
 0x60a   :  { %3401 = vmatpush3.bf16.msra.mxu0 %v3612_v9 }
 0x60b   :  { %3402 = vmatprep.subr.bf16.mxu0 %v3796_v1 }
 0x60e   :  { %3403 = vmatpush3.bf16.msra.mxu0 %v3613_v10 }
 0x60f   :  { %3404 = vmatprep.subr.bf16.mxu0 %v3796_v1 }
 0x612   :  { %3405 = vmatpush3.bf16.msra.mxu0 %v3614_v11 }
 0x613   :  { %3406 = vmatprep.subr.bf16.mxu0 %v3796_v1 }
 0x616   :  { %3407 = vmatpush3.bf16.msra.mxu0 %v3615_v12 }
 0x617   :  { %3408 = vmatprep.subr.bf16.mxu0 %v3796_v1 }
 0x61a   :  { %3409 = vmatpush3.bf16.msra.mxu0 %v3616_v54 }
 0x61b   :  { %3410 = vmatprep.subr.bf16.mxu0 %v3796_v1 }
 0x61e   :  { %3411 = vmatpush3.bf16.msra.mxu0 %v3617_v32 }
 0x654   :  { %v1217_v3 = vpop.f32.mrb[6].mxu0 }
 0x655   :  { %v1218_v4 = vadd.f32 %v2921_v0, %v1217_v3  ;;  %v3383_v5 = vpop.f32.mrb[7].mxu0 }
 0x657   :  { %v1221_v7 = vpack.c.bf16 %v1218_v4, %v1218_v4 }
 0x659   :  { %3393 = vmatmul.mubr.msk.bf16.vlgmr.msra.gmra.mrb[28].mxu1 %vm462_vm7, %v1221_v7 }
 0x674   :  { %v3145_v22 = vpop.f32.mrb[8].mxu0 }
 0x675   :  { %v3146_v40 = vpop.f32.mrb[9].mxu0 }
 0x676   :  { %v3147_v13 = vadd.f32 %v3146_v40, %v3145_v22  ;;  %v3148_v14 = vpop.f32.mrb[10].mxu0 }
 0x677   :  { %v3149_v16 = vpop.f32.mrb[11].mxu0 }
 0x678   :  { %v2447_v17 = vadd.f32 %v3147_v13, %v4540_v34 }
 0x67a   :  { %v2487_v19 = vadd.f32 %v3169_v51, %v2447_v17 }
 0x694   :  { %v3189_v21 = vpop.f32.mrb[12].mxu0 }
 0x695   :  { %v3190_v23 = vpop.f32.mrb[13].mxu0 }
 0x696   :  { %v3191_v24 = vadd.f32 %v3190_v23, %v3189_v21  ;;  %v3192_v53 = vpop.f32.mrb[14].mxu0 }
 0x697   :  { %v3193_v25 = vpop.f32.mrb[15].mxu0 }
 0x698   :  { %v2527_v26 = vadd.f32 %v3191_v24, %v2487_v19 }
 0x69a   :  { %v2567_v27 = vadd.f32 %v3213_v63, %v2527_v26 }
 0x6b4   :  { %v3233_v28 = vpop.f32.mrb[16].mxu0 }
 0x6b5   :  { %v3234_v29 = vpop.f32.mrb[17].mxu0 }
 0x6b6   :  { %v3235_v35 = vadd.f32 %v3234_v29, %v3233_v28  ;;  %v3236_v42 = vpop.f32.mrb[18].mxu0 }
 0x6b7   :  { %v3237_v15 = vpop.f32.mrb[19].mxu0 }
 0x6b8   :  { %v2607_v30 = vadd.f32 %v3235_v35, %v2567_v27 }
 0x6ba   :  { %v2647_v31 = vadd.f32 %v3257_v18, %v2607_v30 }
 0x6d4   :  { %v3277_v33 = vpop.f32.mrb[20].mxu0 }
 0x6d5   :  { %v3278_v61 = vpop.f32.mrb[21].mxu0 }
 0x6d6   :  { %v3279_v34 = vadd.f32 %v3278_v61, %v3277_v33  ;;  %v3280_v36 = vpop.f32.mrb[22].mxu0 }
 0x6d7   :  { %v3281_v37 = vpop.f32.mrb[23].mxu0 }
 0x6d8   :  { %v2687_v38 = vadd.f32 %v3279_v34, %v2647_v31 }
 0x72c   :  { %v2753_v39 = vpop.f32.mrb[28].mxu1 }
 0x72d   :  { %v2754_v43 = vadd.f32 %v2753_v39, %v2687_v38  ;;  %v3394_v44 = vpop.f32.mrb[29].mxu1 }
 0x72e   :  { %v2756_v1 = vpop.f32.mrb[30].mxu1 }
 0x72f   :  { %v2766_v45 = vadd.f32 %v3056_v41, %v2754_v43  ;;  %v3395_v46 = vpop.f32.mrb[31].mxu1 }
 0x731   :  { %v2767_v47 = vmax.f32 %v2766_v45, 0.0 }
 0x733   :  { %v2768_v48 = vpack.c.bf16 %v2767_v47, %v2767_v47 }
 0x735   :  { %3413 = vmatmul.mubr.bf16.vlgmr.msra.gmra.mrb[24].mxu0 %v2768_v48 }
 0x808   :  { %v2874_v50 = vpop.f32.mrb[24].mxu0 }
 0x809   :  { %v2875_v51 = vadd.f32 %v3057_v49, %v2874_v50  ;;  %v3414_v52 = vpop.f32.mrb[25].mxu0 }
 0x80a   :  { %v2877_v55 = vpop.f32.mrb[26].mxu0 }
 0x80b   :  { %2880 = vst [vmem:[#allocation13] sm:$0x3] %v2875_v51  ;;  %v3415_v56 = vpop.f32.mrb[27].mxu0 }
 0x80c   :  { %3765 = shalt.err (!%p3762_p10)
}
 0x80d   :  { %s4610_s9 = sld [smem:[#allocation19_spill]] }
 0x813   :  { %s3766_s26 = scalar_lea.hbm %s4610_s9, 32 }
 0x814   :  { %p3767_p11 = scmp.ne.s32.totalorder %s4610_s9, %s3766_s26  ;;  %p3770_p12 = scmp.lt.u32.totalorder %s3766_s26, %s4610_s9 }
 0x816   :  { %p3772_p13 = pnand %p3770_p12, %p3767_p11 }
 0x818   :  { %3775 = shalt.err (!%p3772_p13)
}
 0x819   :  { %2890 = dma.vmem_to_hbm [thread:$0]  %s2888_s10, 32, %s4610_s9, [#allocation4]  }
 0x81a   :  { %3784 = dma.done.wait [#allocation4], 32  }
 0x81b   :  { %3785 = vsyncadd [#allocation4], 4294967264 }
 0x81c   :  { %2894 = vsyncpa [#allocation3], 1 }
 0x81d   :  { %2895 = vsyncpa [#allocation6], 1 }
 0x81e   :  { %2896 = vsyncpa [#allocation9], 1 }
 0x81f   :  { %2897 = vsyncpa [#allocation12], 1 }
 0x820   :  { %2898 = vsyncpa [#allocation4], 1 }

// kernel: torch_gcnn_forward.2
= control target key start
LH: loop header
LB: loop body
LE: loop exit
PB: predicated region body
PF: predicated region fallthrough
CT: control target
= control target key end

     0   :  { %vm27_vm0 = vcmask 31744   ;;  %vm29_vm1 = vcmask 25600   ;;  %v3144_v0 = vmov 0.0   ;;  %s3145_s10 = smov 4   ;;  %s3146_s11 = smov 8   ;;  %vm757_vm2 = vcmask 1041408   ;;  %s4246_s0 = inlined_call_operand.vmem [shape: f32[2,8,8,4], index: 0, kind: input, shape index: {}]   ;;  %s4247_s1 = inlined_call_operand.vmem [shape: bf16[36,32], index: 1, kind: input, shape index: {}]   ;;  %s4248_s3 = inlined_call_operand.vmem [shape: bf16[288,32], index: 3, kind: input, shape index: {}]   ;;  %s4249_s2 = inlined_call_operand.vmem [shape: f32[1,32], index: 2, kind: input, shape index: {}]   ;;  %s4250_s5 = inlined_call_operand.vmem [shape: bf16[288,32], index: 5, kind: input, shape index: {}]   ;;  %s4251_s4 = inlined_call_operand.vmem [shape: f32[1,32], index: 4, kind: input, shape index: {}]   ;;  %s4252_s6 = inlined_call_operand.vmem [shape: f32[1,32], index: 6, kind: input, shape index: {}]   ;;  %s4253_s7 = inlined_call_operand.vmem [shape: bf16[128,32], index: 7, kind: output, shape index: {}]  }
   0x1   :  { %28 = vst.msk [vmem:[#allocation2] sm:$0xff] %vm27_vm0, %v3144_v0  ;;  %31 = vst.msk [vmem:[#allocation2 + $0x10] sm:$0xff] %vm27_vm0, %v3144_v0  ;;  %v111_v1 = vld [vmem:[%s4246_s0] sm:$0xff]  ;;  %v112_v2 = vld [vmem:[%s4246_s0 + $0x8] sm:$0xff]  ;;  %s3148_s12 = smov 16   ;;  %s3149_s13 = smov 20  }
   0x2   :  { %30 = vst.msk [vmem:[#allocation2 + $0x8] sm:$0x3] %vm29_vm1, %v3144_v0  ;;  %32 = vst.msk [vmem:[#allocation2 + $0x18] sm:$0x3] %vm29_vm1, %v3144_v0  ;;  %v113_v3 = vld [vmem:[%s4246_s0 + $0x10] sm:$0xff]  ;;  %v114_v4 = vld [vmem:[%s4246_s0 + $0x18] sm:$0xff] }
   0x3   :  { %33 = vst.msk [vmem:[#allocation2 + $0x20] sm:$0xff] %vm27_vm0, %v3144_v0  ;;  %35 = vst.msk [vmem:[#allocation2 + $0x30] sm:$0xff] %vm27_vm0, %v3144_v0  ;;  %v115_v5 = vld [vmem:[%s4246_s0 + $0x20] sm:$0xff]  ;;  %v116_v6 = vld [vmem:[%s4246_s0 + $0x28] sm:$0xff]  ;;  %s3150_s18 = smov 24   ;;  %s3151_s21 = smov 28  }
   0x4   :  { %34 = vst.msk [vmem:[#allocation2 + $0x28] sm:$0x3] %vm29_vm1, %v3144_v0  ;;  %36 = vst.msk [vmem:[#allocation2 + $0x38] sm:$0x3] %vm29_vm1, %v3144_v0  ;;  %v117_v7 = vld [vmem:[%s4246_s0 + $0x30] sm:$0xff]  ;;  %v118_v8 = vld [vmem:[%s4246_s0 + $0x38] sm:$0xff] }
   0x5   :  { %37 = vst.msk [vmem:[#allocation2 + $0x40] sm:$0xff] %vm27_vm0, %v3144_v0  ;;  %39 = vst.msk [vmem:[#allocation2 + $0x50] sm:$0xff] %vm27_vm0, %v3144_v0  ;;  %v119_v9 = vld [vmem:[%s4246_s0 + $0x40] sm:$0xff]  ;;  %v120_v10 = vld [vmem:[%s4246_s0 + $0x48] sm:$0xff]  ;;  %s3152_s22 = smov 32   ;;  %vm232_vm3 = vcmask 64544  }
   0x6   :  { %38 = vst.msk [vmem:[#allocation2 + $0x48] sm:$0x3] %vm29_vm1, %v3144_v0  ;;  %40 = vst.msk [vmem:[#allocation2 + $0x58] sm:$0x3] %vm29_vm1, %v3144_v0  ;;  %v121_v11 = vld [vmem:[%s4246_s0 + $0x50] sm:$0xff]  ;;  %v122_v12 = vld [vmem:[%s4246_s0 + $0x58] sm:$0xff] }
   0x7   :  { %41 = vst.msk [vmem:[#allocation2 + $0x60] sm:$0xff] %vm27_vm0, %v3144_v0  ;;  %43 = vst.msk [vmem:[#allocation2 + $0x70] sm:$0xff] %vm27_vm0, %v3144_v0  ;;  %v123_v13 = vld [vmem:[%s4246_s0 + $0x60] sm:$0xff]  ;;  %v124_v14 = vld [vmem:[%s4246_s0 + $0x68] sm:$0xff]  ;;  %vm297_vm4 = vcmask 97344   ;;  %vm362_vm5 = vcmask 130144  }
   0x8   :  { %42 = vst.msk [vmem:[#allocation2 + $0x68] sm:$0x3] %vm29_vm1, %v3144_v0  ;;  %44 = vst.msk [vmem:[#allocation2 + $0x78] sm:$0x3] %vm29_vm1, %v3144_v0  ;;  %v125_v15 = vld [vmem:[%s4246_s0 + $0x70] sm:$0xff]  ;;  %v126_v16 = vld [vmem:[%s4246_s0 + $0x78] sm:$0xff] }
   0x9   :  { %45 = vst.msk [vmem:[#allocation2 + $0x80] sm:$0xff] %vm27_vm0, %v3144_v0  ;;  %47 = vst.msk [vmem:[#allocation2 + $0x90] sm:$0xff] %vm27_vm0, %v3144_v0  ;;  %v176_v17 = vld [vmem:[#allocation2 + $0x1] sm:$0xff]  ;;  %s3147_s0 = smov 12   ;;  %vm69_vm6 = vcmask 261120   ;;  %vm71_vm7 = vcmask 254976  }
   0xa   :  { %46 = vst.msk [vmem:[#allocation2 + $0x88] sm:$0x3] %vm29_vm1, %v3144_v0  ;;  %48 = vst.msk [vmem:[#allocation2 + $0x98] sm:$0x3] %vm29_vm1, %v3144_v0  ;;  %v241_v18 = vld [vmem:[#allocation2 + $0x2] sm:$0xff]  ;;  %vm427_vm8 = vcmask 162944  }
   0xb   :  { %49 = vst.msk [vmem:[#allocation2 + $0xa0] sm:$0xff] %vm27_vm0, %v3144_v0  ;;  %51 = vst.msk [vmem:[#allocation2 + $0xb0] sm:$0xff] %vm27_vm0, %v3144_v0  ;;  %v144_v56 = vld [vmem:[#allocation2] sm:$0xff]  ;;  %v3106_v61 = vld [vmem:[%s4247_s1 + $0x8] sm:$0xff]   ;;  %vm492_vm9 = vcmask 195744   ;;  %vm558_vm10 = vcmask 228544  }
   0xc   :  { %50 = vst.msk [vmem:[#allocation2 + $0xa8] sm:$0x3] %vm29_vm1, %v3144_v0  ;;  %52 = vst.msk [vmem:[#allocation2 + $0xb8] sm:$0x3] %vm29_vm1, %v3144_v0  ;;  %v3105_v60 = vld [vmem:[%s4247_s1] sm:$0xff]   ;;  %vm623_vm11 = vcmask 261344  }
   0xd   :  { %53 = vst.msk [vmem:[#allocation2 + $0xc0] sm:$0xff] %vm27_vm0, %v3144_v0  ;;  %55 = vst.msk [vmem:[#allocation2 + $0xd0] sm:$0xff] %vm27_vm0, %v3144_v0  ;;  %3031 = vmatprep.subr.bf16.mxu0 %v3105_v60  ;;  %v3107_v63 = vld [vmem:[%s4247_s1 + $0x10] ss:$0 sps:$4 sm:$0x33]   ;;  %vm688_vm12 = vcmask 294144  }
   0xe   :  { %54 = vst.msk [vmem:[#allocation2 + $0xc8] sm:$0x3] %vm29_vm1, %v3144_v0  ;;  %56 = vst.msk [vmem:[#allocation2 + $0xd8] sm:$0x3] %vm29_vm1, %v3144_v0  ;;  %3032 = vmatpush3.bf16.msra.mxu0 %v3105_v60  ;;  %vm732_vm13 = vcmask 293888   ;;  %s3153_s8 = smov 64  }
   0xf   :  { %57 = vst.msk [vmem:[#allocation2 + $0xe0] sm:$0xff] %vm27_vm0, %v3144_v0  ;;  %59 = vst.msk [vmem:[#allocation2 + $0xf0] sm:$0xff] %vm27_vm0, %v3144_v0  ;;  %3033 = vmatprep.subr.bf16.mxu0 %v3106_v61  ;;  %vm979_vm14 = vcmask 523520   ;;  %vm1044_vm15 = vcmask 785920  }
  0x10   :  { %58 = vst.msk [vmem:[#allocation2 + $0xe8] sm:$0x3] %vm29_vm1, %v3144_v0  ;;  %60 = vst.msk [vmem:[#allocation2 + $0xf8] sm:$0x3] %vm29_vm1, %v3144_v0 }
  0x11   :  { %61 = vst.msk [vmem:[#allocation2 + $0x100] sm:$0xff] %vm27_vm0, %v3144_v0  ;;  %63 = vst.msk [vmem:[#allocation2 + $0x110] sm:$0xff] %vm27_vm0, %v3144_v0 }
  0x12   :  { %62 = vst.msk [vmem:[#allocation2 + $0x108] sm:$0x3] %vm29_vm1, %v3144_v0  ;;  %64 = vst.msk [vmem:[#allocation2 + $0x118] sm:$0x3] %vm29_vm1, %v3144_v0  ;;  %3034 = vmatpush3.bf16.msra.mxu0 %v3106_v61 }
  0x13   :  { %65 = vst.msk [vmem:[#allocation2 + $0x120] sm:$0xff] %vm27_vm0, %v3144_v0  ;;  %67 = vst.msk [vmem:[#allocation2 + $0x130] sm:$0xff] %vm27_vm0, %v3144_v0  ;;  %3093 = vmatprep.subr.msk.bf16.mxu0 %vm757_vm2, %v3107_v63 }
  0x14   :  { %66 = vst.msk [vmem:[#allocation2 + $0x128] sm:$0x3] %vm29_vm1, %v3144_v0  ;;  %68 = vst.msk [vmem:[#allocation2 + $0x138] sm:$0x3] %vm29_vm1, %v3144_v0  ;;  %vm2753_vm1 = vcmask 257024  }
  0x15   :  { %128 = vst.msk [vmem:[#allocation2 + $0x11] sm:$0xff] %vm27_vm0, %v111_v1  ;;  %129 = vst.msk [vmem:[#allocation2 + $0x21] sm:$0xff] %vm27_vm0, %v112_v2 }
  0x16   :  { %130 = vst.msk [vmem:[#allocation2 + $0x31] sm:$0xff] %vm27_vm0, %v113_v3  ;;  %131 = vst.msk [vmem:[#allocation2 + $0x41] sm:$0xff] %vm27_vm0, %v114_v4  ;;  %v759_v3 = vsel %vm757_vm2, %v3107_v63, 0 }
  0x17   :  { %132 = vst.msk [vmem:[#allocation2 + $0x51] sm:$0xff] %vm27_vm0, %v115_v5  ;;  %133 = vst.msk [vmem:[#allocation2 + $0x61] sm:$0xff] %vm27_vm0, %v116_v6  ;;  %3036 = vmatpush3.bf16.msra.mxu0 %v759_v3 }
  0x18   :  { %134 = vst.msk [vmem:[#allocation2 + $0x71] sm:$0xff] %vm27_vm0, %v117_v7  ;;  %135 = vst.msk [vmem:[#allocation2 + $0x81] sm:$0xff] %vm27_vm0, %v118_v8 }
  0x19   :  { %136 = vst.msk [vmem:[#allocation2 + $0xb1] sm:$0xff] %vm27_vm0, %v119_v9  ;;  %137 = vst.msk [vmem:[#allocation2 + $0xc1] sm:$0xff] %vm27_vm0, %v120_v10 }
  0x1a   :  { %138 = vst.msk [vmem:[#allocation2 + $0xd1] sm:$0xff] %vm27_vm0, %v121_v11  ;;  %139 = vst.msk [vmem:[#allocation2 + $0xe1] sm:$0xff] %vm27_vm0, %v122_v12 }
  0x1b   :  { %140 = vst.msk [vmem:[#allocation2 + $0xf1] sm:$0xff] %vm27_vm0, %v123_v13  ;;  %141 = vst.msk [vmem:[#allocation2 + $0x101] sm:$0xff] %vm27_vm0, %v124_v14 }
  0x1c   :  { %142 = vst.msk [vmem:[#allocation2 + $0x111] sm:$0xff] %vm27_vm0, %v125_v15  ;;  %143 = vst.msk [vmem:[#allocation2 + $0x121] sm:$0xff] %vm27_vm0, %v126_v16  ;;  %v177_v19 = vld [vmem:[#allocation2 + $0x11] sm:$0xff]  ;;  %v178_v21 = vld [vmem:[#allocation2 + $0x21] sm:$0xff] }
  0x1d   :  { %v242_v20 = vld [vmem:[#allocation2 + $0x12] sm:$0xff]  ;;  %v192_v22 = vpack.c.bf16 %v177_v19, %v176_v17  ;;  %v243_v25 = vld [vmem:[#allocation2 + $0x22] sm:$0xff]  ;;  %v387_v42 = vpack.c.bf16 %v178_v21, %v177_v19  ;;  %77 = vst.msk [vmem:[#allocation3 + $0x30] sm:$0xff] %vm69_vm6, %v3144_v0  ;;  %70 = vst.msk [vmem:[#allocation3] sm:$0xff] %vm69_vm6, %v3144_v0 }
  0x1e   :  { %v257_v23 = vpack.c.bf16 %v242_v20, %v241_v18  ;;  %v179_v24 = vld [vmem:[#allocation2 + $0x31] sm:$0xff]  ;;  %v307_v27 = vld [vmem:[#allocation2 + $0x20] sm:$0xff]  ;;  %v452_v51 = vpack.c.bf16 %v243_v25, %v242_v20  ;;  %78 = vst.msk [vmem:[#allocation3 + $0x38] sm:$0x3] %vm71_vm7, %v3144_v0  ;;  %72 = vst.msk [vmem:[#allocation3 + $0x8] sm:$0x3] %vm71_vm7, %v3144_v0 }
  0x1f   :  { %v244_v26 = vld [vmem:[#allocation2 + $0x32] sm:$0xff]  ;;  %208 = vrot.lane.b32.xlu0 %v192_v22, %s3145_s10  ;;  %v3341_v29 = vpack.c.bf16 %v179_v24, %v178_v21  ;;  %v309_v33 = vld [vmem:[#allocation2 + $0x40] sm:$0xff]  ;;  %73 = vst.msk [vmem:[#allocation3 + $0x10] sm:$0xff] %vm69_vm6, %v3144_v0  ;;  %75 = vst.msk [vmem:[#allocation3 + $0x20] sm:$0xff] %vm69_vm6, %v3144_v0 }
  0x20   :  { %v308_v28 = vld [vmem:[#allocation2 + $0x30] sm:$0xff]  ;;  %273 = vrot.lane.b32.xlu1 %v257_v23, %s3146_s11  ;;  %v3343_v30 = vpack.c.bf16 %v244_v26, %v243_v25  ;;  %v3349_v36 = vld [vmem:[#allocation2 + $0x60] sm:$0xff]  ;;  %74 = vst.msk [vmem:[#allocation3 + $0x18] sm:$0x3] %vm71_vm7, %v3144_v0  ;;  %76 = vst.msk [vmem:[#allocation3 + $0x28] sm:$0x3] %vm71_vm7, %v3144_v0 }
  0x21   :  { %v518_v31 = vpack.c.bf16 %v308_v28, %v307_v27  ;;  %v306_v32 = vld [vmem:[#allocation2 + $0x10] sm:$0xff]  ;;  %v323_v39 = vpack.c.bf16 %v309_v33, %v308_v28  ;;  %v374_v41 = vld [vmem:[#allocation2 + $0x41] sm:$0xff]  ;;  %79 = vst.msk [vmem:[#allocation3 + $0x40] sm:$0xff] %vm69_vm6, %v3144_v0  ;;  %81 = vst.msk [vmem:[#allocation3 + $0x50] sm:$0xff] %vm69_vm6, %v3144_v0 }
  0x22   :  { %v3345_v34 = vld [vmem:[#allocation2 + $0x50] sm:$0xff]  ;;  %v322_v38 = vpack.c.bf16 %v307_v27, %v306_v32  ;;  %v388_v43 = vpack.c.bf16 %v374_v41, %v179_v24  ;;  %v439_v44 = vld [vmem:[#allocation2 + $0x42] sm:$0xff]  ;;  %v160_v58 = vpack.c.bf16 %v306_v32, %v144_v56  ;;  %80 = vst.msk [vmem:[#allocation3 + $0x48] sm:$0x3] %vm71_vm7, %v3144_v0  ;;  %82 = vst.msk [vmem:[#allocation3 + $0x58] sm:$0x3] %vm71_vm7, %v3144_v0 }
  0x23   :  { %v519_v35 = vpack.c.bf16 %v3345_v34, %v309_v33  ;;  %169 = vst.msk [vmem:[#allocation4 + $0x8] sm:$0xff] %vm27_vm0, %v518_v31  ;;  %v3351_v37 = vld [vmem:[#allocation2 + $0x70] sm:$0xff]  ;;  %210 = vrot.lane.b32.xlu0 %v3341_v29, %s3145_s10  ;;  %v3366_v45 = vld [vmem:[#allocation2 + $0xc0] sm:$0xff]  ;;  %v453_v52 = vpack.c.bf16 %v439_v44, %v244_v26  ;;  %v324_v11 = vpack.c.bf16 %v3349_v36, %v3345_v34 }
  0x24   :  { %275 = vrot.lane.b32.xlu1 %v3343_v30, %s3146_s11  ;;  %v3359_v40 = vpack.c.bf16 %v3351_v37, %v3349_v36  ;;  %v3368_v46 = vld [vmem:[#allocation2 + $0xd0] sm:$0xff]  ;;  %v3370_v47 = vld [vmem:[#allocation2 + $0xe0] sm:$0xff]  ;;  %168 = vst.msk [vmem:[#allocation4] sm:$0xff] %vm27_vm0, %v160_v58 }
  0x25   :  { %170 = vst.msk [vmem:[#allocation4 + $0x10] sm:$0xff] %vm27_vm0, %v519_v35  ;;  %v3374_v48 = vpack.c.bf16 %v3368_v46, %v3366_v45  ;;  %v3376_v49 = vld [vmem:[#allocation2 + $0xf0] sm:$0xff]  ;;  %v3384_v53 = vld [vmem:[#allocation2 + $0x100] sm:$0xff] }
  0x26   :  { %171 = vst.msk [vmem:[#allocation4 + $0x18] sm:$0xff] %vm27_vm0, %v3359_v40  ;;  %v3380_v50 = vpack.c.bf16 %v3376_v49, %v3370_v47  ;;  %v328_v54 = vpack.c.bf16 %v3384_v53, %v3376_v49  ;;  %v3390_v55 = vld [vmem:[#allocation2 + $0x110] sm:$0xff]  ;;  %v182_v4 = vld [vmem:[#allocation2 + $0x61] sm:$0xff] }
  0x27   :  { %338 = vrot.lane.b32.xlu0 %v322_v38, %s3147_s0  ;;  %173 = vst.msk [vmem:[#allocation4 + $0x28] sm:$0xff] %vm27_vm0, %v3374_v48  ;;  %v3396_v57 = vpack.c.bf16 %v3390_v55, %v3384_v53  ;;  %v570_v59 = vld [vmem:[#allocation2 + $0x51] sm:$0xff]  ;;  %v247_v7 = vld [vmem:[#allocation2 + $0x62] sm:$0xff] }
  0x28   :  { %340 = vrot.lane.b32.xlu1 %v323_v39, %s3147_s0  ;;  %174 = vst.msk [vmem:[#allocation4 + $0x30] sm:$0xff] %vm27_vm0, %v3380_v50  ;;  %v584_v62 = vpack.c.bf16 %v570_v59, %v374_v41  ;;  %v635_v1 = vld [vmem:[#allocation2 + $0x52] sm:$0xff]  ;;  %v313_v10 = vld [vmem:[#allocation2 + $0x80] sm:$0xff]  ;;  %v389_v14 = vpack.c.bf16 %v182_v4, %v570_v59  ;;  %v327_v41 = vpack.c.bf16 %v3370_v47, %v3368_v46 }
  0x29   :  { %175 = vst.msk [vmem:[#allocation4 + $0x38] sm:$0xff] %vm27_vm0, %v3396_v57  ;;  %v649_v2 = vpack.c.bf16 %v635_v1, %v439_v44  ;;  %v183_v5 = vld [vmem:[#allocation2 + $0x71] sm:$0xff]  ;;  %v325_v12 = vpack.c.bf16 %v313_v10, %v3351_v37  ;;  %v378_v13 = vld [vmem:[#allocation2 + $0x81] sm:$0xff]  ;;  %v454_v17 = vpack.c.bf16 %v247_v7, %v635_v1 }
  0x2a   :  { %v195_v6 = vpack.c.bf16 %v183_v5, %v182_v4  ;;  %v248_v8 = vld [vmem:[#allocation2 + $0x72] sm:$0xff]  ;;  %v390_v15 = vpack.c.bf16 %v378_v13, %v183_v5  ;;  %v443_v16 = vld [vmem:[#allocation2 + $0x82] sm:$0xff]  ;;  %83 = vst.msk [vmem:[#allocation3 + $0x60] sm:$0xff] %vm69_vm6, %v3144_v0  ;;  %85 = vst.msk [vmem:[#allocation3 + $0x70] sm:$0xff] %vm69_vm6, %v3144_v0 }
  0x2b   :  { %403 = vrot.lane.b32.xlu0 %v387_v42, %s3148_s12  ;;  %v260_v9 = vpack.c.bf16 %v248_v8, %v247_v7  ;;  %v455_v18 = vpack.c.bf16 %v443_v16, %v248_v8  ;;  %v509_v19 = vld [vmem:[#allocation2 + $0x90] sm:$0xff]  ;;  %v152_v21 = vld [vmem:[#allocation2 + $0xa0] sm:$0xff]  ;;  %84 = vst.msk [vmem:[#allocation3 + $0x68] sm:$0x3] %vm71_vm7, %v3144_v0  ;;  %86 = vst.msk [vmem:[#allocation3 + $0x78] sm:$0x3] %vm71_vm7, %v3144_v0 }
  0x2c   :  { %405 = vrot.lane.b32.xlu1 %v388_v43, %s3148_s12  ;;  %v314_v20 = vld [vmem:[#allocation2 + $0xb0] sm:$0xff]  ;;  %v521_v22 = vpack.c.bf16 %v509_v19, %v313_v10  ;;  %v184_v28 = vld [vmem:[#allocation2 + $0xa1] sm:$0xff]  ;;  %87 = vst.msk [vmem:[#allocation3 + $0x80] sm:$0xff] %vm69_vm6, %v3144_v0  ;;  %89 = vst.msk [vmem:[#allocation3 + $0x90] sm:$0xff] %vm69_vm6, %v3144_v0 }
  0x2d   :  { %v164_v23 = vpack.c.bf16 %v314_v20, %v152_v21  ;;  %v574_v24 = vld [vmem:[#allocation2 + $0x91] sm:$0xff]  ;;  %v249_v34 = vld [vmem:[#allocation2 + $0xa2] sm:$0xff]  ;;  %88 = vst.msk [vmem:[#allocation3 + $0x88] sm:$0x3] %vm71_vm7, %v3144_v0  ;;  %90 = vst.msk [vmem:[#allocation3 + $0x98] sm:$0x3] %vm71_vm7, %v3144_v0 }
  0x2e   :  { %v586_v25 = vpack.c.bf16 %v574_v24, %v378_v13  ;;  %v639_v26 = vld [vmem:[#allocation2 + $0x92] sm:$0xff]  ;;  %v251_v36 = vld [vmem:[#allocation2 + $0xc2] sm:$0xff]  ;;  %91 = vst.msk [vmem:[#allocation3 + $0xa0] sm:$0xff] %vm69_vm6, %v3144_v0  ;;  %93 = vst.msk [vmem:[#allocation3 + $0xb0] sm:$0xff] %vm69_vm6, %v3144_v0 }
  0x2f   :  { %468 = vrot.lane.b32.xlu0 %v452_v51, %s3149_s13  ;;  %172 = vst.msk [vmem:[#allocation4 + $0x20] sm:$0xff] %vm27_vm0, %v164_v23  ;;  %v651_v27 = vpack.c.bf16 %v639_v26, %v443_v16  ;;  %v252_v37 = vld [vmem:[#allocation2 + $0xd2] sm:$0xff]  ;;  %v382_v42 = vld [vmem:[#allocation2 + $0xe1] sm:$0xff]  ;;  %vm1109_vm0 = vcmask 1048320  }
  0x30   :  { %470 = vrot.lane.b32.xlu1 %v453_v52, %s3149_s13  ;;  %v262_v39 = vpack.c.bf16 %v252_v37, %v251_v36  ;;  %v447_v51 = vld [vmem:[#allocation2 + $0xe2] sm:$0xff]  ;;  %v643_v47 = vld [vmem:[#allocation2 + $0xf2] sm:$0xff]  ;;  %92 = vst.msk [vmem:[#allocation3 + $0xa8] sm:$0x3] %vm71_vm7, %v3144_v0  ;;  %94 = vst.msk [vmem:[#allocation3 + $0xb8] sm:$0x3] %vm71_vm7, %v3144_v0 }
  0x31   :  { %v457_v56 = vpack.c.bf16 %v447_v51, %v252_v37  ;;  %v653_v58 = vpack.c.bf16 %v643_v47, %v447_v51  ;;  %v190_v59 = vld [vmem:[#allocation2 + $0x101] sm:$0xff]  ;;  %v191_v60 = vld [vmem:[#allocation2 + $0x111] sm:$0xff]  ;;  %95 = vst.msk [vmem:[#allocation3 + $0xc0] sm:$0xff] %vm69_vm6, %v3144_v0  ;;  %97 = vst.msk [vmem:[#allocation3 + $0xd0] sm:$0xff] %vm69_vm6, %v3144_v0 }
  0x32   :  { %v199_v61 = vpack.c.bf16 %v191_v60, %v190_v59  ;;  %v256_v63 = vld [vmem:[#allocation2 + $0x112] sm:$0xff]  ;;  %v3475_v5 = vld [vmem:[#allocation2 + $0x122] sm:$0xff]  ;;  %96 = vst.msk [vmem:[#allocation3 + $0xc8] sm:$0x3] %vm71_vm7, %v3144_v0  ;;  %98 = vst.msk [vmem:[#allocation3 + $0xd8] sm:$0x3] %vm71_vm7, %v3144_v0 }
  0x33   :  { %534 = vrot.lane.b32.xlu0 %v518_v31, %s3150_s18  ;;  %v187_v31 = vld [vmem:[#allocation2 + $0xd1] sm:$0xff]  ;;  %v459_v7 = vpack.c.bf16 %v3475_v5, %v256_v63  ;;  %99 = vst.msk [vmem:[#allocation3 + $0xe0] sm:$0xff] %vm69_vm6, %v3144_v0  ;;  %101 = vst.msk [vmem:[#allocation3 + $0xf0] sm:$0xff] %vm69_vm6, %v3144_v0 }
  0x34   :  { %536 = vrot.lane.b32.xlu1 %v519_v35, %s3150_s18  ;;  %v250_v35 = vld [vmem:[#allocation2 + $0xb2] sm:$0xff]  ;;  %v392_v44 = vpack.c.bf16 %v382_v42, %v187_v31  ;;  %100 = vst.msk [vmem:[#allocation3 + $0xe8] sm:$0x3] %vm71_vm7, %v3144_v0  ;;  %102 = vst.msk [vmem:[#allocation3 + $0xf8] sm:$0x3] %vm71_vm7, %v3144_v0 }
  0x35   :  { %v261_v38 = vpack.c.bf16 %v250_v35, %v249_v34  ;;  %v456_v52 = vpack.c.bf16 %v251_v36, %v250_v35  ;;  %v582_v53 = vld [vmem:[#allocation2 + $0x131] sm:$0xff]  ;;  %103 = vst.msk [vmem:[#allocation3 + $0x100] sm:$0xff] %vm69_vm6, %v3144_v0  ;;  %105 = vst.msk [vmem:[#allocation3 + $0x110] sm:$0xff] %vm69_vm6, %v3144_v0 }
  0x36   :  { %v647_v10 = vld [vmem:[#allocation2 + $0x132] sm:$0xff]  ;;  %104 = vst.msk [vmem:[#allocation3 + $0x108] sm:$0x3] %vm71_vm7, %v3144_v0  ;;  %106 = vst.msk [vmem:[#allocation3 + $0x118] sm:$0x3] %vm71_vm7, %v3144_v0 }
  0x37   :  { %599 = vrot.lane.b32.xlu0 %v3341_v29, %s3151_s21  ;;  %v185_v29 = vld [vmem:[#allocation2 + $0xb1] sm:$0xff]  ;;  %v655_v13 = vpack.c.bf16 %v647_v10, %v3475_v5  ;;  %107 = vst.msk [vmem:[#allocation3 + $0x120] sm:$0xff] %vm69_vm6, %v3144_v0  ;;  %109 = vst.msk [vmem:[#allocation3 + $0x130] sm:$0xff] %vm69_vm6, %v3144_v0 }
  0x38   :  { %601 = vrot.lane.b32.xlu1 %v584_v62, %s3151_s21  ;;  %v196_v32 = vpack.c.bf16 %v185_v29, %v184_v28  ;;  %108 = vst.msk [vmem:[#allocation3 + $0x128] sm:$0x3] %vm71_vm7, %v3144_v0  ;;  %110 = vst.msk [vmem:[#allocation3 + $0x138] sm:$0x3] %vm71_vm7, %v3144_v0 }
  0x3b   :  { %664 = vrot.lane.b32.xlu0 %v3343_v30, %s3152_s22  ;;  %v186_v30 = vld [vmem:[#allocation2 + $0xc1] sm:$0xff] }
  0x3c   :  { %666 = vrot.lane.b32.xlu1 %v649_v2, %s3152_s22  ;;  %v197_v33 = vpack.c.bf16 %v187_v31, %v186_v30  ;;  %v391_v43 = vpack.c.bf16 %v186_v30, %v185_v29 }
  0x3f   :  { %212 = vrot.lane.b32.xlu0 %v584_v62, %s3145_s10  ;;  %v255_v62 = vld [vmem:[#allocation2 + $0x102] sm:$0xff] }
  0x40   :  { %214 = vrot.lane.b32.xlu1 %v195_v6, %s3145_s10 }
  0x43   :  { %277 = vrot.lane.b32.xlu0 %v649_v2, %s3146_s11  ;;  %v386_v2 = vld [vmem:[#allocation2 + $0x121] sm:$0xff] }
  0x44   :  { %279 = vrot.lane.b32.xlu1 %v260_v9, %s3146_s11  ;;  %v394_v4 = vpack.c.bf16 %v386_v2, %v191_v60 }
  0x47   :  { %342 = vrot.lane.b32.xlu0 %v324_v11, %s3147_s0 }
  0x48   :  { %344 = vrot.lane.b32.xlu1 %v325_v12, %s3147_s0 }
  0x4b   :  { %407 = vrot.lane.b32.xlu0 %v389_v14, %s3148_s12 }
  0x4c   :  { %409 = vrot.lane.b32.xlu1 %v390_v15, %s3148_s12 }
  0x4f   :  { %472 = vrot.lane.b32.xlu0 %v454_v17, %s3149_s13 }
  0x50   :  { %474 = vrot.lane.b32.xlu1 %v455_v18, %s3149_s13 }
  0x53   :  { %538 = vrot.lane.b32.xlu0 %v3359_v40, %s3150_s18  ;;  %v326_v40 = vpack.c.bf16 %v3366_v45, %v314_v20  ;;  %v578_v45 = vld [vmem:[#allocation2 + $0xf1] sm:$0xff] }
  0x54   :  { %540 = vrot.lane.b32.xlu1 %v521_v22, %s3150_s18  ;;  %v588_v46 = vpack.c.bf16 %v578_v45, %v382_v42  ;;  %v393_v3 = vpack.c.bf16 %v190_v59, %v578_v45 }
  0x57   :  { %603 = vrot.lane.b32.xlu0 %v195_v6, %s3151_s21  ;;  %v458_v6 = vpack.c.bf16 %v255_v62, %v643_v47 }
  0x58   :  { %605 = vrot.lane.b32.xlu1 %v586_v25, %s3151_s21 }
  0x5b   :  { %668 = vrot.lane.b32.xlu0 %v260_v9, %s3152_s22  ;;  %v590_v9 = vpack.c.bf16 %v582_v53, %v386_v2 }
  0x5c   :  { %670 = vrot.lane.b32.xlu1 %v651_v27, %s3152_s22 }
  0x5f   :  { %216 = vrot.lane.b32.xlu0 %v196_v32, %s3145_s10 }
  0x60   :  { %218 = vrot.lane.b32.xlu1 %v197_v33, %s3145_s10 }
  0x63   :  { %281 = vrot.lane.b32.xlu0 %v261_v38, %s3146_s11 }
  0x64   :  { %283 = vrot.lane.b32.xlu1 %v262_v39, %s3146_s11 }
  0x67   :  { %346 = vrot.lane.b32.xlu0 %v326_v40, %s3147_s0 }
  0x68   :  { %348 = vrot.lane.b32.xlu1 %v327_v41, %s3147_s0 }
  0x6b   :  { %411 = vrot.lane.b32.xlu0 %v391_v43, %s3148_s12 }
  0x6c   :  { %413 = vrot.lane.b32.xlu1 %v392_v44, %s3148_s12 }
  0x6f   :  { %476 = vrot.lane.b32.xlu0 %v456_v52, %s3149_s13 }
  0x70   :  { %478 = vrot.lane.b32.xlu1 %v457_v56, %s3149_s13 }
  0x73   :  { %542 = vrot.lane.b32.xlu0 %v3374_v48, %s3150_s18  ;;  %v3464_v48 = vpack.c.bf16 %v256_v63, %v255_v62 }
  0x74   :  { %544 = vrot.lane.b32.xlu1 %v3380_v50, %s3150_s18  ;;  %v321_v50 = vld [vmem:[#allocation2 + $0x120] sm:$0xff] }
  0x75   :  { %v329_v1 = vpack.c.bf16 %v321_v50, %v3390_v55  ;;  %v517_v55 = vld [vmem:[#allocation2 + $0x130] sm:$0xff] }
  0x76   :  { %v525_v49 = vpack.c.bf16 %v517_v55, %v321_v50 }
  0x77   :  { %607 = vrot.lane.b32.xlu0 %v197_v33, %s3151_s21 }
  0x78   :  { %609 = vrot.lane.b32.xlu1 %v588_v46, %s3151_s21 }
  0x7b   :  { %672 = vrot.lane.b32.xlu0 %v262_v39, %s3152_s22 }
  0x7c   :  { %674 = vrot.lane.b32.xlu1 %v653_v58, %s3152_s22 }
  0x7f   :  { %220 = vrot.lane.b32.xlu0 %v588_v46, %s3145_s10 }
  0x80   :  { %222 = vrot.lane.b32.xlu1 %v199_v61, %s3145_s10 }
  0x83   :  { %285 = vrot.lane.b32.xlu0 %v653_v58, %s3146_s11 }
  0x84   :  { %287 = vrot.lane.b32.xlu1 %v3464_v48, %s3146_s11 }
  0x87   :  { %350 = vrot.lane.b32.xlu0 %v328_v54, %s3147_s0 }
  0x88   :  { %352 = vrot.lane.b32.xlu1 %v329_v1, %s3147_s0 }
  0x8b   :  { %415 = vrot.lane.b32.xlu0 %v393_v3, %s3148_s12 }
  0x8c   :  { %417 = vrot.lane.b32.xlu1 %v394_v4, %s3148_s12  ;;  %s3154_s12 = smov 96  }
  0x8f   :  { %480 = vrot.lane.b32.xlu0 %v458_v6, %s3149_s13 }
  0x90   :  { %482 = vrot.lane.b32.xlu1 %v459_v7, %s3149_s13 }
  0x91   :  { %v209_v54 = vpop.permute.xlu0 %208 }
  0x92   :  { %v274_v8 = vpop.permute.xlu1 %273  ;;  %233 = vst.msk [vmem:[#allocation4] sm:$0xff] %vm232_vm3, %v209_v54 }
  0x93   :  { %298 = vst.msk [vmem:[#allocation4] sm:$0xff] %vm297_vm4, %v274_v8  ;;  %546 = vrot.lane.b32.xlu0 %v3396_v57, %s3150_s18 }
  0x94   :  { %548 = vrot.lane.b32.xlu1 %v525_v49, %s3150_s18 }
  0x95   :  { %v211_v11 = vpop.permute.xlu0 %210 }
  0x96   :  { %v276_v12 = vpop.permute.xlu1 %275  ;;  %234 = vst.msk [vmem:[#allocation4 + $0x8] sm:$0xff] %vm232_vm3, %v211_v11 }
  0x97   :  { %299 = vst.msk [vmem:[#allocation4 + $0x8] sm:$0xff] %vm297_vm4, %v276_v12  ;;  %611 = vrot.lane.b32.xlu0 %v199_v61, %s3151_s21 }
  0x98   :  { %613 = vrot.lane.b32.xlu1 %v590_v9, %s3151_s21 }
  0x99   :  { %v339_v57 = vpop.permute.xlu0 %338 }
  0x9a   :  { %v341_v14 = vpop.permute.xlu1 %340  ;;  %363 = vst.msk [vmem:[#allocation4] sm:$0xff] %vm362_vm5, %v339_v57 }
  0x9b   :  { %364 = vst.msk [vmem:[#allocation4 + $0x8] sm:$0xff] %vm362_vm5, %v341_v14  ;;  %676 = vrot.lane.b32.xlu0 %v3464_v48, %s3152_s22 }
  0x9c   :  { %678 = vrot.lane.b32.xlu1 %v655_v13, %s3152_s22 }
  0x9d   :  { %v404_v15 = vpop.permute.xlu0 %403 }
  0x9e   :  { %v406_v16 = vpop.permute.xlu1 %405  ;;  %428 = vst.msk [vmem:[#allocation4] sm:$0xff] %vm427_vm8, %v404_v15 }
  0x9f   :  { %429 = vst.msk [vmem:[#allocation4 + $0x8] sm:$0xff] %vm427_vm8, %v406_v16 }
  0xa1   :  { %v469_v0 = vpop.permute.xlu0 %468 }
  0xa2   :  { %v471_v17 = vpop.permute.xlu1 %470  ;;  %493 = vst.msk [vmem:[#allocation4] sm:$0xff] %vm492_vm9, %v469_v0  ;;  %v3108_v0 = vld [vmem:[%s4248_s3 + $0x80] sm:$0xff]  }
  0xa3   :  { %494 = vst.msk [vmem:[#allocation4 + $0x8] sm:$0xff] %vm492_vm9, %v471_v17  ;;  %v3109_v17 = vld [vmem:[%s4248_s3 + $0x88] sm:$0xff]   ;;  %3053 = vmatprep.subr.bf16.mxu0 %v3108_v0 }
  0xa5   :  { %v535_v18 = vpop.permute.xlu0 %534 }
  0xa6   :  { %v537_v19 = vpop.permute.xlu1 %536  ;;  %559 = vst.msk [vmem:[#allocation4] sm:$0xff] %vm558_vm10, %v535_v18  ;;  %v3110_v18 = vld [vmem:[%s4248_s3 + $0x40] sm:$0xff]  }
  0xa7   :  { %560 = vst.msk [vmem:[#allocation4 + $0x8] sm:$0xff] %vm558_vm10, %v537_v19  ;;  %v3111_v19 = vld [vmem:[%s4248_s3] sm:$0xff]   ;;  %2883 = vmatprep.subr.bf16.mxu1 %v3110_v18 }
  0xa8   :  { %2884 = vmatpush3.bf16.msra.mxu1 %v3111_v19 }
  0xa9   :  { %v600_v20 = vpop.permute.xlu0 %599 }
  0xaa   :  { %v602_v21 = vpop.permute.xlu1 %601  ;;  %624 = vst.msk [vmem:[#allocation4] sm:$0xff] %vm623_vm11, %v600_v20  ;;  %v3112_v20 = vld [vmem:[%s4248_s3 + $0x48] sm:$0xff]  }
  0xab   :  { %625 = vst.msk [vmem:[#allocation4 + $0x8] sm:$0xff] %vm623_vm11, %v602_v21  ;;  %v3113_v21 = vld [vmem:[%s4248_s3 + $0x8] sm:$0xff]   ;;  %2885 = vmatprep.subr.bf16.mxu1 %v3112_v20 }
  0xac   :  { %2886 = vmatpush3.bf16.msra.mxu1 %v3113_v21 }
  0xad   :  { %v665_v22 = vpop.permute.xlu0 %664 }
  0xae   :  { %v667_v23 = vpop.permute.xlu1 %666  ;;  %689 = vst.msk [vmem:[#allocation4] sm:$0xff] %vm688_vm12, %v665_v22  ;;  %v3664_v22 = vld [vmem:[%s4249_s2] ss:$0 sm:$0xff] }
  0xaf   :  { %690 = vst.msk [vmem:[#allocation4 + $0x8] sm:$0xff] %vm688_vm12, %v667_v23 }
  0xb1   :  { %v213_v24 = vpop.permute.xlu0 %212 }
  0xb2   :  { %v215_v25 = vpop.permute.xlu1 %214  ;;  %235 = vst.msk [vmem:[#allocation4 + $0x10] sm:$0xff] %vm232_vm3, %v213_v24  ;;  %v3114_v24 = vld [vmem:[%s4248_s3 + $0x50] sm:$0xff]  }
  0xb3   :  { %236 = vst.msk [vmem:[#allocation4 + $0x18] sm:$0xff] %vm232_vm3, %v215_v25  ;;  %2887 = vmatprep.subr.bf16.mxu1 %v3114_v24  ;;  %v1350_v24 = vld [vmem:[#allocation3 + $0x92] sm:$0xff] }
  0xb5   :  { %v278_v26 = vpop.permute.xlu0 %277  ;;  %v697_v28 = vld [vmem:[#allocation4] sm:$0xff] }
  0xb6   :  { %v280_v27 = vpop.permute.xlu1 %279  ;;  %v698_v29 = vld [vmem:[#allocation4 + $0x8] sm:$0xff]  ;;  %300 = vst.msk [vmem:[#allocation4 + $0x10] sm:$0xff] %vm297_vm4, %v278_v26  ;;  %3037 = vmatprep.mubr.msk.bf16.mxu0 %vm732_vm13, %v697_v28 }
  0xb7   :  { %301 = vst.msk [vmem:[#allocation4 + $0x18] sm:$0xff] %vm297_vm4, %v280_v27  ;;  %3038 = vmatmul.mubr.msk.bf16.vlgmr.msra.gmra.mrb[0].mxu0 %vm732_vm13, %v698_v29  ;;  %v3115_v27 = vld [vmem:[%s4248_s3 + $0x10] sm:$0xff]  }
  0xb8   :  { %3054 = vmatpush3.bf16.msra.mxu0 %v3108_v0  ;;  %2888 = vmatpush3.bf16.msra.mxu1 %v3115_v27 }
  0xb9   :  { %v343_v30 = vpop.permute.xlu0 %342  ;;  %3055 = vmatprep.subr.bf16.mxu0 %v3109_v17 }
  0xba   :  { %v345_v31 = vpop.permute.xlu1 %344  ;;  %365 = vst.msk [vmem:[#allocation4 + $0x10] sm:$0xff] %vm362_vm5, %v343_v30 }
  0xbb   :  { %366 = vst.msk [vmem:[#allocation4 + $0x18] sm:$0xff] %vm362_vm5, %v345_v31 }
  0xbc   :  { %3056 = vmatpush3.bf16.msra.mxu0 %v3109_v17 }
  0xbd   :  { %v408_v32 = vpop.permute.xlu0 %407 }
  0xbe   :  { %v410_v33 = vpop.permute.xlu1 %409  ;;  %430 = vst.msk [vmem:[#allocation4 + $0x10] sm:$0xff] %vm427_vm8, %v408_v32 }
  0xbf   :  { %431 = vst.msk [vmem:[#allocation4 + $0x18] sm:$0xff] %vm427_vm8, %v410_v33 }
  0xc1   :  { %v473_v34 = vpop.permute.xlu0 %472 }
  0xc2   :  { %v475_v35 = vpop.permute.xlu1 %474  ;;  %495 = vst.msk [vmem:[#allocation4 + $0x10] sm:$0xff] %vm492_vm9, %v473_v34 }
  0xc3   :  { %496 = vst.msk [vmem:[#allocation4 + $0x18] sm:$0xff] %vm492_vm9, %v475_v35  ;;  %v3116_v35 = vld [vmem:[%s4248_s3 + $0x58] sm:$0xff]  }
  0xc4   :  { %2889 = vmatprep.subr.bf16.mxu1 %v3116_v35 }
  0xc5   :  { %v539_v36 = vpop.permute.xlu0 %538 }
  0xc6   :  { %v541_v37 = vpop.permute.xlu1 %540  ;;  %561 = vst.msk [vmem:[#allocation4 + $0x10] sm:$0xff] %vm558_vm10, %v539_v36 }
  0xc7   :  { %562 = vst.msk [vmem:[#allocation4 + $0x18] sm:$0xff] %vm558_vm10, %v541_v37  ;;  %v3117_v37 = vld [vmem:[%s4248_s3 + $0x18] sm:$0xff]  }
  0xc8   :  { %2890 = vmatpush3.bf16.msra.mxu1 %v3117_v37 }
  0xc9   :  { %v604_v38 = vpop.permute.xlu0 %603 }
  0xca   :  { %v606_v39 = vpop.permute.xlu1 %605  ;;  %626 = vst.msk [vmem:[#allocation4 + $0x10] sm:$0xff] %vm623_vm11, %v604_v38 }
  0xcb   :  { %627 = vst.msk [vmem:[#allocation4 + $0x18] sm:$0xff] %vm623_vm11, %v606_v39  ;;  %v3118_v39 = vld [vmem:[%s4248_s3 + $0x60] sm:$0xff]  }
  0xcc   :  { %2891 = vmatprep.subr.bf16.mxu1 %v3118_v39 }
  0xcd   :  { %v669_v40 = vpop.permute.xlu0 %668 }
  0xce   :  { %v671_v41 = vpop.permute.xlu1 %670  ;;  %691 = vst.msk [vmem:[#allocation4 + $0x10] sm:$0xff] %vm688_vm12, %v669_v40  ;;  %v3119_v40 = vld [vmem:[%s4248_s3 + $0x20] sm:$0xff]  }
  0xcf   :  { %692 = vst.msk [vmem:[#allocation4 + $0x18] sm:$0xff] %vm688_vm12, %v671_v41  ;;  %v923_v41 = vld [vmem:[#allocation3 + $0x1] sm:$0xff]  ;;  %2892 = vmatpush3.bf16.msra.mxu1 %v3119_v40 }
  0xd1   :  { %v217_v42 = vpop.permute.xlu0 %216 }
  0xd2   :  { %v219_v43 = vpop.permute.xlu1 %218  ;;  %237 = vst.msk [vmem:[#allocation4 + $0x20] sm:$0xff] %vm232_vm3, %v217_v42  ;;  %v891_v42 = vld [vmem:[#allocation3] sm:$0xff] }
  0xd3   :  { %238 = vst.msk [vmem:[#allocation4 + $0x28] sm:$0xff] %vm232_vm3, %v219_v43 }
  0xd5   :  { %v282_v44 = vpop.permute.xlu0 %281  ;;  %v699_v52 = vld [vmem:[#allocation4 + $0x10] sm:$0xff] }
  0xd6   :  { %v284_v51 = vpop.permute.xlu1 %283  ;;  %v700_v56 = vld [vmem:[#allocation4 + $0x18] sm:$0xff]  ;;  %302 = vst.msk [vmem:[#allocation4 + $0x20] sm:$0xff] %vm297_vm4, %v282_v44  ;;  %3041 = vmatprep.mubr.msk.bf16.mxu0 %vm732_vm13, %v699_v52 }
  0xd7   :  { %303 = vst.msk [vmem:[#allocation4 + $0x28] sm:$0xff] %vm297_vm4, %v284_v51  ;;  %3042 = vmatmul.mubr.msk.bf16.gmra.mrb[4].mxu0 %vm732_vm13, %v700_v56  ;;  %v988_v51 = vld [vmem:[#allocation3 + $0x2] sm:$0xff] }
  0xd9   :  { %v347_v45 = vpop.permute.xlu0 %346 }
  0xda   :  { %v349_v46 = vpop.permute.xlu1 %348  ;;  %367 = vst.msk [vmem:[#allocation4 + $0x20] sm:$0xff] %vm362_vm5, %v347_v45 }
  0xdb   :  { %368 = vst.msk [vmem:[#allocation4 + $0x28] sm:$0xff] %vm362_vm5, %v349_v46 }
  0xdd   :  { %v412_v47 = vpop.permute.xlu0 %411 }
  0xde   :  { %v414_v58 = vpop.permute.xlu1 %413  ;;  %432 = vst.msk [vmem:[#allocation4 + $0x20] sm:$0xff] %vm427_vm8, %v412_v47 }
  0xdf   :  { %433 = vst.msk [vmem:[#allocation4 + $0x28] sm:$0xff] %vm427_vm8, %v414_v58 }
  0xe1   :  { %v477_v59 = vpop.permute.xlu0 %476 }
  0xe2   :  { %v479_v60 = vpop.permute.xlu1 %478  ;;  %497 = vst.msk [vmem:[#allocation4 + $0x20] sm:$0xff] %vm492_vm9, %v477_v59 }
  0xe3   :  { %498 = vst.msk [vmem:[#allocation4 + $0x28] sm:$0xff] %vm492_vm9, %v479_v60 }
  0xe5   :  { %v543_v61 = vpop.permute.xlu0 %542 }
  0xe6   :  { %v545_v62 = vpop.permute.xlu1 %544  ;;  %563 = vst.msk [vmem:[#allocation4 + $0x20] sm:$0xff] %vm558_vm10, %v543_v61 }
  0xe7   :  { %564 = vst.msk [vmem:[#allocation4 + $0x28] sm:$0xff] %vm558_vm10, %v545_v62 }
  0xe9   :  { %v608_v63 = vpop.permute.xlu0 %607 }
  0xea   :  { %v610_v48 = vpop.permute.xlu1 %609  ;;  %628 = vst.msk [vmem:[#allocation4 + $0x20] sm:$0xff] %vm623_vm11, %v608_v63 }
  0xeb   :  { %629 = vst.msk [vmem:[#allocation4 + $0x28] sm:$0xff] %vm623_vm11, %v610_v48 }
  0xed   :  { %v673_v50 = vpop.permute.xlu0 %672 }
  0xee   :  { %v675_v1 = vpop.permute.xlu1 %674  ;;  %693 = vst.msk [vmem:[#allocation4 + $0x20] sm:$0xff] %vm688_vm12, %v673_v50 }
  0xef   :  { %694 = vst.msk [vmem:[#allocation4 + $0x28] sm:$0xff] %vm688_vm12, %v675_v1 }
  0xf1   :  { %v221_v2 = vpop.permute.xlu0 %220 }
  0xf2   :  { %v223_v3 = vpop.permute.xlu1 %222  ;;  %239 = vst.msk [vmem:[#allocation4 + $0x30] sm:$0xff] %vm232_vm3, %v221_v2 }
  0xf3   :  { %240 = vst.msk [vmem:[#allocation4 + $0x38] sm:$0xff] %vm232_vm3, %v223_v3  ;;  %v3120_v3 = vld [vmem:[%s4248_s3 + $0x68] sm:$0xff]  }
  0xf4   :  { %2893 = vmatprep.subr.bf16.mxu1 %v3120_v3 }
  0xf5   :  { %v286_v4 = vpop.permute.xlu0 %285  ;;  %v701_v6 = vld [vmem:[#allocation4 + $0x20] sm:$0xff] }
  0xf6   :  { %v288_v5 = vpop.permute.xlu1 %287  ;;  %v702_v7 = vld [vmem:[#allocation4 + $0x28] sm:$0xff]  ;;  %304 = vst.msk [vmem:[#allocation4 + $0x30] sm:$0xff] %vm297_vm4, %v286_v4  ;;  %3045 = vmatprep.mubr.msk.bf16.mxu0 %vm732_vm13, %v701_v6 }
  0xf7   :  { %305 = vst.msk [vmem:[#allocation4 + $0x38] sm:$0xff] %vm297_vm4, %v288_v5  ;;  %3046 = vmatmul.mubr.msk.bf16.gmra.mrb[8].mxu0 %vm732_vm13, %v702_v7  ;;  %v3121_v4 = vld [vmem:[%s4248_s3 + $0x28] sm:$0xff]   ;;  %v3122_v5 = vld [vmem:[%s4248_s3 + $0x70] sm:$0xff]  }
  0xf8   :  { %2894 = vmatpush3.bf16.msra.mxu1 %v3121_v4 }
  0xf9   :  { %v351_v55 = vpop.permute.xlu0 %350  ;;  %2895 = vmatprep.subr.bf16.mxu1 %v3122_v5 }
  0xfa   :  { %v353_v49 = vpop.permute.xlu1 %352  ;;  %369 = vst.msk [vmem:[#allocation4 + $0x30] sm:$0xff] %vm362_vm5, %v351_v55 }
  0xfb   :  { %370 = vst.msk [vmem:[#allocation4 + $0x38] sm:$0xff] %vm362_vm5, %v353_v49 }
  0xfd   :  { %v416_v53 = vpop.permute.xlu0 %415 }
  0xfe   :  { %v418_v54 = vpop.permute.xlu1 %417  ;;  %434 = vst.msk [vmem:[#allocation4 + $0x30] sm:$0xff] %vm427_vm8, %v416_v53  ;;  %v3123_v53 = vld [vmem:[%s4248_s3 + $0x30] sm:$0xff]  }
  0xff   :  { %435 = vst.msk [vmem:[#allocation4 + $0x38] sm:$0xff] %vm427_vm8, %v418_v54  ;;  %v3124_v54 = vld [vmem:[%s4248_s3 + $0x78] sm:$0xff]   ;;  %2896 = vmatpush3.bf16.msra.mxu1 %v3123_v53 }
 0x100   :  { %2897 = vmatprep.subr.bf16.mxu1 %v3124_v54  ;;  %v931_v54 = vld [vmem:[#allocation3 + $0xa1] sm:$0xff] }
 0x101   :  { %v481_v8 = vpop.permute.xlu0 %480 }
 0x102   :  { %v483_v9 = vpop.permute.xlu1 %482  ;;  %499 = vst.msk [vmem:[#allocation4 + $0x30] sm:$0xff] %vm492_vm9, %v481_v8 }
 0x103   :  { %500 = vst.msk [vmem:[#allocation4 + $0x38] sm:$0xff] %vm492_vm9, %v483_v9  ;;  %v3125_v9 = vld [vmem:[%s4248_s3 + $0x38] sm:$0xff]  }
 0x104   :  { %2898 = vmatpush3.bf16.msra.mxu1 %v3125_v9 }
 0x105   :  { %v547_v10 = vpop.permute.xlu0 %546 }
 0x106   :  { %v549_v11 = vpop.permute.xlu1 %548  ;;  %565 = vst.msk [vmem:[#allocation4 + $0x30] sm:$0xff] %vm558_vm10, %v547_v10 }
 0x107   :  { %566 = vst.msk [vmem:[#allocation4 + $0x38] sm:$0xff] %vm558_vm10, %v549_v11 }
 0x109   :  { %v612_v12 = vpop.permute.xlu0 %611 }
 0x10a   :  { %v614_v13 = vpop.permute.xlu1 %613  ;;  %630 = vst.msk [vmem:[#allocation4 + $0x30] sm:$0xff] %vm623_vm11, %v612_v12 }
 0x10b   :  { %631 = vst.msk [vmem:[#allocation4 + $0x38] sm:$0xff] %vm623_vm11, %v614_v13 }
 0x10d   :  { %v677_v57 = vpop.permute.xlu0 %676 }
 0x10e   :  { %v679_v14 = vpop.permute.xlu1 %678  ;;  %695 = vst.msk [vmem:[#allocation4 + $0x30] sm:$0xff] %vm688_vm12, %v677_v57 }
 0x10f   :  { %696 = vst.msk [vmem:[#allocation4 + $0x38] sm:$0xff] %vm688_vm12, %v679_v14 }
 0x115   :  { %v703_v15 = vld [vmem:[#allocation4 + $0x30] sm:$0xff] }
 0x116   :  { %v704_v16 = vld [vmem:[#allocation4 + $0x38] sm:$0xff]  ;;  %3049 = vmatprep.mubr.msk.bf16.mxu0 %vm732_vm13, %v703_v15 }
 0x117   :  { %3050 = vmatmul.mubr.msk.bf16.gmra.mrb[12].mxu0 %vm732_vm13, %v704_v16 }
 0x18a   :  { %v3039_v23 = vpop.f32.mrb[0].mxu0 }
 0x18b   :  { %v804_v25 = vadd.f32 %v3039_v23, %v3664_v22  ;;  %v795_v26 = vpop.f32.mrb[1].mxu0 }
 0x18c   :  { %v796_v28 = vadd.f32 %v3664_v22, %v795_v26  ;;  %v3040_v29 = vpop.f32.mrb[2].mxu0 }
 0x18d   :  { %v860_v30 = vmax.f32 %v804_v25, 0.0  ;;  %v807_v31 = vadd.f32 %v3040_v29, %v3664_v22  ;;  %v798_v32 = vpop.f32.mrb[3].mxu0 }
 0x18e   :  { %v858_v33 = vmax.f32 %v796_v28, 0.0  ;;  %v799_v34 = vadd.f32 %v3664_v22, %v798_v32 }
 0x18f   :  { %877 = vst.msk [vmem:[#allocation3 + $0x31] sm:$0xff] %vm69_vm6, %v860_v30  ;;  %v861_v36 = vmax.f32 %v807_v31, 0.0 }
 0x190   :  { %875 = vst.msk [vmem:[#allocation3 + $0x11] sm:$0xff] %vm69_vm6, %v858_v33  ;;  %v859_v38 = vmax.f32 %v799_v34, 0.0 }
 0x191   :  { %878 = vst.msk [vmem:[#allocation3 + $0x41] sm:$0xff] %vm69_vm6, %v861_v36 }
 0x192   :  { %876 = vst.msk [vmem:[#allocation3 + $0x21] sm:$0xff] %vm69_vm6, %v859_v38 }
 0x196   :  { %v1152_v43 = vld [vmem:[#allocation3 + $0x32] sm:$0xff] }
 0x197   :  { %v924_v44 = vld [vmem:[#allocation3 + $0x11] sm:$0xff] }
 0x198   :  { %v1055_v52 = vld [vmem:[#allocation3 + $0x30] sm:$0xff]  ;;  %v3692_v46 = vld [vmem:[#allocation3 + $0x42] sm:$0xff]  ;;  %v939_v47 = vpack.c.bf16 %v924_v44, %v923_v41 }
 0x199   :  { %v1053_v56 = vld [vmem:[#allocation3 + $0x10] sm:$0xff]  ;;  %v3694_v59 = vld [vmem:[#allocation3 + $0x41] sm:$0xff]  ;;  %v1167_v61 = vpack.c.bf16 %v3692_v46, %v1152_v43 }
 0x19a   :  { %v1280_v45 = vld [vmem:[#allocation3 + $0x31] sm:$0xff]  ;;  %v907_v60 = vpack.c.bf16 %v1053_v56, %v891_v42  ;;  %v1151_v62 = vld [vmem:[#allocation3 + $0x22] sm:$0xff]  ;;  %955 = vrot.lane.b32.xlu1 %v939_v47, %s3152_s22 }
 0x19b   :  { %v989_v58 = vld [vmem:[#allocation3 + $0x12] sm:$0xff]  ;;  %v1215_v63 = vld [vmem:[#allocation3 + $0x20] sm:$0xff]  ;;  %v1135_v50 = vpack.c.bf16 %v3694_v59, %v1280_v45  ;;  %v1359_v2 = vpack.c.bf16 %v1152_v43, %v1151_v62  ;;  %1184 = vrot.lane.b32.xlu0 %v1167_v61, %s3152_s22 }
 0x19c   :  { %v1279_v48 = vld [vmem:[#allocation3 + $0x21] sm:$0xff]  ;;  %v1231_v1 = vpack.c.bf16 %v1055_v52, %v1215_v63  ;;  %915 = vst.msk [vmem:[#allocation5] sm:$0xff] %vm69_vm6, %v907_v60  ;;  %v1004_v7 = vpack.c.bf16 %v989_v58, %v988_v51  ;;  %v1166_v55 = vpack.c.bf16 %v1151_v62, %v989_v58  ;;  %v1069_v11 = vpack.c.bf16 %v1215_v63, %v1053_v56 }
 0x19d   :  { %1143 = vst.msk [vmem:[#allocation5 + $0x20] sm:$0xff] %vm69_vm6, %v1135_v50  ;;  %v1134_v6 = vpack.c.bf16 %v1279_v48, %v924_v44  ;;  %1367 = vst.msk [vmem:[#allocation5 + $0x10] sm:$0xff] %vm69_vm6, %v1359_v2  ;;  %v1056_v49 = vld [vmem:[#allocation3 + $0x40] sm:$0xff]  ;;  %v1295_v12 = vpack.c.bf16 %v1280_v45, %v1279_v48  ;;  %v1222_v45 = vld [vmem:[#allocation3 + $0x90] sm:$0xff] }
 0x19e   :  { %916 = vst.msk [vmem:[#allocation5 + $0x18] sm:$0xff] %vm69_vm6, %v1231_v1  ;;  %1020 = vrot.lane.b32.xlu1 %v1004_v7, %s3153_s8  ;;  %v1070_v8 = vpack.c.bf16 %v1056_v49, %v1055_v52 }
 0x19f   :  { %1142 = vst.msk [vmem:[#allocation5 + $0x8] sm:$0xff] %vm69_vm6, %v1134_v6  ;;  %1182 = vrot.lane.b32.xlu0 %v1166_v55, %s3152_s22 }
 0x1a2   :  { %1087 = vrot.lane.b32.xlu1 %v1070_v8, %s3154_s12  ;;  %v899_v8 = vld [vmem:[#allocation3 + $0xa0] sm:$0xff] }
 0x1a3   :  { %1247 = vrot.lane.b32.xlu0 %v1231_v1, %s3153_s8 }
 0x1a4   :  { %v1377_v10 = vld [vmem:[#allocation5 + $0x10] sm:$0xff] }
 0x1a5   :  { %3057 = vmatprep.mubr.msk.bf16.mxu0 %vm69_vm6, %v1377_v10 }
 0x1a6   :  { %1085 = vrot.lane.b32.xlu1 %v1069_v11, %s3154_s12  ;;  %v996_v11 = vld [vmem:[#allocation3 + $0xa2] sm:$0xff] }
 0x1a7   :  { %1311 = vrot.lane.b32.xlu0 %v1295_v12, %s3154_s12 }
 0x1aa   :  { %v3043_v13 = vpop.f32.mrb[4].mxu0  ;;  %957 = vrot.lane.b32.xlu1 %v1295_v12, %s3152_s22 }
 0x1ab   :  { %v820_v57 = vadd.f32 %v3043_v13, %v3664_v22  ;;  %v811_v14 = vpop.f32.mrb[5].mxu0 }
 0x1ac   :  { %v812_v15 = vadd.f32 %v3664_v22, %v811_v14  ;;  %v3044_v16 = vpop.f32.mrb[6].mxu0 }
 0x1ad   :  { %v864_v0 = vmax.f32 %v820_v57, 0.0  ;;  %v823_v17 = vadd.f32 %v3044_v16, %v3664_v22  ;;  %v814_v18 = vpop.f32.mrb[7].mxu0 }
 0x1ae   :  { %v862_v19 = vmax.f32 %v812_v15, 0.0  ;;  %v815_v20 = vadd.f32 %v3664_v22, %v814_v18  ;;  %1022 = vrot.lane.b32.xlu1 %v1359_v2, %s3153_s8 }
 0x1af   :  { %881 = vst.msk [vmem:[#allocation3 + $0x71] sm:$0xff] %vm69_vm6, %v864_v0  ;;  %v865_v21 = vmax.f32 %v823_v17, 0.0 }
 0x1b0   :  { %879 = vst.msk [vmem:[#allocation3 + $0x51] sm:$0xff] %vm69_vm6, %v862_v19  ;;  %v863_v23 = vmax.f32 %v815_v20, 0.0 }
 0x1b1   :  { %882 = vst.msk [vmem:[#allocation3 + $0x81] sm:$0xff] %vm69_vm6, %v865_v21 }
 0x1b2   :  { %880 = vst.msk [vmem:[#allocation3 + $0x61] sm:$0xff] %vm69_vm6, %v863_v23 }
 0x1b6   :  { %v1156_v31 = vld [vmem:[#allocation3 + $0x72] sm:$0xff] }
 0x1b7   :  { %v1346_v25 = vld [vmem:[#allocation3 + $0x52] sm:$0xff] }
 0x1b8   :  { %v1218_v26 = vld [vmem:[#allocation3 + $0x50] sm:$0xff]  ;;  %v1360_v28 = vpack.c.bf16 %v1346_v25, %v3692_v46  ;;  %v1157_v32 = vld [vmem:[#allocation3 + $0x82] sm:$0xff] }
 0x1b9   :  { %v928_v27 = vld [vmem:[#allocation3 + $0x51] sm:$0xff]  ;;  %v1232_v29 = vpack.c.bf16 %v1218_v26, %v1056_v49  ;;  %v1285_v33 = vld [vmem:[#allocation3 + $0x81] sm:$0xff]  ;;  %v1362_v36 = vpack.c.bf16 %v1350_v24, %v1157_v32  ;;  %v1169_v51 = vpack.c.bf16 %v1157_v32, %v1156_v31 }
 0x1ba   :  { %v941_v30 = vpack.c.bf16 %v928_v27, %v3694_v59  ;;  %v1347_v34 = vld [vmem:[#allocation3 + $0x62] sm:$0xff]  ;;  %1368 = vst.msk [vmem:[#allocation5 + $0x28] sm:$0xff] %vm69_vm6, %v1360_v28  ;;  %v1059_v38 = vld [vmem:[#allocation3 + $0x70] sm:$0xff] }
 0x1bb   :  { %v1058_v35 = vld [vmem:[#allocation3 + $0x60] sm:$0xff]  ;;  %1249 = vrot.lane.b32.xlu0 %v1232_v29, %s3153_s8  ;;  %v1361_v39 = vpack.c.bf16 %v1156_v31, %v1347_v34  ;;  %v930_v40 = vld [vmem:[#allocation3 + $0x71] sm:$0xff]  ;;  %917 = vst.msk [vmem:[#allocation5 + $0x30] sm:$0xff] %vm69_vm6, %v1232_v29  ;;  %1370 = vst.msk [vmem:[#allocation5 + $0x58] sm:$0xff] %vm69_vm6, %v1362_v36  ;;  %v1168_v3 = vpack.c.bf16 %v1347_v34, %v1346_v25 }
 0x1bc   :  { %v929_v37 = vld [vmem:[#allocation3 + $0x61] sm:$0xff]  ;;  %959 = vrot.lane.b32.xlu1 %v941_v30, %s3152_s22  ;;  %v1233_v41 = vpack.c.bf16 %v1059_v38, %v1058_v35  ;;  %v1137_v42 = vpack.c.bf16 %v1285_v33, %v930_v40  ;;  %v1071_v58 = vpack.c.bf16 %v1058_v35, %v1218_v26  ;;  %v1286_v59 = vld [vmem:[#allocation3 + $0x91] sm:$0xff] }
 0x1bd   :  { %1369 = vst.msk [vmem:[#allocation5 + $0x40] sm:$0xff] %vm69_vm6, %v1361_v39  ;;  %v1136_v43 = vpack.c.bf16 %v929_v37, %v928_v27  ;;  %v1060_v44 = vld [vmem:[#allocation3 + $0x80] sm:$0xff]  ;;  %v1298_v60 = vpack.c.bf16 %v1286_v59, %v1285_v33  ;;  %v942_v62 = vpack.c.bf16 %v930_v40, %v929_v37 }
 0x1be   :  { %1145 = vst.msk [vmem:[#allocation5 + $0x50] sm:$0xff] %vm69_vm6, %v1137_v42  ;;  %918 = vst.msk [vmem:[#allocation5 + $0x48] sm:$0xff] %vm69_vm6, %v1233_v41  ;;  %v1072_v56 = vpack.c.bf16 %v1060_v44, %v1059_v38  ;;  %v1234_v47 = vpack.c.bf16 %v1222_v45, %v1060_v44 }
 0x1bf   :  { %1313 = vrot.lane.b32.xlu0 %v941_v30, %s3154_s12  ;;  %1144 = vst.msk [vmem:[#allocation5 + $0x38] sm:$0xff] %vm69_vm6, %v1136_v43 }
 0x1c0   :  { %1024 = vrot.lane.b32.xlu1 %v1360_v28, %s3153_s8 }
 0x1c1   :  { %v1380_v52 = vld [vmem:[#allocation5 + $0x28] sm:$0xff] }
 0x1c2   :  { %3058 = vmatmul.mubr.msk.bf16.vlgmr.msra.gmra.mrb[16].mxu0 %vm69_vm6, %v1380_v52  ;;  %v1386_v61 = vld [vmem:[#allocation5 + $0x58] sm:$0xff] }
 0x1c3   :  { %1188 = vrot.lane.b32.xlu0 %v1169_v51, %s3152_s22  ;;  %v1358_v52 = vld [vmem:[#allocation3 + $0x132] sm:$0xff] }
 0x1c4   :  { %1091 = vrot.lane.b32.xlu1 %v1072_v56, %s3154_s12  ;;  %v1383_v46 = vld [vmem:[#allocation5 + $0x40] sm:$0xff] }
 0x1c5   :  { %3061 = vmatprep.mubr.msk.bf16.mxu0 %vm69_vm6, %v1383_v46 }
 0x1c7   :  { %1253 = vrot.lane.b32.xlu0 %v1234_v47, %s3153_s8 }
 0x1c8   :  { %1089 = vrot.lane.b32.xlu1 %v1071_v58, %s3154_s12 }
 0x1ca   :  { %v3047_v63 = vpop.f32.mrb[8].mxu0  ;;  %3062 = vmatmul.mubr.msk.bf16.gmra.mrb[20].mxu0 %vm69_vm6, %v1386_v61 }
 0x1cb   :  { %1317 = vrot.lane.b32.xlu0 %v1298_v60, %s3154_s12  ;;  %v836_v48 = vadd.f32 %v3047_v63, %v3664_v22  ;;  %v827_v50 = vpop.f32.mrb[9].mxu0 }
 0x1cc   :  { %961 = vrot.lane.b32.xlu1 %v942_v62, %s3152_s22  ;;  %v828_v1 = vadd.f32 %v3664_v22, %v827_v50  ;;  %v3048_v2 = vpop.f32.mrb[10].mxu0 }
 0x1cd   :  { %v868_v4 = vmax.f32 %v836_v48, 0.0  ;;  %v839_v5 = vadd.f32 %v3048_v2, %v3664_v22  ;;  %v830_v6 = vpop.f32.mrb[11].mxu0 }
 0x1ce   :  { %v866_v7 = vmax.f32 %v828_v1, 0.0  ;;  %v831_v55 = vadd.f32 %v3664_v22, %v830_v6 }
 0x1cf   :  { %1186 = vrot.lane.b32.xlu0 %v1168_v3, %s3152_s22  ;;  %885 = vst.msk [vmem:[#allocation3 + $0xd1] sm:$0xff] %vm69_vm6, %v868_v4  ;;  %v869_v49 = vmax.f32 %v839_v5, 0.0 }
 0x1d0   :  { %1026 = vrot.lane.b32.xlu1 %v1361_v39, %s3153_s8  ;;  %883 = vst.msk [vmem:[#allocation3 + $0xb1] sm:$0xff] %vm69_vm6, %v866_v7  ;;  %v867_v53 = vmax.f32 %v831_v55, 0.0 }
 0x1d1   :  { %886 = vst.msk [vmem:[#allocation3 + $0xe1] sm:$0xff] %vm69_vm6, %v869_v49 }
 0x1d2   :  { %884 = vst.msk [vmem:[#allocation3 + $0xc1] sm:$0xff] %vm69_vm6, %v867_v53 }
 0x1d3   :  { %1251 = vrot.lane.b32.xlu0 %v1233_v41, %s3153_s8 }
 0x1d6   :  { %v1160_v9 = vld [vmem:[#allocation3 + $0xd2] sm:$0xff] }
 0x1d7   :  { %1315 = vrot.lane.b32.xlu0 %v942_v62, %s3154_s12  ;;  %v932_v10 = vld [vmem:[#allocation3 + $0xb1] sm:$0xff] }
 0x1d8   :  { %v1063_v12 = vld [vmem:[#allocation3 + $0xd0] sm:$0xff]  ;;  %v943_v14 = vpack.c.bf16 %v932_v10, %v931_v54  ;;  %v1161_v15 = vld [vmem:[#allocation3 + $0xe2] sm:$0xff] }
 0x1d9   :  { %v1061_v13 = vld [vmem:[#allocation3 + $0xb0] sm:$0xff]  ;;  %v935_v0 = vld [vmem:[#allocation3 + $0xe1] sm:$0xff]  ;;  %v1171_v18 = vpack.c.bf16 %v1161_v15, %v1160_v9 }
 0x1da   :  { %v1288_v57 = vld [vmem:[#allocation3 + $0xd1] sm:$0xff]  ;;  %v911_v17 = vpack.c.bf16 %v1061_v13, %v899_v8  ;;  %v1159_v19 = vld [vmem:[#allocation3 + $0xc2] sm:$0xff]  ;;  %963 = vrot.lane.b32.xlu1 %v943_v14, %s3152_s22 }
 0x1db   :  { %v997_v16 = vld [vmem:[#allocation3 + $0xb2] sm:$0xff]  ;;  %v1223_v20 = vld [vmem:[#allocation3 + $0xc0] sm:$0xff]  ;;  %v1139_v23 = vpack.c.bf16 %v935_v0, %v1288_v57  ;;  %v1363_v25 = vpack.c.bf16 %v1160_v9, %v1159_v19  ;;  %1192 = vrot.lane.b32.xlu0 %v1171_v18, %s3152_s22 }
 0x1dc   :  { %v1287_v21 = vld [vmem:[#allocation3 + $0xc1] sm:$0xff]  ;;  %v1235_v24 = vpack.c.bf16 %v1063_v12, %v1223_v20  ;;  %919 = vst.msk [vmem:[#allocation5 + $0x60] sm:$0xff] %vm69_vm6, %v911_v17  ;;  %v1008_v27 = vpack.c.bf16 %v997_v16, %v996_v11  ;;  %v1170_v28 = vpack.c.bf16 %v1159_v19, %v997_v16  ;;  %v1073_v32 = vpack.c.bf16 %v1223_v20, %v1061_v13 }
 0x1dd   :  { %1147 = vst.msk [vmem:[#allocation5 + $0x80] sm:$0xff] %vm69_vm6, %v1139_v23  ;;  %v1138_v26 = vpack.c.bf16 %v1287_v21, %v932_v10  ;;  %1371 = vst.msk [vmem:[#allocation5 + $0x70] sm:$0xff] %vm69_vm6, %v1363_v25  ;;  %v1064_v29 = vld [vmem:[#allocation3 + $0xe0] sm:$0xff]  ;;  %v1299_v33 = vpack.c.bf16 %v1288_v57, %v1287_v21  ;;  %v1230_v57 = vld [vmem:[#allocation3 + $0x130] sm:$0xff] }
 0x1de   :  { %920 = vst.msk [vmem:[#allocation5 + $0x78] sm:$0xff] %vm69_vm6, %v1235_v24  ;;  %1028 = vrot.lane.b32.xlu1 %v1008_v27, %s3153_s8  ;;  %v1074_v30 = vpack.c.bf16 %v1064_v29, %v1063_v12 }
 0x1df   :  { %1146 = vst.msk [vmem:[#allocation5 + $0x68] sm:$0xff] %vm69_vm6, %v1138_v26  ;;  %1190 = vrot.lane.b32.xlu0 %v1170_v28, %s3152_s22 }
 0x1e2   :  { %1095 = vrot.lane.b32.xlu1 %v1074_v30, %s3154_s12 }
 0x1e3   :  { %1255 = vrot.lane.b32.xlu0 %v1235_v24, %s3153_s8 }
 0x1e4   :  { %v1389_v31 = vld [vmem:[#allocation5 + $0x70] sm:$0xff] }
 0x1e5   :  { %3065 = vmatprep.mubr.msk.bf16.mxu0 %vm69_vm6, %v1389_v31 }
 0x1e6   :  { %1093 = vrot.lane.b32.xlu1 %v1073_v32, %s3154_s12 }
 0x1e7   :  { %1319 = vrot.lane.b32.xlu0 %v1299_v33, %s3154_s12 }
 0x1ea   :  { %v3051_v34 = vpop.f32.mrb[12].mxu0  ;;  %965 = vrot.lane.b32.xlu1 %v1299_v33, %s3152_s22 }
 0x1eb   :  { %v852_v35 = vadd.f32 %v3051_v34, %v3664_v22  ;;  %v843_v36 = vpop.f32.mrb[13].mxu0 }
 0x1ec   :  { %v844_v37 = vadd.f32 %v3664_v22, %v843_v36  ;;  %v3052_v38 = vpop.f32.mrb[14].mxu0 }
 0x1ed   :  { %v872_v39 = vmax.f32 %v852_v35, 0.0  ;;  %v855_v40 = vadd.f32 %v3052_v38, %v3664_v22  ;;  %v846_v41 = vpop.f32.mrb[15].mxu0 }
 0x1ee   :  { %v870_v42 = vmax.f32 %v844_v37, 0.0  ;;  %v847_v43 = vadd.f32 %v3664_v22, %v846_v41  ;;  %1030 = vrot.lane.b32.xlu1 %v1363_v25, %s3153_s8 }
 0x1ef   :  { %889 = vst.msk [vmem:[#allocation3 + $0x111] sm:$0xff] %vm69_vm6, %v872_v39  ;;  %v873_v44 = vmax.f32 %v855_v40, 0.0 }
 0x1f0   :  { %887 = vst.msk [vmem:[#allocation3 + $0xf1] sm:$0xff] %vm69_vm6, %v870_v42  ;;  %v871_v51 = vmax.f32 %v847_v43, 0.0 }
 0x1f1   :  { %890 = vst.msk [vmem:[#allocation3 + $0x121] sm:$0xff] %vm69_vm6, %v873_v44 }
 0x1f2   :  { %888 = vst.msk [vmem:[#allocation3 + $0x101] sm:$0xff] %vm69_vm6, %v871_v51 }
 0x1f6   :  { %v1164_v22 = vld [vmem:[#allocation3 + $0x112] sm:$0xff] }
 0x1f7   :  { %v1226_v56 = vld [vmem:[#allocation3 + $0xf0] sm:$0xff] }
 0x1f8   :  { %v936_v45 = vld [vmem:[#allocation3 + $0xf1] sm:$0xff]  ;;  %v1236_v47 = vpack.c.bf16 %v1226_v56, %v1064_v29  ;;  %v1165_v60 = vld [vmem:[#allocation3 + $0x122] sm:$0xff] }
 0x1f9   :  { %v1001_v46 = vld [vmem:[#allocation3 + $0xf2] sm:$0xff]  ;;  %v945_v58 = vpack.c.bf16 %v936_v45, %v935_v0  ;;  %v1293_v61 = vld [vmem:[#allocation3 + $0x121] sm:$0xff]  ;;  %v1366_v50 = vpack.c.bf16 %v1358_v52, %v1165_v60  ;;  %v1173_v7 = vpack.c.bf16 %v1165_v60, %v1164_v22 }
 0x1fa   :  { %v1010_v59 = vpack.c.bf16 %v1001_v46, %v1161_v15  ;;  %v1066_v62 = vld [vmem:[#allocation3 + $0x100] sm:$0xff]  ;;  %1257 = vrot.lane.b32.xlu0 %v1236_v47, %s3153_s8  ;;  %v938_v2 = vld [vmem:[#allocation3 + $0x111] sm:$0xff]  ;;  %921 = vst.msk [vmem:[#allocation5 + $0x90] sm:$0xff] %vm69_vm6, %v1236_v47 }
 0x1fb   :  { %v1355_v63 = vld [vmem:[#allocation3 + $0x102] sm:$0xff]  ;;  %967 = vrot.lane.b32.xlu1 %v945_v58, %s3152_s22  ;;  %v1228_v3 = vld [vmem:[#allocation3 + $0x110] sm:$0xff]  ;;  %1374 = vst.msk [vmem:[#allocation5 + $0xb8] sm:$0xff] %vm69_vm6, %v1366_v50  ;;  %v1141_v5 = vpack.c.bf16 %v1293_v61, %v938_v2  ;;  %v1075_v49 = vpack.c.bf16 %v1066_v62, %v1226_v56 }
 0x1fc   :  { %v937_v48 = vld [vmem:[#allocation3 + $0x101] sm:$0xff]  ;;  %1372 = vst.msk [vmem:[#allocation5 + $0x88] sm:$0xff] %vm69_vm6, %v1010_v59  ;;  %v1365_v1 = vpack.c.bf16 %v1164_v22, %v1355_v63  ;;  %v1237_v4 = vpack.c.bf16 %v1228_v3, %v1066_v62  ;;  %v1172_v54 = vpack.c.bf16 %v1355_v63, %v1001_v46  ;;  %v1294_v0 = vld [vmem:[#allocation3 + $0x131] sm:$0xff] }
 0x1fd   :  { %v1140_v6 = vpack.c.bf16 %v937_v48, %v936_v45  ;;  %1149 = vst.msk [vmem:[#allocation5 + $0xb0] sm:$0xff] %vm69_vm6, %v1141_v5  ;;  %v946_v8 = vpack.c.bf16 %v938_v2, %v937_v48  ;;  %v1068_v10 = vld [vmem:[#allocation3 + $0x120] sm:$0xff]  ;;  %v1302_v18 = vpack.c.bf16 %v1294_v0, %v1293_v61 }
 0x1fe   :  { %1373 = vst.msk [vmem:[#allocation5 + $0xa0] sm:$0xff] %vm69_vm6, %v1365_v1  ;;  %922 = vst.msk [vmem:[#allocation5 + $0xa8] sm:$0xff] %vm69_vm6, %v1237_v4  ;;  %1321 = vrot.lane.b32.xlu0 %v945_v58, %s3154_s12  ;;  %v1076_v13 = vpack.c.bf16 %v1068_v10, %v1228_v3  ;;  %v1238_v15 = vpack.c.bf16 %v1230_v57, %v1068_v10 }
 0x1ff   :  { %1032 = vrot.lane.b32.xlu1 %v1010_v59, %s3153_s8  ;;  %1148 = vst.msk [vmem:[#allocation5 + $0x98] sm:$0xff] %vm69_vm6, %v1140_v6 }
 0x202   :  { %1196 = vrot.lane.b32.xlu0 %v1173_v7, %s3152_s22  ;;  %v1398_v9 = vld [vmem:[#allocation5 + $0xb8] sm:$0xff] }
 0x203   :  { %v1392_v55 = vld [vmem:[#allocation5 + $0x88] sm:$0xff]  ;;  %1097 = vrot.lane.b32.xlu1 %v1075_v49, %s3154_s12 }
 0x204   :  { %3066 = vmatmul.mubr.msk.bf16.gmra.mrb[24].mxu0 %vm69_vm6, %v1392_v55 }
 0x205   :  { %v1395_v53 = vld [vmem:[#allocation5 + $0xa0] sm:$0xff] }
 0x206   :  { %3069 = vmatprep.mubr.msk.bf16.mxu0 %vm69_vm6, %v1395_v53  ;;  %1194 = vrot.lane.b32.xlu0 %v1172_v54, %s3152_s22 }
 0x207   :  { %969 = vrot.lane.b32.xlu1 %v946_v8, %s3152_s22 }
 0x20a   :  { %1259 = vrot.lane.b32.xlu0 %v1237_v4, %s3153_s8 }
 0x20b   :  { %1034 = vrot.lane.b32.xlu1 %v1365_v1, %s3153_s8 }
 0x20c   :  { %3070 = vmatmul.mubr.msk.bf16.gmra.mrb[28].mxu0 %vm69_vm6, %v1398_v9  ;;  %v956_v11 = vpop.permute.xlu1 %955 }
 0x20d   :  { %980 = vst.msk [vmem:[#allocation5] sm:$0xff] %vm979_vm14, %v956_v11  ;;  %v1185_v12 = vpop.permute.xlu0 %1184 }
 0x20e   :  { %1207 = vst.msk [vmem:[#allocation5 + $0x20] sm:$0xff] %vm979_vm14, %v1185_v12  ;;  %1323 = vrot.lane.b32.xlu0 %v946_v8, %s3154_s12 }
 0x20f   :  { %1099 = vrot.lane.b32.xlu1 %v1076_v13, %s3154_s12 }
 0x210   :  { %v1021_v14 = vpop.permute.xlu1 %1020 }
 0x211   :  { %1045 = vst.msk [vmem:[#allocation5] sm:$0xff] %vm1044_vm15, %v1021_v14  ;;  %v1183_v16 = vpop.permute.xlu0 %1182 }
 0x212   :  { %1206 = vst.msk [vmem:[#allocation5 + $0x8] sm:$0xff] %vm979_vm14, %v1183_v16  ;;  %1261 = vrot.lane.b32.xlu0 %v1238_v15, %s3153_s8 }
 0x214   :  { %v1088_v17 = vpop.permute.xlu1 %1087 }
 0x215   :  { %v1248_v19 = vpop.permute.xlu0 %1247 }
 0x216   :  { %1271 = vst.msk [vmem:[#allocation5 + $0x8] sm:$0xff] %vm1044_vm15, %v1248_v19  ;;  %1325 = vrot.lane.b32.xlu0 %v1302_v18, %s3154_s12 }
 0x218   :  { %v1086_v20 = vpop.permute.xlu1 %1085 }
 0x219   :  { %1110 = vst.msk [vmem:[#allocation5] sm:$0xff] %vm1109_vm0, %v1086_v20  ;;  %v1312_v21 = vpop.permute.xlu0 %1311 }
 0x21a   :  { %1335 = vst.msk [vmem:[#allocation5 + $0x8] sm:$0xff] %vm1109_vm0, %v1312_v21 }
 0x21c   :  { %v958_v23 = vpop.permute.xlu1 %957 }
 0x21d   :  { %981 = vst.msk [vmem:[#allocation5 + $0x18] sm:$0xff] %vm979_vm14, %v958_v23  ;;  %v3126_v23 = vld [vmem:[%s4250_s5 + $0x80] sm:$0xff]  }
 0x21e   :  { %3073 = vmatprep.subr.bf16.mxu1 %v3126_v23 }
 0x220   :  { %v1023_v24 = vpop.permute.xlu1 %1022  ;;  %v1375_v26 = vld [vmem:[#allocation5] sm:$0xff] }
 0x221   :  { %1046 = vst.msk [vmem:[#allocation5 + $0x18] sm:$0xff] %vm1044_vm15, %v1023_v24  ;;  %v1376_v25 = vld [vmem:[#allocation5 + $0x8] sm:$0xff] }
 0x222   :  { %1111 = vst.msk [vmem:[#allocation5 + $0x18] sm:$0xff] %vm1109_vm0, %v1088_v17  ;;  %1606 = vmatprep.mubr.bf16.mxu1 %v1376_v25  ;;  %v3127_v24 = vld [vmem:[%s4250_s5 + $0x88] sm:$0xff]  }
 0x223   :  { %1607 = vmatmul.mubr.bf16.vlgmr.msra.gmra.mrb[0].mxu1 %v1375_v26 }
 0x224   :  { %3074 = vmatpush3.bf16.msra.mxu1 %v3126_v23  ;;  %v3139_v23 = vld [vmem:[%s4250_s5 + $0x28] sm:$0xff]  }
 0x225   :  { %3075 = vmatprep.subr.bf16.mxu1 %v3127_v24 }
 0x228   :  { %3076 = vmatpush3.bf16.msra.mxu1 %v3127_v24 }
 0x229   :  { %v1378_v36 = vld [vmem:[#allocation5 + $0x18] sm:$0xff] }
 0x22d   :  { %v1250_v27 = vpop.permute.xlu0 %1249 }
 0x22e   :  { %v960_v28 = vpop.permute.xlu1 %959  ;;  %1272 = vst.msk [vmem:[#allocation5 + $0x20] sm:$0xff] %vm1044_vm15, %v1250_v27 }
 0x22f   :  { %982 = vst.msk [vmem:[#allocation5 + $0x30] sm:$0xff] %vm979_vm14, %v960_v28 }
 0x231   :  { %v1314_v29 = vpop.permute.xlu0 %1313 }
 0x232   :  { %v1025_v30 = vpop.permute.xlu1 %1024  ;;  %1336 = vst.msk [vmem:[#allocation5 + $0x20] sm:$0xff] %vm1109_vm0, %v1314_v29 }
 0x233   :  { %1047 = vst.msk [vmem:[#allocation5 + $0x30] sm:$0xff] %vm1044_vm15, %v1025_v30 }
 0x235   :  { %v1189_v31 = vpop.permute.xlu0 %1188 }
 0x236   :  { %1209 = vst.msk [vmem:[#allocation5 + $0x50] sm:$0xff] %vm979_vm14, %v1189_v31  ;;  %v1092_v32 = vpop.permute.xlu1 %1091 }
 0x239   :  { %v1254_v33 = vpop.permute.xlu0 %1253  ;;  %v1379_v34 = vld [vmem:[#allocation5 + $0x20] sm:$0xff] }
 0x23a   :  { %1274 = vst.msk [vmem:[#allocation5 + $0x50] sm:$0xff] %vm1044_vm15, %v1254_v33  ;;  %v1090_v35 = vpop.permute.xlu1 %1089  ;;  %1614 = vmatprep.mubr.bf16.mxu1 %v1379_v34  ;;  %v3907_v34 = vld [vmem:[%s4251_s4] ss:$0 sm:$0xff] }
 0x23b   :  { %1112 = vst.msk [vmem:[#allocation5 + $0x30] sm:$0xff] %vm1109_vm0, %v1090_v35  ;;  %1615 = vmatmul.mubr.bf16.gmra.mrb[4].mxu1 %v1378_v36 }
 0x23d   :  { %v1318_v37 = vpop.permute.xlu0 %1317 }
 0x23e   :  { %1338 = vst.msk [vmem:[#allocation5 + $0x50] sm:$0xff] %vm1109_vm0, %v1318_v37  ;;  %v962_v38 = vpop.permute.xlu1 %961 }
 0x23f   :  { %983 = vst.msk [vmem:[#allocation5 + $0x48] sm:$0xff] %vm979_vm14, %v962_v38 }
 0x241   :  { %v1187_v39 = vpop.permute.xlu0 %1186 }
 0x242   :  { %1208 = vst.msk [vmem:[#allocation5 + $0x38] sm:$0xff] %vm979_vm14, %v1187_v39  ;;  %v1027_v40 = vpop.permute.xlu1 %1026  ;;  %v1381_v45 = vld [vmem:[#allocation5 + $0x30] sm:$0xff] }
 0x243   :  { %1048 = vst.msk [vmem:[#allocation5 + $0x48] sm:$0xff] %vm1044_vm15, %v1027_v40 }
 0x244   :  { %1113 = vst.msk [vmem:[#allocation5 + $0x48] sm:$0xff] %vm1109_vm0, %v1092_v32 }
 0x245   :  { %v1252_v41 = vpop.permute.xlu0 %1251  ;;  %v1385_v46 = vld [vmem:[#allocation5 + $0x50] sm:$0xff] }
 0x246   :  { %1273 = vst.msk [vmem:[#allocation5 + $0x38] sm:$0xff] %vm1044_vm15, %v1252_v41 }
 0x249   :  { %v1316_v42 = vpop.permute.xlu0 %1315 }
 0x24a   :  { %1337 = vst.msk [vmem:[#allocation5 + $0x38] sm:$0xff] %vm1109_vm0, %v1316_v42 }
 0x24b   :  { %v1384_v60 = vld [vmem:[#allocation5 + $0x48] sm:$0xff] }
 0x24c   :  { %v964_v43 = vpop.permute.xlu1 %963 }
 0x24d   :  { %984 = vst.msk [vmem:[#allocation5 + $0x60] sm:$0xff] %vm979_vm14, %v964_v43  ;;  %v1193_v44 = vpop.permute.xlu0 %1192 }
 0x24e   :  { %1211 = vst.msk [vmem:[#allocation5 + $0x80] sm:$0xff] %vm979_vm14, %v1193_v44 }
 0x250   :  { %v1029_v51 = vpop.permute.xlu1 %1028 }
 0x251   :  { %v1382_v52 = vld [vmem:[#allocation5 + $0x38] sm:$0xff]  ;;  %1049 = vst.msk [vmem:[#allocation5 + $0x60] sm:$0xff] %vm1044_vm15, %v1029_v51  ;;  %v1191_v56 = vpop.permute.xlu0 %1190 }
 0x252   :  { %1622 = vmatprep.mubr.bf16.mxu1 %v1382_v52  ;;  %1210 = vst.msk [vmem:[#allocation5 + $0x68] sm:$0xff] %vm979_vm14, %v1191_v56  ;;  %v3128_v52 = vld [vmem:[%s4250_s5 + $0x40] sm:$0xff]  }
 0x253   :  { %1623 = vmatmul.mubr.bf16.gmra.mrb[8].mxu1 %v1381_v45  ;;  %v3129_v56 = vld [vmem:[%s4250_s5] sm:$0xff]   ;;  %2957 = vmatprep.subr.bf16.mxu0 %v3128_v52 }
 0x254   :  { %1630 = vmatprep.mubr.bf16.mxu1 %v1385_v46  ;;  %v1096_v47 = vpop.permute.xlu1 %1095  ;;  %2958 = vmatpush3.bf16.msra.mxu0 %v3129_v56  ;;  %v1832_v45 = vld [vmem:[#allocation3 + $0x1] sm:$0xff] }
 0x255   :  { %v1256_v58 = vpop.permute.xlu0 %1255  ;;  %v1800_v46 = vld [vmem:[#allocation3] sm:$0xff] }
 0x256   :  { %1275 = vst.msk [vmem:[#allocation5 + $0x68] sm:$0xff] %vm1044_vm15, %v1256_v58  ;;  %v3131_v58 = vld [vmem:[%s4250_s5 + $0x8] sm:$0xff]  }
 0x258   :  { %v1094_v59 = vpop.permute.xlu1 %1093 }
 0x259   :  { %1114 = vst.msk [vmem:[#allocation5 + $0x60] sm:$0xff] %vm1109_vm0, %v1094_v59  ;;  %v1320_v22 = vpop.permute.xlu0 %1319  ;;  %v3132_v59 = vld [vmem:[%s4250_s5 + $0x50] sm:$0xff]  }
 0x25a   :  { %1339 = vst.msk [vmem:[#allocation5 + $0x68] sm:$0xff] %vm1109_vm0, %v1320_v22 }
 0x25b   :  { %1631 = vmatmul.mubr.bf16.gmra.mrb[12].mxu1 %v1384_v60 }
 0x25c   :  { %v966_v61 = vpop.permute.xlu1 %965 }
 0x25d   :  { %985 = vst.msk [vmem:[#allocation5 + $0x78] sm:$0xff] %vm979_vm14, %v966_v61 }
 0x260   :  { %v1031_v62 = vpop.permute.xlu1 %1030  ;;  %v1387_v48 = vld [vmem:[#allocation5 + $0x60] sm:$0xff] }
 0x261   :  { %1050 = vst.msk [vmem:[#allocation5 + $0x78] sm:$0xff] %vm1044_vm15, %v1031_v62  ;;  %v1388_v63 = vld [vmem:[#allocation5 + $0x68] sm:$0xff] }
 0x262   :  { %1115 = vst.msk [vmem:[#allocation5 + $0x78] sm:$0xff] %vm1109_vm0, %v1096_v47  ;;  %1638 = vmatprep.mubr.bf16.mxu1 %v1388_v63  ;;  %v3130_v47 = vld [vmem:[%s4250_s5 + $0x48] sm:$0xff]  }
 0x263   :  { %1639 = vmatmul.mubr.bf16.gmra.mrb[16].mxu1 %v1387_v48  ;;  %2959 = vmatprep.subr.bf16.mxu0 %v3130_v47  ;;  %v1896_v62 = vld [vmem:[#allocation3 + $0x2] sm:$0xff] }
 0x264   :  { %2960 = vmatpush3.bf16.msra.mxu0 %v3131_v58 }
 0x265   :  { %2961 = vmatprep.subr.bf16.mxu0 %v3132_v59 }
 0x269   :  { %v1390_v49 = vld [vmem:[#allocation5 + $0x78] sm:$0xff] }
 0x26c   :  { %v1258_v50 = vpop.permute.xlu0 %1257 }
 0x26d   :  { %v968_v1 = vpop.permute.xlu1 %967  ;;  %1276 = vst.msk [vmem:[#allocation5 + $0x80] sm:$0xff] %vm1044_vm15, %v1258_v50 }
 0x26e   :  { %986 = vst.msk [vmem:[#allocation5 + $0x90] sm:$0xff] %vm979_vm14, %v968_v1 }
 0x270   :  { %v1322_v2 = vpop.permute.xlu0 %1321 }
 0x271   :  { %v1033_v3 = vpop.permute.xlu1 %1032  ;;  %1340 = vst.msk [vmem:[#allocation5 + $0x80] sm:$0xff] %vm1109_vm0, %v1322_v2 }
 0x272   :  { %1051 = vst.msk [vmem:[#allocation5 + $0x90] sm:$0xff] %vm1044_vm15, %v1033_v3 }
 0x274   :  { %v1197_v4 = vpop.permute.xlu0 %1196 }
 0x275   :  { %1213 = vst.msk [vmem:[#allocation5 + $0xb0] sm:$0xff] %vm979_vm14, %v1197_v4  ;;  %v1098_v5 = vpop.permute.xlu1 %1097  ;;  %v3133_v4 = vld [vmem:[%s4250_s5 + $0x10] sm:$0xff]  }
 0x276   :  { %1116 = vst.msk [vmem:[#allocation5 + $0x90] sm:$0xff] %vm1109_vm0, %v1098_v5  ;;  %v3134_v5 = vld [vmem:[%s4250_s5 + $0x58] sm:$0xff]   ;;  %2962 = vmatpush3.bf16.msra.mxu0 %v3133_v4 }
 0x277   :  { %2963 = vmatprep.subr.bf16.mxu0 %v3134_v5 }
 0x278   :  { %v1195_v6 = vpop.permute.xlu0 %1194  ;;  %v1391_v7 = vld [vmem:[#allocation5 + $0x80] sm:$0xff] }
 0x279   :  { %1212 = vst.msk [vmem:[#allocation5 + $0x98] sm:$0xff] %vm979_vm14, %v1195_v6  ;;  %v970_v55 = vpop.permute.xlu1 %969  ;;  %1646 = vmatprep.mubr.bf16.mxu1 %v1391_v7 }
 0x27a   :  { %987 = vst.msk [vmem:[#allocation5 + $0xa8] sm:$0xff] %vm979_vm14, %v970_v55  ;;  %1647 = vmatmul.mubr.bf16.gmra.mrb[20].mxu1 %v1390_v49  ;;  %v3135_v49 = vld [vmem:[%s4250_s5 + $0x18] sm:$0xff]  }
 0x27b   :  { %2964 = vmatpush3.bf16.msra.mxu0 %v3135_v49 }
 0x27c   :  { %v1260_v53 = vpop.permute.xlu0 %1259 }
 0x27d   :  { %1277 = vst.msk [vmem:[#allocation5 + $0x98] sm:$0xff] %vm1044_vm15, %v1260_v53  ;;  %v1035_v54 = vpop.permute.xlu1 %1034  ;;  %v1393_v13 = vld [vmem:[#allocation5 + $0x90] sm:$0xff]  ;;  %v3136_v53 = vld [vmem:[%s4250_s5 + $0x60] sm:$0xff]  }
 0x27e   :  { %1052 = vst.msk [vmem:[#allocation5 + $0xa8] sm:$0xff] %vm1044_vm15, %v1035_v54  ;;  %2965 = vmatprep.subr.bf16.mxu0 %v3136_v53 }
 0x280   :  { %v1324_v8 = vpop.permute.xlu0 %1323 }
 0x281   :  { %1341 = vst.msk [vmem:[#allocation5 + $0x98] sm:$0xff] %vm1109_vm0, %v1324_v8  ;;  %v1100_v9 = vpop.permute.xlu1 %1099 }
 0x282   :  { %1117 = vst.msk [vmem:[#allocation5 + $0xa8] sm:$0xff] %vm1109_vm0, %v1100_v9 }
 0x284   :  { %v1262_v10 = vpop.permute.xlu0 %1261 }
 0x285   :  { %1278 = vst.msk [vmem:[#allocation5 + $0xb0] sm:$0xff] %vm1044_vm15, %v1262_v10 }
 0x288   :  { %v1326_v11 = vpop.permute.xlu0 %1325  ;;  %v1394_v12 = vld [vmem:[#allocation5 + $0x98] sm:$0xff] }
 0x289   :  { %1342 = vst.msk [vmem:[#allocation5 + $0xb0] sm:$0xff] %vm1109_vm0, %v1326_v11  ;;  %1654 = vmatprep.mubr.bf16.mxu1 %v1394_v12  ;;  %v1396_v14 = vld [vmem:[#allocation5 + $0xa8] sm:$0xff]  ;;  %v3137_v12 = vld [vmem:[%s4250_s5 + $0x20] sm:$0xff]  }
 0x28a   :  { %1655 = vmatmul.mubr.bf16.gmra.mrb[24].mxu1 %v1393_v13  ;;  %2966 = vmatpush3.bf16.msra.mxu0 %v3137_v12 }
 0x290   :  { %v1397_v57 = vld [vmem:[#allocation5 + $0xb0] sm:$0xff] }
 0x291   :  { %1662 = vmatprep.mubr.bf16.mxu1 %v1397_v57 }
 0x292   :  { %1663 = vmatmul.mubr.bf16.gmra.mrb[28].mxu1 %v1396_v14 }
 0x295   :  { %v3870_v15 = vpop.f32.mrb[16].mxu0 }
 0x296   :  { %v1705_v16 = vpop.f32.mrb[17].mxu0 }
 0x297   :  { %v3872_v0 = vpop.f32.mrb[18].mxu0 }
 0x298   :  { %v1708_v17 = vpop.f32.mrb[19].mxu0 }
 0x29d   :  { %v3874_v18 = vpop.f32.mrb[20].mxu0 }
 0x29e   :  { %v3876_v19 = vpop.f32.mrb[21].mxu0 }
 0x29f   :  { %v3878_v20 = vpop.f32.mrb[22].mxu0 }
 0x2a0   :  { %v3880_v21 = vpop.f32.mrb[23].mxu0 }
 0x2d7   :  { %v3888_v25 = vpop.f32.mrb[24].mxu0 }
 0x2d8   :  { %v3890_v26 = vpop.f32.mrb[25].mxu0 }
 0x2d9   :  { %v3892_v27 = vpop.f32.mrb[26].mxu0 }
 0x2da   :  { %v3894_v28 = vpop.f32.mrb[27].mxu0 }
 0x2df   :  { %v3896_v29 = vpop.f32.mrb[28].mxu0 }
 0x2e0   :  { %v3898_v30 = vpop.f32.mrb[29].mxu0 }
 0x2e1   :  { %v3900_v31 = vpop.f32.mrb[30].mxu0 }
 0x2e2   :  { %v3902_v32 = vpop.f32.mrb[31].mxu0 }
 0x2f6   :  { %v2899_v33 = vpop.f32.mrb[0].mxu1 }
 0x2f7   :  { %v2900_v35 = vpop.f32.mrb[1].mxu1 }
 0x2f8   :  { %v2901_v36 = vadd.f32 %v2900_v35, %v2899_v33  ;;  %v2902_v37 = vpop.f32.mrb[2].mxu1 }
 0x2f9   :  { %v2903_v38 = vpop.f32.mrb[3].mxu1 }
 0x2fa   :  { %v1609_v39 = vadd.f32 %v2901_v36, %v3907_v34  ;;  %v2904_v40 = vadd.f32 %v2903_v38, %v2902_v37  ;;  %v3141_v36 = vld [vmem:[%s4250_s5 + $0x30] sm:$0xff]   ;;  %v3143_v37 = vld [vmem:[%s4250_s5 + $0x38] sm:$0xff]  }
 0x2fc   :  { %v1706_v41 = vadd.f32 %v1705_v16, %v1609_v39  ;;  %v1612_v42 = vadd.f32 %v2904_v40, %v3907_v34 }
 0x2fe   :  { %v1768_v43 = vmax.f32 %v1706_v41, 0.0  ;;  %v1709_v44 = vadd.f32 %v1708_v17, %v1612_v42  ;;  %v3138_v17 = vld [vmem:[%s4250_s5 + $0x68] sm:$0xff]  }
 0x2ff   :  { %2967 = vmatprep.subr.bf16.mxu0 %v3138_v17 }
 0x300   :  { %1784 = vst.msk [vmem:[#allocation3 + $0x11] sm:$0xff] %vm69_vm6, %v1768_v43  ;;  %v1769_v51 = vmax.f32 %v1709_v44, 0.0  ;;  %2968 = vmatpush3.bf16.msra.mxu0 %v3139_v23 }
 0x302   :  { %1785 = vst.msk [vmem:[#allocation3 + $0x21] sm:$0xff] %vm69_vm6, %v1769_v51 }
 0x307   :  { %v1833_v22 = vld [vmem:[#allocation3 + $0x11] sm:$0xff] }
 0x308   :  { %v1960_v60 = vld [vmem:[#allocation3 + $0x10] sm:$0xff]  ;;  %v1848_v61 = vpack.c.bf16 %v1833_v22, %v1832_v45 }
 0x309   :  { %v1816_v63 = vpack.c.bf16 %v1960_v60, %v1800_v46  ;;  %v2056_v48 = vld [vmem:[#allocation3 + $0x12] sm:$0xff]  ;;  %v2057_v50 = vld [vmem:[#allocation3 + $0x22] sm:$0xff] }
 0x30a   :  { %v1834_v1 = vld [vmem:[#allocation3 + $0x21] sm:$0xff]  ;;  %1864 = vrot.lane.b32.xlu1 %v1848_v61, %s3152_s22  ;;  %v2072_v2 = vpack.c.bf16 %v2057_v50, %v2056_v48  ;;  %v1912_v6 = vpack.c.bf16 %v2056_v48, %v1896_v62 }
 0x30b   :  { %1824 = vst.msk [vmem:[#allocation5] sm:$0xff] %vm69_vm6, %v1816_v63  ;;  %v2040_v3 = vpack.c.bf16 %v1834_v1, %v1833_v22  ;;  %v1961_v55 = vld [vmem:[#allocation3 + $0x20] sm:$0xff] }
 0x30c   :  { %2088 = vrot.lane.b32.xlu0 %v2072_v2, %s3152_s22  ;;  %v1976_v11 = vpack.c.bf16 %v1961_v55, %v1960_v60 }
 0x30d   :  { %2048 = vst.msk [vmem:[#allocation5 + $0x8] sm:$0xff] %vm69_vm6, %v2040_v3 }
 0x30e   :  { %v2905_v7 = vpop.f32.mrb[4].mxu1  ;;  %1928 = vrot.lane.b32.xlu1 %v1912_v6, %s3153_s8 }
 0x30f   :  { %v2906_v54 = vpop.f32.mrb[5].mxu1 }
 0x310   :  { %v2907_v8 = vadd.f32 %v2906_v54, %v2905_v7  ;;  %v2908_v9 = vpop.f32.mrb[6].mxu1 }
 0x311   :  { %v2909_v10 = vpop.f32.mrb[7].mxu1 }
 0x312   :  { %v1617_v13 = vadd.f32 %v2907_v8, %v3907_v34  ;;  %v2910_v57 = vadd.f32 %v2909_v10, %v2908_v9  ;;  %1992 = vrot.lane.b32.xlu1 %v1976_v11, %s3154_s12 }
 0x314   :  { %v1714_v14 = vadd.f32 %v3870_v15, %v1617_v13  ;;  %v1620_v16 = vadd.f32 %v2910_v57, %v3907_v34  ;;  %v3140_v15 = vld [vmem:[%s4250_s5 + $0x70] sm:$0xff]  }
 0x315   :  { %2969 = vmatprep.subr.bf16.mxu0 %v3140_v15 }
 0x316   :  { %v1770_v24 = vmax.f32 %v1714_v14, 0.0  ;;  %v1717_v33 = vadd.f32 %v3872_v0, %v1620_v16  ;;  %2970 = vmatpush3.bf16.msra.mxu0 %v3141_v36  ;;  %v3142_v0 = vld [vmem:[%s4250_s5 + $0x78] sm:$0xff]  }
 0x317   :  { %2971 = vmatprep.subr.bf16.mxu0 %v3142_v0 }
 0x318   :  { %1786 = vst.msk [vmem:[#allocation3 + $0x31] sm:$0xff] %vm69_vm6, %v1770_v24  ;;  %v1771_v35 = vmax.f32 %v1717_v33, 0.0 }
 0x31a   :  { %1787 = vst.msk [vmem:[#allocation3 + $0x41] sm:$0xff] %vm69_vm6, %v1771_v35  ;;  %2972 = vmatpush3.bf16.msra.mxu0 %v3143_v37 }
 0x31f   :  { %v2121_v38 = vld [vmem:[#allocation3 + $0x30] sm:$0xff] }
 0x320   :  { %v1835_v39 = vld [vmem:[#allocation3 + $0x31] sm:$0xff]  ;;  %v2136_v41 = vpack.c.bf16 %v2121_v38, %v1961_v55 }
 0x321   :  { %v1899_v40 = vld [vmem:[#allocation3 + $0x32] sm:$0xff]  ;;  %v1849_v42 = vpack.c.bf16 %v1835_v39, %v1834_v1  ;;  %v1836_v44 = vld [vmem:[#allocation3 + $0x41] sm:$0xff] }
 0x322   :  { %v1913_v43 = vpack.c.bf16 %v1899_v40, %v2057_v50  ;;  %2152 = vrot.lane.b32.xlu0 %v2136_v41, %s3153_s8  ;;  %1825 = vst.msk [vmem:[#allocation5 + $0x18] sm:$0xff] %vm69_vm6, %v2136_v41  ;;  %v2041_v51 = vpack.c.bf16 %v1836_v44, %v1835_v39  ;;  %v2059_v52 = vld [vmem:[#allocation3 + $0x42] sm:$0xff] }
 0x323   :  { %1866 = vrot.lane.b32.xlu1 %v1849_v42, %s3152_s22  ;;  %v1963_v45 = vld [vmem:[#allocation3 + $0x40] sm:$0xff]  ;;  %v2073_v59 = vpack.c.bf16 %v2059_v52, %v1899_v40 }
 0x324   :  { %2272 = vst.msk [vmem:[#allocation5 + $0x10] sm:$0xff] %vm69_vm6, %v1913_v43  ;;  %2049 = vst.msk [vmem:[#allocation5 + $0x20] sm:$0xff] %vm69_vm6, %v2041_v51  ;;  %v1977_v61 = vpack.c.bf16 %v1963_v45, %v2121_v38 }
 0x326   :  { %v2911_v56 = vpop.f32.mrb[8].mxu1  ;;  %2216 = vrot.lane.b32.xlu0 %v1849_v42, %s3154_s12 }
 0x327   :  { %1930 = vrot.lane.b32.xlu1 %v1913_v43, %s3153_s8  ;;  %v2912_v46 = vpop.f32.mrb[9].mxu1  ;;  %v2255_v43 = vld [vmem:[#allocation3 + $0x92] sm:$0xff] }
 0x328   :  { %v2913_v47 = vadd.f32 %v2912_v46, %v2911_v56  ;;  %v2914_v58 = vpop.f32.mrb[10].mxu1 }
 0x329   :  { %v2915_v22 = vpop.f32.mrb[11].mxu1 }
 0x32a   :  { %v1625_v62 = vadd.f32 %v2913_v47, %v3907_v34  ;;  %v2916_v63 = vadd.f32 %v2915_v22, %v2914_v58  ;;  %2090 = vrot.lane.b32.xlu0 %v2073_v59, %s3152_s22 }
 0x32b   :  { %v2282_v60 = vld [vmem:[#allocation5 + $0x10] sm:$0xff]  ;;  %1994 = vrot.lane.b32.xlu1 %v1977_v61, %s3154_s12 }
 0x32c   :  { %3077 = vmatprep.mubr.msk.bf16.mxu1 %vm69_vm6, %v2282_v60  ;;  %v1722_v48 = vadd.f32 %v3876_v19, %v1625_v62  ;;  %v1628_v50 = vadd.f32 %v2916_v63, %v3907_v34  ;;  %v1808_v60 = vld [vmem:[#allocation3 + $0xa0] sm:$0xff] }
 0x32e   :  { %v1772_v1 = vmax.f32 %v1722_v48, 0.0  ;;  %v1725_v2 = vadd.f32 %v3880_v21, %v1628_v50  ;;  %v2917_v3 = vpop.f32.mrb[12].mxu1 }
 0x32f   :  { %v2918_v4 = vpop.f32.mrb[13].mxu1 }
 0x330   :  { %1788 = vst.msk [vmem:[#allocation3 + $0x51] sm:$0xff] %vm69_vm6, %v1772_v1  ;;  %v1773_v5 = vmax.f32 %v1725_v2, 0.0  ;;  %v2919_v6 = vadd.f32 %v2918_v4, %v2917_v3  ;;  %v2920_v7 = vpop.f32.mrb[14].mxu1 }
 0x331   :  { %v2921_v55 = vpop.f32.mrb[15].mxu1 }
 0x332   :  { %1789 = vst.msk [vmem:[#allocation3 + $0x61] sm:$0xff] %vm69_vm6, %v1773_v5  ;;  %v1633_v49 = vadd.f32 %v2919_v6, %v3907_v34  ;;  %v2922_v53 = vadd.f32 %v2921_v55, %v2920_v7  ;;  %v2127_v6 = vld [vmem:[#allocation3 + $0x90] sm:$0xff]  ;;  %v1840_v55 = vld [vmem:[#allocation3 + $0xa1] sm:$0xff] }
 0x334   :  { %v1730_v19 = vadd.f32 %v3874_v18, %v1633_v49  ;;  %v1636_v54 = vadd.f32 %v2922_v53, %v3907_v34 }
 0x336   :  { %v1774_v8 = vmax.f32 %v1730_v19, 0.0  ;;  %v1733_v21 = vadd.f32 %v3878_v20, %v1636_v54  ;;  %v2923_v9 = vpop.f32.mrb[16].mxu1 }
 0x337   :  { %v2123_v10 = vld [vmem:[#allocation3 + $0x50] sm:$0xff]  ;;  %v2924_v57 = vpop.f32.mrb[17].mxu1 }
 0x338   :  { %v1837_v11 = vld [vmem:[#allocation3 + $0x51] sm:$0xff]  ;;  %1790 = vst.msk [vmem:[#allocation3 + $0x71] sm:$0xff] %vm69_vm6, %v1774_v8  ;;  %v1775_v13 = vmax.f32 %v1733_v21, 0.0  ;;  %v2137_v14 = vpack.c.bf16 %v2123_v10, %v1963_v45  ;;  %v2925_v23 = vadd.f32 %v2924_v57, %v2923_v9  ;;  %v2926_v24 = vpop.f32.mrb[18].mxu1 }
 0x339   :  { %v1901_v12 = vld [vmem:[#allocation3 + $0x52] sm:$0xff]  ;;  %v1850_v16 = vpack.c.bf16 %v1837_v11, %v1836_v44  ;;  %v1838_v33 = vld [vmem:[#allocation3 + $0x61] sm:$0xff]  ;;  %v2927_v18 = vpop.f32.mrb[19].mxu1 }
 0x33a   :  { %v1914_v17 = vpack.c.bf16 %v1901_v12, %v2059_v52  ;;  %1791 = vst.msk [vmem:[#allocation3 + $0x81] sm:$0xff] %vm69_vm6, %v1775_v13  ;;  %2154 = vrot.lane.b32.xlu0 %v2137_v14, %s3153_s8  ;;  %1826 = vst.msk [vmem:[#allocation5 + $0x30] sm:$0xff] %vm69_vm6, %v2137_v14  ;;  %v2042_v20 = vpack.c.bf16 %v1838_v33, %v1837_v11  ;;  %v1641_v35 = vadd.f32 %v2925_v23, %v3907_v34  ;;  %v2061_v37 = vld [vmem:[#allocation3 + $0x62] sm:$0xff]  ;;  %v2191_v9 = vld [vmem:[#allocation3 + $0x91] sm:$0xff] }
 0x33b   :  { %1868 = vrot.lane.b32.xlu1 %v1850_v16, %s3152_s22  ;;  %v2928_v15 = vadd.f32 %v2927_v18, %v2926_v24  ;;  %v1965_v38 = vld [vmem:[#allocation3 + $0x60] sm:$0xff]  ;;  %v2074_v44 = vpack.c.bf16 %v2061_v37, %v1901_v12 }
 0x33c   :  { %2273 = vst.msk [vmem:[#allocation5 + $0x28] sm:$0xff] %vm69_vm6, %v1914_v17  ;;  %2050 = vst.msk [vmem:[#allocation5 + $0x38] sm:$0xff] %vm69_vm6, %v2042_v20  ;;  %v1738_v36 = vadd.f32 %v3890_v26, %v1641_v35  ;;  %v1978_v45 = vpack.c.bf16 %v1965_v38, %v2123_v10  ;;  %v1904_v12 = vld [vmem:[#allocation3 + $0xa2] sm:$0xff] }
 0x33d   :  { %v1644_v0 = vadd.f32 %v2928_v15, %v3907_v34 }
 0x33e   :  { %2218 = vrot.lane.b32.xlu0 %v1850_v16, %s3154_s12  ;;  %v1776_v39 = vmax.f32 %v1738_v36, 0.0 }
 0x33f   :  { %1932 = vrot.lane.b32.xlu1 %v1914_v17, %s3153_s8  ;;  %v1741_v40 = vadd.f32 %v3894_v28, %v1644_v0  ;;  %v2125_v41 = vld [vmem:[#allocation3 + $0x70] sm:$0xff] }
 0x340   :  { %v2253_v42 = vld [vmem:[#allocation3 + $0x72] sm:$0xff]  ;;  %v2138_v51 = vpack.c.bf16 %v2125_v41, %v1965_v38  ;;  %1792 = vst.msk [vmem:[#allocation3 + $0xb1] sm:$0xff] %vm69_vm6, %v1776_v39 }
 0x341   :  { %v2266_v52 = vpack.c.bf16 %v2253_v42, %v2061_v37  ;;  %v1777_v26 = vmax.f32 %v1741_v40, 0.0  ;;  %v2254_v46 = vld [vmem:[#allocation3 + $0x82] sm:$0xff]  ;;  %v1839_v47 = vld [vmem:[#allocation3 + $0x71] sm:$0xff] }
 0x342   :  { %2092 = vrot.lane.b32.xlu0 %v2074_v44, %s3152_s22  ;;  %v2267_v28 = vpack.c.bf16 %v2255_v43, %v2254_v46  ;;  %v2190_v58 = vld [vmem:[#allocation3 + $0x81] sm:$0xff]  ;;  %1827 = vst.msk [vmem:[#allocation5 + $0x48] sm:$0xff] %vm69_vm6, %v2138_v51  ;;  %v1851_v22 = vpack.c.bf16 %v1839_v47, %v1838_v33  ;;  %v2075_v4 = vpack.c.bf16 %v2254_v46, %v2253_v42 }
 0x343   :  { %v2285_v56 = vld [vmem:[#allocation5 + $0x28] sm:$0xff]  ;;  %2274 = vst.msk [vmem:[#allocation5 + $0x40] sm:$0xff] %vm69_vm6, %v2266_v52  ;;  %1793 = vst.msk [vmem:[#allocation3 + $0xc1] sm:$0xff] %vm69_vm6, %v1777_v26  ;;  %1996 = vrot.lane.b32.xlu1 %v1978_v45, %s3154_s12  ;;  %v2043_v59 = vpack.c.bf16 %v2190_v58, %v1839_v47  ;;  %v1967_v48 = vld [vmem:[#allocation3 + $0x80] sm:$0xff]  ;;  %v2203_v16 = vpack.c.bf16 %v2191_v9, %v2190_v58 }
 0x344   :  { %3078 = vmatmul.mubr.msk.bf16.vlgmr.msra.gmra.mrb[32].mxu1 %vm69_vm6, %v2285_v56  ;;  %2275 = vst.msk [vmem:[#allocation5 + $0x58] sm:$0xff] %vm69_vm6, %v2267_v28  ;;  %v1979_v5 = vpack.c.bf16 %v1967_v48, %v2125_v41  ;;  %v2139_v54 = vpack.c.bf16 %v2127_v6, %v1967_v48 }
 0x345   :  { %2051 = vst.msk [vmem:[#allocation5 + $0x50] sm:$0xff] %vm69_vm6, %v2043_v59 }
 0x346   :  { %2156 = vrot.lane.b32.xlu0 %v2138_v51, %s3153_s8 }
 0x347   :  { %1870 = vrot.lane.b32.xlu1 %v1851_v22, %s3152_s22  ;;  %v1968_v61 = vld [vmem:[#allocation3 + $0xb0] sm:$0xff] }
 0x348   :  { %v1820_v63 = vpack.c.bf16 %v1968_v61, %v1808_v60  ;;  %v1841_v50 = vld [vmem:[#allocation3 + $0xb1] sm:$0xff] }
 0x349   :  { %v1852_v21 = vpack.c.bf16 %v1841_v50, %v1840_v55  ;;  %v1905_v13 = vld [vmem:[#allocation3 + $0xb2] sm:$0xff] }
 0x34a   :  { %v2288_v62 = vld [vmem:[#allocation5 + $0x40] sm:$0xff]  ;;  %2220 = vrot.lane.b32.xlu0 %v1851_v22, %s3154_s12  ;;  %1828 = vst.msk [vmem:[#allocation5 + $0x60] sm:$0xff] %vm69_vm6, %v1820_v63  ;;  %v1916_v17 = vpack.c.bf16 %v1905_v13, %v1904_v12 }
 0x34b   :  { %3081 = vmatprep.mubr.msk.bf16.mxu1 %vm69_vm6, %v2288_v62  ;;  %v1842_v1 = vld [vmem:[#allocation3 + $0xc1] sm:$0xff]  ;;  %1934 = vrot.lane.b32.xlu1 %v2266_v52, %s3153_s8  ;;  %v2291_v2 = vld [vmem:[#allocation5 + $0x58] sm:$0xff] }
 0x34c   :  { %v2044_v3 = vpack.c.bf16 %v1842_v1, %v1841_v50  ;;  %3082 = vmatmul.mubr.msk.bf16.gmra.mrb[36].mxu1 %vm69_vm6, %v2291_v2  ;;  %v2065_v23 = vld [vmem:[#allocation3 + $0xc2] sm:$0xff] }
 0x34d   :  { %v2929_v7 = vpop.f32.mrb[20].mxu1  ;;  %v1969_v18 = vld [vmem:[#allocation3 + $0xc0] sm:$0xff]  ;;  %v2076_v35 = vpack.c.bf16 %v2065_v23, %v1905_v13 }
 0x34e   :  { %2052 = vst.msk [vmem:[#allocation5 + $0x68] sm:$0xff] %vm69_vm6, %v2044_v3  ;;  %2094 = vrot.lane.b32.xlu0 %v2075_v4, %s3152_s22  ;;  %v2930_v49 = vpop.f32.mrb[21].mxu1  ;;  %v1980_v15 = vpack.c.bf16 %v1969_v18, %v1968_v61 }
 0x34f   :  { %1998 = vrot.lane.b32.xlu1 %v1979_v5, %s3154_s12  ;;  %v2931_v53 = vadd.f32 %v2930_v49, %v2929_v7  ;;  %v2932_v19 = vpop.f32.mrb[22].mxu1 }
 0x350   :  { %v2933_v8 = vpop.f32.mrb[23].mxu1 }
 0x351   :  { %v1649_v10 = vadd.f32 %v2931_v53, %v3907_v34  ;;  %v2934_v11 = vadd.f32 %v2933_v8, %v2932_v19 }
 0x352   :  { %2158 = vrot.lane.b32.xlu0 %v2139_v54, %s3153_s8 }
 0x353   :  { %1872 = vrot.lane.b32.xlu1 %v1852_v21, %s3152_s22  ;;  %v1746_v57 = vadd.f32 %v3888_v25, %v1649_v10  ;;  %v1652_v14 = vadd.f32 %v2934_v11, %v3907_v34  ;;  %v2263_v10 = vld [vmem:[#allocation3 + $0x132] sm:$0xff] }
 0x355   :  { %v1778_v24 = vmax.f32 %v1746_v57, 0.0  ;;  %v1749_v33 = vadd.f32 %v3892_v27, %v1652_v14 }
 0x356   :  { %2222 = vrot.lane.b32.xlu0 %v2203_v16, %s3154_s12 }
 0x357   :  { %1936 = vrot.lane.b32.xlu1 %v1916_v17, %s3153_s8  ;;  %1794 = vst.msk [vmem:[#allocation3 + $0xd1] sm:$0xff] %vm69_vm6, %v1778_v24  ;;  %v1779_v20 = vmax.f32 %v1749_v33, 0.0 }
 0x359   :  { %1795 = vst.msk [vmem:[#allocation3 + $0xe1] sm:$0xff] %vm69_vm6, %v1779_v20 }
 0x35a   :  { %2096 = vrot.lane.b32.xlu0 %v2076_v35, %s3152_s22 }
 0x35b   :  { %2000 = vrot.lane.b32.xlu1 %v1980_v15, %s3154_s12 }
 0x35d   :  { %v2935_v25 = vpop.f32.mrb[24].mxu1 }
 0x35e   :  { %v2936_v36 = vpop.f32.mrb[25].mxu1  ;;  %v2129_v0 = vld [vmem:[#allocation3 + $0xd0] sm:$0xff] }
 0x35f   :  { %v1843_v27 = vld [vmem:[#allocation3 + $0xd1] sm:$0xff]  ;;  %v2937_v38 = vadd.f32 %v2936_v36, %v2935_v25  ;;  %v2938_v39 = vpop.f32.mrb[26].mxu1  ;;  %v2140_v40 = vpack.c.bf16 %v2129_v0, %v1969_v18 }
 0x360   :  { %v1907_v37 = vld [vmem:[#allocation3 + $0xd2] sm:$0xff]  ;;  %v1853_v41 = vpack.c.bf16 %v1843_v27, %v1842_v1  ;;  %v2939_v43 = vpop.f32.mrb[27].mxu1  ;;  %v1844_v44 = vld [vmem:[#allocation3 + $0xe1] sm:$0xff] }
 0x361   :  { %v1917_v42 = vpack.c.bf16 %v1907_v37, %v2065_v23  ;;  %v1657_v51 = vadd.f32 %v2937_v38, %v3907_v34  ;;  %v2940_v52 = vadd.f32 %v2939_v43, %v2938_v39  ;;  %2160 = vrot.lane.b32.xlu0 %v2140_v40, %s3153_s8  ;;  %1829 = vst.msk [vmem:[#allocation5 + $0x78] sm:$0xff] %vm69_vm6, %v2140_v40  ;;  %v2067_v46 = vld [vmem:[#allocation3 + $0xe2] sm:$0xff]  ;;  %v2135_v39 = vld [vmem:[#allocation3 + $0x130] sm:$0xff] }
 0x362   :  { %1874 = vrot.lane.b32.xlu1 %v1853_v41, %s3152_s22  ;;  %v2045_v26 = vpack.c.bf16 %v1844_v44, %v1843_v27  ;;  %v1971_v59 = vld [vmem:[#allocation3 + $0xe0] sm:$0xff]  ;;  %v2077_v62 = vpack.c.bf16 %v2067_v46, %v1907_v37 }
 0x363   :  { %2276 = vst.msk [vmem:[#allocation5 + $0x70] sm:$0xff] %vm69_vm6, %v1917_v42  ;;  %v1754_v56 = vadd.f32 %v3898_v30, %v1657_v51  ;;  %v1660_v45 = vadd.f32 %v2940_v52, %v3907_v34  ;;  %v1981_v50 = vpack.c.bf16 %v1971_v59, %v2129_v0 }
 0x364   :  { %2053 = vst.msk [vmem:[#allocation5 + $0x80] sm:$0xff] %vm69_vm6, %v2045_v26 }
 0x365   :  { %v1780_v47 = vmax.f32 %v1754_v56, 0.0  ;;  %v1757_v28 = vadd.f32 %v3902_v32, %v1660_v45  ;;  %v2941_v58 = vpop.f32.mrb[28].mxu1  ;;  %2224 = vrot.lane.b32.xlu0 %v1853_v41, %s3154_s12  ;;  %v2199_v41 = vld [vmem:[#allocation3 + $0x131] sm:$0xff] }
 0x366   :  { %1938 = vrot.lane.b32.xlu1 %v1917_v42, %s3153_s8  ;;  %v2942_v22 = vpop.f32.mrb[29].mxu1 }
 0x367   :  { %1796 = vst.msk [vmem:[#allocation3 + $0xf1] sm:$0xff] %vm69_vm6, %v1780_v47  ;;  %v1781_v60 = vmax.f32 %v1757_v28, 0.0  ;;  %v2943_v61 = vadd.f32 %v2942_v22, %v2941_v58  ;;  %v2944_v30 = vpop.f32.mrb[30].mxu1 }
 0x368   :  { %v2945_v63 = vpop.f32.mrb[31].mxu1 }
 0x369   :  { %1797 = vst.msk [vmem:[#allocation3 + $0x101] sm:$0xff] %vm69_vm6, %v1781_v60  ;;  %v1665_v32 = vadd.f32 %v2943_v61, %v3907_v34  ;;  %v2946_v1 = vadd.f32 %v2945_v63, %v2944_v30  ;;  %2098 = vrot.lane.b32.xlu0 %v2077_v62, %s3152_s22 }
 0x36a   :  { %v2294_v48 = vld [vmem:[#allocation5 + $0x70] sm:$0xff]  ;;  %2002 = vrot.lane.b32.xlu1 %v1981_v50, %s3154_s12 }
 0x36b   :  { %3085 = vmatprep.mubr.msk.bf16.mxu1 %vm69_vm6, %v2294_v48  ;;  %v1762_v2 = vadd.f32 %v3896_v29, %v1665_v32  ;;  %v1668_v3 = vadd.f32 %v2946_v1, %v3907_v34 }
 0x36d   :  { %v1782_v4 = vmax.f32 %v1762_v2, 0.0  ;;  %v1765_v5 = vadd.f32 %v3900_v31, %v1668_v3 }
 0x36e   :  { %v2131_v6 = vld [vmem:[#allocation3 + $0xf0] sm:$0xff] }
 0x36f   :  { %v1845_v7 = vld [vmem:[#allocation3 + $0xf1] sm:$0xff]  ;;  %1798 = vst.msk [vmem:[#allocation3 + $0x111] sm:$0xff] %vm69_vm6, %v1782_v4  ;;  %v1783_v49 = vmax.f32 %v1765_v5, 0.0  ;;  %v2141_v53 = vpack.c.bf16 %v2131_v6, %v1971_v59 }
 0x370   :  { %v1909_v55 = vld [vmem:[#allocation3 + $0xf2] sm:$0xff]  ;;  %v1854_v19 = vpack.c.bf16 %v1845_v7, %v1844_v44  ;;  %v1846_v8 = vld [vmem:[#allocation3 + $0x101] sm:$0xff] }
 0x371   :  { %v1918_v54 = vpack.c.bf16 %v1909_v55, %v2067_v46  ;;  %1799 = vst.msk [vmem:[#allocation3 + $0x121] sm:$0xff] %vm69_vm6, %v1783_v49  ;;  %2162 = vrot.lane.b32.xlu0 %v2141_v53, %s3153_s8  ;;  %1830 = vst.msk [vmem:[#allocation5 + $0x90] sm:$0xff] %vm69_vm6, %v2141_v53  ;;  %v2046_v29 = vpack.c.bf16 %v1846_v8, %v1845_v7  ;;  %v2069_v31 = vld [vmem:[#allocation3 + $0x102] sm:$0xff] }
 0x372   :  { %1876 = vrot.lane.b32.xlu1 %v1854_v19, %s3152_s22  ;;  %v1973_v34 = vld [vmem:[#allocation3 + $0x100] sm:$0xff]  ;;  %v2078_v11 = vpack.c.bf16 %v2069_v31, %v1909_v55 }
 0x373   :  { %2277 = vst.msk [vmem:[#allocation5 + $0x88] sm:$0xff] %vm69_vm6, %v1918_v54  ;;  %2054 = vst.msk [vmem:[#allocation5 + $0x98] sm:$0xff] %vm69_vm6, %v2046_v29  ;;  %v1982_v14 = vpack.c.bf16 %v1973_v34, %v2131_v6 }
 0x375   :  { %2226 = vrot.lane.b32.xlu0 %v1854_v19, %s3154_s12 }
 0x376   :  { %1940 = vrot.lane.b32.xlu1 %v1918_v54, %s3153_s8  ;;  %v2133_v21 = vld [vmem:[#allocation3 + $0x110] sm:$0xff] }
 0x377   :  { %v2261_v9 = vld [vmem:[#allocation3 + $0x112] sm:$0xff]  ;;  %v2142_v12 = vpack.c.bf16 %v2133_v21, %v1973_v34 }
 0x378   :  { %v2270_v13 = vpack.c.bf16 %v2261_v9, %v2069_v31  ;;  %v2262_v16 = vld [vmem:[#allocation3 + $0x122] sm:$0xff]  ;;  %v1847_v17 = vld [vmem:[#allocation3 + $0x111] sm:$0xff] }
 0x379   :  { %2100 = vrot.lane.b32.xlu0 %v2078_v11, %s3152_s22  ;;  %v2271_v23 = vpack.c.bf16 %v2263_v10, %v2262_v16  ;;  %v2198_v24 = vld [vmem:[#allocation3 + $0x121] sm:$0xff]  ;;  %1831 = vst.msk [vmem:[#allocation5 + $0xa8] sm:$0xff] %vm69_vm6, %v2142_v12  ;;  %v1855_v20 = vpack.c.bf16 %v1847_v17, %v1846_v8  ;;  %v2079_v27 = vpack.c.bf16 %v2262_v16, %v2261_v9 }
 0x37a   :  { %v2297_v57 = vld [vmem:[#allocation5 + $0x88] sm:$0xff]  ;;  %2278 = vst.msk [vmem:[#allocation5 + $0xa0] sm:$0xff] %vm69_vm6, %v2270_v13  ;;  %2004 = vrot.lane.b32.xlu1 %v1982_v14, %s3154_s12  ;;  %v2047_v33 = vpack.c.bf16 %v2198_v24, %v1847_v17  ;;  %v1975_v36 = vld [vmem:[#allocation3 + $0x120] sm:$0xff]  ;;  %v2207_v42 = vpack.c.bf16 %v2199_v41, %v2198_v24 }
 0x37b   :  { %3086 = vmatmul.mubr.msk.bf16.gmra.mrb[40].mxu1 %vm69_vm6, %v2297_v57  ;;  %2279 = vst.msk [vmem:[#allocation5 + $0xb8] sm:$0xff] %vm69_vm6, %v2271_v23  ;;  %v1983_v38 = vpack.c.bf16 %v1975_v36, %v2133_v21  ;;  %v2143_v40 = vpack.c.bf16 %v2135_v39, %v1975_v36 }
 0x37c   :  { %v1865_v18 = vpop.permute.xlu1 %1864  ;;  %2055 = vst.msk [vmem:[#allocation5 + $0xb0] sm:$0xff] %vm69_vm6, %v2047_v33 }
 0x37d   :  { %1888 = vst.msk [vmem:[#allocation5] sm:$0xff] %vm979_vm14, %v1865_v18  ;;  %2164 = vrot.lane.b32.xlu0 %v2142_v12, %s3153_s8 }
 0x37e   :  { %1878 = vrot.lane.b32.xlu1 %v1855_v20, %s3152_s22  ;;  %v2089_v35 = vpop.permute.xlu0 %2088 }
 0x37f   :  { %2112 = vst.msk [vmem:[#allocation5 + $0x8] sm:$0xff] %vm979_vm14, %v2089_v35 }
 0x380   :  { %v1929_v15 = vpop.permute.xlu1 %1928 }
 0x381   :  { %v2300_v25 = vld [vmem:[#allocation5 + $0xa0] sm:$0xff]  ;;  %1952 = vst.msk [vmem:[#allocation5] sm:$0xff] %vm1044_vm15, %v1929_v15  ;;  %2228 = vrot.lane.b32.xlu0 %v1855_v20, %s3154_s12 }
 0x382   :  { %3089 = vmatprep.mubr.msk.bf16.mxu1 %vm69_vm6, %v2300_v25  ;;  %1942 = vrot.lane.b32.xlu1 %v2270_v13, %s3153_s8  ;;  %v2303_v0 = vld [vmem:[#allocation5 + $0xb8] sm:$0xff] }
 0x383   :  { %3090 = vmatmul.mubr.msk.bf16.gmra.mrb[44].mxu1 %vm69_vm6, %v2303_v0 }
 0x384   :  { %v1993_v37 = vpop.permute.xlu1 %1992 }
 0x385   :  { %2016 = vst.msk [vmem:[#allocation5] sm:$0xff] %vm1109_vm0, %v1993_v37  ;;  %2102 = vrot.lane.b32.xlu0 %v2079_v27, %s3152_s22 }
 0x386   :  { %2006 = vrot.lane.b32.xlu1 %v1983_v38, %s3154_s12 }
 0x389   :  { %2166 = vrot.lane.b32.xlu0 %v2143_v40, %s3153_s8 }
 0x38c   :  { %v2280_v46 = vld [vmem:[#allocation5] sm:$0xff] }
 0x38d   :  { %2230 = vrot.lane.b32.xlu0 %v2207_v42, %s3154_s12 }
 0x394   :  { %v2153_v43 = vpop.permute.xlu0 %2152 }
 0x395   :  { %v1867_v44 = vpop.permute.xlu1 %1866  ;;  %2176 = vst.msk [vmem:[#allocation5 + $0x8] sm:$0xff] %vm1044_vm15, %v2153_v43 }
 0x396   :  { %1889 = vst.msk [vmem:[#allocation5 + $0x18] sm:$0xff] %vm979_vm14, %v1867_v44 }
 0x398   :  { %v2217_v51 = vpop.permute.xlu0 %2216 }
 0x399   :  { %v1931_v52 = vpop.permute.xlu1 %1930  ;;  %2240 = vst.msk [vmem:[#allocation5 + $0x8] sm:$0xff] %vm1109_vm0, %v2217_v51 }
 0x39a   :  { %1953 = vst.msk [vmem:[#allocation5 + $0x18] sm:$0xff] %vm1044_vm15, %v1931_v52 }
 0x39c   :  { %v2091_v26 = vpop.permute.xlu0 %2090 }
 0x39d   :  { %2113 = vst.msk [vmem:[#allocation5 + $0x20] sm:$0xff] %vm979_vm14, %v2091_v26  ;;  %v1995_v56 = vpop.permute.xlu1 %1994 }
 0x39e   :  { %2017 = vst.msk [vmem:[#allocation5 + $0x18] sm:$0xff] %vm1109_vm0, %v1995_v56 }
 0x3a0   :  { %v2281_v45 = vld [vmem:[#allocation5 + $0x8] sm:$0xff] }
 0x3a1   :  { %2511 = vmatprep.mubr.bf16.mxu0 %v2281_v45 }
 0x3a2   :  { %2512 = vmatmul.mubr.bf16.vlgmr.msra.gmra.mrb[32].mxu0 %v2280_v46 }
 0x3a5   :  { %v2283_v63 = vld [vmem:[#allocation5 + $0x18] sm:$0xff] }
 0x3ac   :  { %v2155_v47 = vpop.permute.xlu0 %2154 }
 0x3ad   :  { %v1869_v28 = vpop.permute.xlu1 %1868  ;;  %2177 = vst.msk [vmem:[#allocation5 + $0x20] sm:$0xff] %vm1044_vm15, %v2155_v47 }
 0x3ae   :  { %1890 = vst.msk [vmem:[#allocation5 + $0x30] sm:$0xff] %vm979_vm14, %v1869_v28 }
 0x3b0   :  { %v2219_v58 = vpop.permute.xlu0 %2218 }
 0x3b1   :  { %v1933_v59 = vpop.permute.xlu1 %1932  ;;  %2241 = vst.msk [vmem:[#allocation5 + $0x20] sm:$0xff] %vm1109_vm0, %v2219_v58 }
 0x3b2   :  { %1954 = vst.msk [vmem:[#allocation5 + $0x30] sm:$0xff] %vm1044_vm15, %v1933_v59 }
 0x3b4   :  { %v2093_v22 = vpop.permute.xlu0 %2092 }
 0x3b5   :  { %2114 = vst.msk [vmem:[#allocation5 + $0x38] sm:$0xff] %vm979_vm14, %v2093_v22  ;;  %v1997_v60 = vpop.permute.xlu1 %1996 }
 0x3b6   :  { %2018 = vst.msk [vmem:[#allocation5 + $0x30] sm:$0xff] %vm1109_vm0, %v1997_v60  ;;  %v4154_v60 = vld [vmem:[%s4252_s6] ss:$0 sm:$0xff] }
 0x3b8   :  { %v2157_v61 = vpop.permute.xlu0 %2156  ;;  %v2284_v30 = vld [vmem:[#allocation5 + $0x20] sm:$0xff] }
 0x3b9   :  { %2178 = vst.msk [vmem:[#allocation5 + $0x38] sm:$0xff] %vm1044_vm15, %v2157_v61  ;;  %v1871_v62 = vpop.permute.xlu1 %1870  ;;  %2519 = vmatprep.mubr.bf16.mxu0 %v2284_v30 }
 0x3ba   :  { %1891 = vst.msk [vmem:[#allocation5 + $0x48] sm:$0xff] %vm979_vm14, %v1871_v62  ;;  %2520 = vmatmul.mubr.bf16.gmra.mrb[36].mxu0 %v2283_v63 }
 0x3bc   :  { %v2221_v48 = vpop.permute.xlu0 %2220 }
 0x3bd   :  { %2242 = vst.msk [vmem:[#allocation5 + $0x38] sm:$0xff] %vm1109_vm0, %v2221_v48  ;;  %v1935_v50 = vpop.permute.xlu1 %1934  ;;  %v2286_v5 = vld [vmem:[#allocation5 + $0x30] sm:$0xff] }
 0x3be   :  { %1955 = vst.msk [vmem:[#allocation5 + $0x48] sm:$0xff] %vm1044_vm15, %v1935_v50 }
 0x3c0   :  { %v2095_v32 = vpop.permute.xlu0 %2094 }
 0x3c1   :  { %2115 = vst.msk [vmem:[#allocation5 + $0x50] sm:$0xff] %vm979_vm14, %v2095_v32  ;;  %v1999_v1 = vpop.permute.xlu1 %1998 }
 0x3c2   :  { %2019 = vst.msk [vmem:[#allocation5 + $0x48] sm:$0xff] %vm1109_vm0, %v1999_v1 }
 0x3c4   :  { %v2159_v2 = vpop.permute.xlu0 %2158  ;;  %v2287_v3 = vld [vmem:[#allocation5 + $0x38] sm:$0xff] }
 0x3c5   :  { %2179 = vst.msk [vmem:[#allocation5 + $0x50] sm:$0xff] %vm1044_vm15, %v2159_v2  ;;  %v1873_v4 = vpop.permute.xlu1 %1872  ;;  %2527 = vmatprep.mubr.bf16.mxu0 %v2287_v3 }
 0x3c6   :  { %1892 = vst.msk [vmem:[#allocation5 + $0x60] sm:$0xff] %vm979_vm14, %v1873_v4  ;;  %2528 = vmatmul.mubr.bf16.gmra.mrb[40].mxu0 %v2286_v5 }
 0x3c8   :  { %v2223_v6 = vpop.permute.xlu0 %2222 }
 0x3c9   :  { %2243 = vst.msk [vmem:[#allocation5 + $0x50] sm:$0xff] %vm1109_vm0, %v2223_v6  ;;  %v1937_v7 = vpop.permute.xlu1 %1936  ;;  %v2289_v19 = vld [vmem:[#allocation5 + $0x48] sm:$0xff] }
 0x3ca   :  { %1956 = vst.msk [vmem:[#allocation5 + $0x60] sm:$0xff] %vm1044_vm15, %v1937_v7 }
 0x3cc   :  { %v2097_v55 = vpop.permute.xlu0 %2096 }
 0x3cd   :  { %2116 = vst.msk [vmem:[#allocation5 + $0x68] sm:$0xff] %vm979_vm14, %v2097_v55  ;;  %v2001_v49 = vpop.permute.xlu1 %2000 }
 0x3ce   :  { %2020 = vst.msk [vmem:[#allocation5 + $0x60] sm:$0xff] %vm1109_vm0, %v2001_v49 }
 0x3d0   :  { %v2290_v53 = vld [vmem:[#allocation5 + $0x50] sm:$0xff] }
 0x3d1   :  { %2535 = vmatprep.mubr.bf16.mxu0 %v2290_v53 }
 0x3d2   :  { %2536 = vmatmul.mubr.bf16.gmra.mrb[44].mxu0 %v2289_v19 }
 0x3d3   :  { %v2161_v54 = vpop.permute.xlu0 %2160 }
 0x3d4   :  { %v1875_v8 = vpop.permute.xlu1 %1874  ;;  %2180 = vst.msk [vmem:[#allocation5 + $0x68] sm:$0xff] %vm1044_vm15, %v2161_v54 }
 0x3d5   :  { %1893 = vst.msk [vmem:[#allocation5 + $0x78] sm:$0xff] %vm979_vm14, %v1875_v8  ;;  %v2292_v10 = vld [vmem:[#allocation5 + $0x60] sm:$0xff] }
 0x3d7   :  { %v2225_v29 = vpop.permute.xlu0 %2224 }
 0x3d8   :  { %v1939_v31 = vpop.permute.xlu1 %1938  ;;  %2244 = vst.msk [vmem:[#allocation5 + $0x68] sm:$0xff] %vm1109_vm0, %v2225_v29 }
 0x3d9   :  { %1957 = vst.msk [vmem:[#allocation5 + $0x78] sm:$0xff] %vm1044_vm15, %v1939_v31 }
 0x3db   :  { %v2099_v34 = vpop.permute.xlu0 %2098 }
 0x3dc   :  { %2117 = vst.msk [vmem:[#allocation5 + $0x80] sm:$0xff] %vm979_vm14, %v2099_v34  ;;  %v2003_v21 = vpop.permute.xlu1 %2002 }
 0x3dd   :  { %2021 = vst.msk [vmem:[#allocation5 + $0x78] sm:$0xff] %vm1109_vm0, %v2003_v21 }
 0x3df   :  { %v2293_v9 = vld [vmem:[#allocation5 + $0x68] sm:$0xff] }
 0x3e0   :  { %2543 = vmatprep.mubr.bf16.mxu0 %v2293_v9 }
 0x3e1   :  { %2544 = vmatmul.mubr.bf16.gmra.mrb[48].mxu0 %v2292_v10 }
 0x3e3   :  { %v2163_v11 = vpop.permute.xlu0 %2162 }
 0x3e4   :  { %v1877_v12 = vpop.permute.xlu1 %1876  ;;  %2181 = vst.msk [vmem:[#allocation5 + $0x80] sm:$0xff] %vm1044_vm15, %v2163_v11  ;;  %v2295_v33 = vld [vmem:[#allocation5 + $0x78] sm:$0xff] }
 0x3e5   :  { %1894 = vst.msk [vmem:[#allocation5 + $0x90] sm:$0xff] %vm979_vm14, %v1877_v12 }
 0x3e7   :  { %v2227_v13 = vpop.permute.xlu0 %2226 }
 0x3e8   :  { %v1941_v57 = vpop.permute.xlu1 %1940  ;;  %2245 = vst.msk [vmem:[#allocation5 + $0x80] sm:$0xff] %vm1109_vm0, %v2227_v13 }
 0x3e9   :  { %1958 = vst.msk [vmem:[#allocation5 + $0x90] sm:$0xff] %vm1044_vm15, %v1941_v57 }
 0x3eb   :  { %v2101_v14 = vpop.permute.xlu0 %2100 }
 0x3ec   :  { %2118 = vst.msk [vmem:[#allocation5 + $0x98] sm:$0xff] %vm979_vm14, %v2101_v14  ;;  %v2005_v16 = vpop.permute.xlu1 %2004 }
 0x3ed   :  { %2022 = vst.msk [vmem:[#allocation5 + $0x90] sm:$0xff] %vm1109_vm0, %v2005_v16 }
 0x3ef   :  { %v2165_v17 = vpop.permute.xlu0 %2164  ;;  %v2296_v23 = vld [vmem:[#allocation5 + $0x80] sm:$0xff] }
 0x3f0   :  { %2182 = vst.msk [vmem:[#allocation5 + $0x98] sm:$0xff] %vm1044_vm15, %v2165_v17  ;;  %v1879_v24 = vpop.permute.xlu1 %1878  ;;  %2551 = vmatprep.mubr.bf16.mxu0 %v2296_v23 }
 0x3f1   :  { %1895 = vst.msk [vmem:[#allocation5 + $0xa8] sm:$0xff] %vm979_vm14, %v1879_v24  ;;  %2552 = vmatmul.mubr.bf16.gmra.mrb[52].mxu0 %v2295_v33 }
 0x3f3   :  { %v2229_v18 = vpop.permute.xlu0 %2228 }
 0x3f4   :  { %2246 = vst.msk [vmem:[#allocation5 + $0x98] sm:$0xff] %vm1109_vm0, %v2229_v18  ;;  %v1943_v20 = vpop.permute.xlu1 %1942  ;;  %v2298_v0 = vld [vmem:[#allocation5 + $0x90] sm:$0xff] }
 0x3f5   :  { %1959 = vst.msk [vmem:[#allocation5 + $0xa8] sm:$0xff] %vm1044_vm15, %v1943_v20 }
 0x3f7   :  { %v2103_v35 = vpop.permute.xlu0 %2102 }
 0x3f8   :  { %2119 = vst.msk [vmem:[#allocation5 + $0xb0] sm:$0xff] %vm979_vm14, %v2103_v35  ;;  %v2007_v15 = vpop.permute.xlu1 %2006 }
 0x3f9   :  { %2023 = vst.msk [vmem:[#allocation5 + $0xa8] sm:$0xff] %vm1109_vm0, %v2007_v15 }
 0x3fb   :  { %v2167_v25 = vpop.permute.xlu0 %2166  ;;  %v2299_v36 = vld [vmem:[#allocation5 + $0x98] sm:$0xff] }
 0x3fc   :  { %2183 = vst.msk [vmem:[#allocation5 + $0xb0] sm:$0xff] %vm1044_vm15, %v2167_v25  ;;  %2559 = vmatprep.mubr.bf16.mxu0 %v2299_v36 }
 0x3fd   :  { %2560 = vmatmul.mubr.bf16.gmra.mrb[56].mxu0 %v2298_v0 }
 0x3ff   :  { %v2231_v27 = vpop.permute.xlu0 %2230 }
 0x400   :  { %2247 = vst.msk [vmem:[#allocation5 + $0xb0] sm:$0xff] %vm1109_vm0, %v2231_v27  ;;  %v2301_v38 = vld [vmem:[#allocation5 + $0xa8] sm:$0xff] }
 0x407   :  { %v2302_v37 = vld [vmem:[#allocation5 + $0xb0] sm:$0xff] }
 0x408   :  { %2567 = vmatprep.mubr.bf16.mxu0 %v2302_v37 }
 0x409   :  { %2568 = vmatmul.mubr.bf16.gmra.mrb[60].mxu0 %v2301_v38 }
 0x417   :  { %v3079_v39 = vpop.f32.mrb[32].mxu1 }
 0x418   :  { %v2610_v40 = vpop.f32.mrb[33].mxu1 }
 0x419   :  { %v3080_v41 = vpop.f32.mrb[34].mxu1 }
 0x41a   :  { %v2613_v42 = vpop.f32.mrb[35].mxu1 }
 0x41f   :  { %v4131_v43 = vpop.f32.mrb[36].mxu1 }
 0x420   :  { %v2626_v44 = vpop.f32.mrb[37].mxu1 }
 0x421   :  { %v4133_v51 = vpop.f32.mrb[38].mxu1 }
 0x422   :  { %v2629_v52 = vpop.f32.mrb[39].mxu1 }
 0x44e   :  { %v4135_v26 = vpop.f32.mrb[40].mxu1 }
 0x44f   :  { %v4137_v56 = vpop.f32.mrb[41].mxu1 }
 0x450   :  { %v4139_v45 = vpop.f32.mrb[42].mxu1 }
 0x451   :  { %v4141_v46 = vpop.f32.mrb[43].mxu1 }
 0x456   :  { %v4143_v47 = vpop.f32.mrb[44].mxu1 }
 0x457   :  { %v4145_v28 = vpop.f32.mrb[45].mxu1 }
 0x458   :  { %v4147_v58 = vpop.f32.mrb[46].mxu1 }
 0x459   :  { %v4149_v59 = vpop.f32.mrb[47].mxu1 }
 0x475   :  { %v2973_v22 = vpop.f32.mrb[32].mxu0 }
 0x476   :  { %v2974_v61 = vpop.f32.mrb[33].mxu0 }
 0x477   :  { %v2975_v30 = vadd.f32 %v2974_v61, %v2973_v22  ;;  %v2976_v62 = vpop.f32.mrb[34].mxu0 }
 0x478   :  { %v2977_v63 = vpop.f32.mrb[35].mxu0 }
 0x479   :  { %v2514_v48 = vadd.f32 %v2975_v30, %v4154_v60  ;;  %v2978_v50 = vadd.f32 %v2977_v63, %v2976_v62 }
 0x47b   :  { %v2611_v32 = vadd.f32 %v2610_v40, %v2514_v48  ;;  %v2517_v1 = vadd.f32 %v2978_v50, %v4154_v60 }
 0x47d   :  { %v2673_v2 = vmax.f32 %v2611_v32, 0.0  ;;  %v2614_v3 = vadd.f32 %v2613_v42, %v2517_v1 }
 0x47f   :  { %v2856_v4 = vpack.c.bf16 %v2673_v2, %v2673_v2  ;;  %v2674_v5 = vmax.f32 %v2614_v3, 0.0 }
 0x481   :  { %2754 = vst.msk [vmem:[%s4253_s7] sm:$0xf] %vm2753_vm1, %v2856_v4  ;;  %v2857_v6 = vpack.c.bf16 %v2674_v5, %v2674_v5 }
 0x483   :  { %2755 = vst.msk [vmem:[%s4253_s7 + $0x4] sm:$0xf] %vm2753_vm1, %v2857_v6 }
 0x48d   :  { %v2979_v7 = vpop.f32.mrb[36].mxu0 }
 0x48e   :  { %v2980_v55 = vpop.f32.mrb[37].mxu0 }
 0x48f   :  { %v2981_v49 = vadd.f32 %v2980_v55, %v2979_v7  ;;  %v2982_v53 = vpop.f32.mrb[38].mxu0 }
 0x490   :  { %v2983_v19 = vpop.f32.mrb[39].mxu0 }
 0x491   :  { %v2522_v54 = vadd.f32 %v2981_v49, %v4154_v60  ;;  %v2984_v8 = vadd.f32 %v2983_v19, %v2982_v53 }
 0x493   :  { %v2619_v29 = vadd.f32 %v3079_v39, %v2522_v54  ;;  %v2525_v31 = vadd.f32 %v2984_v8, %v4154_v60 }
 0x495   :  { %v2675_v34 = vmax.f32 %v2619_v29, 0.0  ;;  %v2622_v21 = vadd.f32 %v3080_v41, %v2525_v31 }
 0x497   :  { %v2858_v9 = vpack.c.bf16 %v2675_v34, %v2675_v34  ;;  %v2676_v10 = vmax.f32 %v2622_v21, 0.0 }
 0x499   :  { %2756 = vst.msk [vmem:[%s4253_s7 + $0x8] sm:$0xf] %vm2753_vm1, %v2858_v9  ;;  %v2859_v11 = vpack.c.bf16 %v2676_v10, %v2676_v10  ;;  %v2985_v12 = vpop.f32.mrb[40].mxu0 }
 0x49a   :  { %v2986_v13 = vpop.f32.mrb[41].mxu0 }
 0x49b   :  { %2757 = vst.msk [vmem:[%s4253_s7 + $0xc] sm:$0xf] %vm2753_vm1, %v2859_v11  ;;  %v2987_v57 = vadd.f32 %v2986_v13, %v2985_v12  ;;  %v2988_v14 = vpop.f32.mrb[42].mxu0 }
 0x49c   :  { %v2989_v16 = vpop.f32.mrb[43].mxu0 }
 0x49d   :  { %v2530_v17 = vadd.f32 %v2987_v57, %v4154_v60  ;;  %v2990_v23 = vadd.f32 %v2989_v16, %v2988_v14 }
 0x49f   :  { %v2627_v24 = vadd.f32 %v2626_v44, %v2530_v17  ;;  %v2533_v33 = vadd.f32 %v2990_v23, %v4154_v60 }
 0x4a1   :  { %v2677_v18 = vmax.f32 %v2627_v24, 0.0  ;;  %v2630_v20 = vadd.f32 %v2629_v52, %v2533_v33 }
 0x4a3   :  { %v2860_v35 = vpack.c.bf16 %v2677_v18, %v2677_v18  ;;  %v2678_v15 = vmax.f32 %v2630_v20, 0.0 }
 0x4a5   :  { %2758 = vst.msk [vmem:[%s4253_s7 + $0x10] sm:$0xf] %vm2753_vm1, %v2860_v35  ;;  %v2861_v25 = vpack.c.bf16 %v2678_v15, %v2678_v15  ;;  %v2991_v36 = vpop.f32.mrb[44].mxu0 }
 0x4a6   :  { %v2992_v0 = vpop.f32.mrb[45].mxu0 }
 0x4a7   :  { %2759 = vst.msk [vmem:[%s4253_s7 + $0x14] sm:$0xf] %vm2753_vm1, %v2861_v25  ;;  %v2993_v27 = vadd.f32 %v2992_v0, %v2991_v36  ;;  %v2994_v37 = vpop.f32.mrb[46].mxu0 }
 0x4a8   :  { %v2995_v38 = vpop.f32.mrb[47].mxu0 }
 0x4a9   :  { %v2538_v39 = vadd.f32 %v2993_v27, %v4154_v60  ;;  %v2996_v40 = vadd.f32 %v2995_v38, %v2994_v37 }
 0x4ab   :  { %v2635_v41 = vadd.f32 %v4131_v43, %v2538_v39  ;;  %v2541_v42 = vadd.f32 %v2996_v40, %v4154_v60 }
 0x4ad   :  { %v2679_v44 = vmax.f32 %v2635_v41, 0.0  ;;  %v2638_v52 = vadd.f32 %v4133_v51, %v2541_v42 }
 0x4af   :  { %v2862_v22 = vpack.c.bf16 %v2679_v44, %v2679_v44  ;;  %v2680_v61 = vmax.f32 %v2638_v52, 0.0 }
 0x4b1   :  { %2760 = vst.msk [vmem:[%s4253_s7 + $0x18] sm:$0xf] %vm2753_vm1, %v2862_v22  ;;  %v2863_v30 = vpack.c.bf16 %v2680_v61, %v2680_v61 }
 0x4b3   :  { %2761 = vst.msk [vmem:[%s4253_s7 + $0x1c] sm:$0xf] %vm2753_vm1, %v2863_v30 }
 0x4b4   :  { %v2997_v62 = vpop.f32.mrb[48].mxu0 }
 0x4b5   :  { %v2998_v43 = vpop.f32.mrb[49].mxu0 }
 0x4b6   :  { %v2999_v63 = vadd.f32 %v2998_v43, %v2997_v62  ;;  %v3000_v48 = vpop.f32.mrb[50].mxu0 }
 0x4b7   :  { %v3001_v50 = vpop.f32.mrb[51].mxu0 }
 0x4b8   :  { %v2546_v51 = vadd.f32 %v2999_v63, %v4154_v60  ;;  %v3002_v32 = vadd.f32 %v3001_v50, %v3000_v48 }
 0x4ba   :  { %v2643_v1 = vadd.f32 %v4137_v56, %v2546_v51  ;;  %v2549_v2 = vadd.f32 %v3002_v32, %v4154_v60 }
 0x4bc   :  { %v2681_v3 = vmax.f32 %v2643_v1, 0.0  ;;  %v2646_v4 = vadd.f32 %v4141_v46, %v2549_v2 }
 0x4be   :  { %v2864_v5 = vpack.c.bf16 %v2681_v3, %v2681_v3  ;;  %v2682_v6 = vmax.f32 %v2646_v4, 0.0 }
 0x4c0   :  { %2762 = vst.msk [vmem:[%s4253_s7 + $0x20] sm:$0xf] %vm2753_vm1, %v2864_v5  ;;  %v2865_v7 = vpack.c.bf16 %v2682_v6, %v2682_v6 }
 0x4c2   :  { %2763 = vst.msk [vmem:[%s4253_s7 + $0x24] sm:$0xf] %vm2753_vm1, %v2865_v7 }
 0x4c4   :  { %v3003_v55 = vpop.f32.mrb[52].mxu0 }
 0x4c5   :  { %v3004_v56 = vpop.f32.mrb[53].mxu0 }
 0x4c6   :  { %v3005_v49 = vadd.f32 %v3004_v56, %v3003_v55  ;;  %v3006_v53 = vpop.f32.mrb[54].mxu0 }
 0x4c7   :  { %v3007_v19 = vpop.f32.mrb[55].mxu0 }
 0x4c8   :  { %v2554_v46 = vadd.f32 %v3005_v49, %v4154_v60  ;;  %v3008_v54 = vadd.f32 %v3007_v19, %v3006_v53 }
 0x4ca   :  { %v2651_v8 = vadd.f32 %v4135_v26, %v2554_v46  ;;  %v2557_v29 = vadd.f32 %v3008_v54, %v4154_v60 }
 0x4cc   :  { %v2683_v31 = vmax.f32 %v2651_v8, 0.0  ;;  %v2654_v34 = vadd.f32 %v4139_v45, %v2557_v29 }
 0x4ce   :  { %v2866_v21 = vpack.c.bf16 %v2683_v31, %v2683_v31  ;;  %v2684_v9 = vmax.f32 %v2654_v34, 0.0 }
 0x4d0   :  { %2764 = vst.msk [vmem:[%s4253_s7 + $0x28] sm:$0xf] %vm2753_vm1, %v2866_v21  ;;  %v2867_v10 = vpack.c.bf16 %v2684_v9, %v2684_v9  ;;  %v3009_v11 = vpop.f32.mrb[56].mxu0 }
 0x4d1   :  { %v3010_v12 = vpop.f32.mrb[57].mxu0 }
 0x4d2   :  { %2765 = vst.msk [vmem:[%s4253_s7 + $0x2c] sm:$0xf] %vm2753_vm1, %v2867_v10  ;;  %v3011_v26 = vadd.f32 %v3010_v12, %v3009_v11  ;;  %v3012_v13 = vpop.f32.mrb[58].mxu0 }
 0x4d3   :  { %v3013_v57 = vpop.f32.mrb[59].mxu0 }
 0x4d4   :  { %v2562_v45 = vadd.f32 %v3011_v26, %v4154_v60  ;;  %v3014_v14 = vadd.f32 %v3013_v57, %v3012_v13 }
 0x4d6   :  { %v2659_v16 = vadd.f32 %v4145_v28, %v2562_v45  ;;  %v2565_v17 = vadd.f32 %v3014_v14, %v4154_v60 }
 0x4d8   :  { %v2685_v23 = vmax.f32 %v2659_v16, 0.0  ;;  %v2662_v24 = vadd.f32 %v4149_v59, %v2565_v17 }
 0x4da   :  { %v2868_v33 = vpack.c.bf16 %v2685_v23, %v2685_v23  ;;  %v2686_v18 = vmax.f32 %v2662_v24, 0.0 }
 0x4dc   :  { %2766 = vst.msk [vmem:[%s4253_s7 + $0x30] sm:$0xf] %vm2753_vm1, %v2868_v33  ;;  %v2869_v20 = vpack.c.bf16 %v2686_v18, %v2686_v18  ;;  %v3015_v35 = vpop.f32.mrb[60].mxu0 }
 0x4dd   :  { %v3016_v15 = vpop.f32.mrb[61].mxu0 }
 0x4de   :  { %2767 = vst.msk [vmem:[%s4253_s7 + $0x34] sm:$0xf] %vm2753_vm1, %v2869_v20  ;;  %v3017_v28 = vadd.f32 %v3016_v15, %v3015_v35  ;;  %v3018_v25 = vpop.f32.mrb[62].mxu0 }
 0x4df   :  { %v3019_v36 = vpop.f32.mrb[63].mxu0 }
 0x4e0   :  { %v2570_v59 = vadd.f32 %v3017_v28, %v4154_v60  ;;  %v3020_v0 = vadd.f32 %v3019_v36, %v3018_v25 }
 0x4e2   :  { %v2667_v27 = vadd.f32 %v4143_v47, %v2570_v59  ;;  %v2573_v37 = vadd.f32 %v3020_v0, %v4154_v60 }
 0x4e4   :  { %v2687_v38 = vmax.f32 %v2667_v27, 0.0  ;;  %v2670_v39 = vadd.f32 %v4147_v58, %v2573_v37 }
 0x4e6   :  { %v2870_v40 = vpack.c.bf16 %v2687_v38, %v2687_v38  ;;  %v2688_v41 = vmax.f32 %v2670_v39, 0.0 }
 0x4e8   :  { %2768 = vst.msk [vmem:[%s4253_s7 + $0x38] sm:$0xf] %vm2753_vm1, %v2870_v40  ;;  %v2871_v42 = vpack.c.bf16 %v2688_v41, %v2688_v41 }
 0x4ea   :  { %2769 = vst.msk [vmem:[%s4253_s7 + $0x3c] sm:$0xf] %vm2753_vm1, %v2871_v42 }

</bundles_post_ra>
